<compile_context>
chip_gen: v7x
topology: tpu7x:2x2x1
jax: 0.10.0
libtpu: 0.0.40
codegen_flags: <defaults>
</compile_context>

<pallas_src>
import functools

import numpy as np

import jax
import jax.numpy as jnp
from jax.experimental import pallas as pl
from jax.experimental.pallas import tpu as pltpu


# ----------------------------------------------------------------------------
# Pallas kernel: fused (transposed) matmul + bias + activation
#   out[N, M] = act( W[N, K] @ P[K, M] + b[N, 1] )
# ----------------------------------------------------------------------------
def _mm_bias_act_kernel(w_ref, p_ref, b_ref, o_ref, *, act):
    acc = jnp.dot(w_ref[...], p_ref[...], preferred_element_type=jnp.float32)
    acc = acc + b_ref[...]                       # [N, 1] broadcast over lanes (f32)
    if act == "relu":
        acc = jnp.maximum(acc, 0.0)
    elif act == "sigmoid":
        acc = 1.0 / (1.0 + jnp.exp(-acc))        # exact sigmoid (EUP exp + divide)
    o_ref[...] = acc.astype(o_ref.dtype)


def _pick_tm(M):
    """Largest lane tile (>=128) that divides M with at least 2 grid steps."""
    for cand in (8192, 4096, 2048, 1024, 512, 256, 128):
        if M % cand == 0 and M // cand >= 2:
            return cand
    return M


def matmul_bias_act_t(w, p, b, act, out_dtype):
    """w: [N, K] (bf16), p: [K, M], b: [N, 1] (f32) -> [N, M] lane-dense output.

    Grid strategy:
      * M >= 256: tile the lane (M) dimension -> weights resident, P streamed.
      * otherwise (M == 128 at B=2): split the rows (N) in two so both v7x
        TensorCores get work while keeping the full-128 lane-dense stores.
    """
    N, K = w.shape
    K2, M = p.shape
    assert K == K2, (K, K2)
    kernel = functools.partial(_mm_bias_act_kernel, act=act)

    tm = _pick_tm(M)
    if tm < M:                                   # lane-tiled path
        grid = (M // tm,)
        in_specs = [
            pl.BlockSpec((N, K), lambda i: (0, 0)),     # weights stay resident
            pl.BlockSpec((K, tm), lambda i: (0, i)),    # lane-dense patch tile
            pl.BlockSpec((N, 1), lambda i: (0, 0)),     # bias
        ]
        out_specs = pl.BlockSpec((N, tm), lambda i: (0, i))
        semantics = ("parallel",)
    elif N % 16 == 0:                            # row-split path (M too small)
        tn = N // 2
        grid = (2,)
        in_specs = [
            pl.BlockSpec((tn, K), lambda i: (i, 0)),
            pl.BlockSpec((K, M), lambda i: (0, 0)),
            pl.BlockSpec((tn, 1), lambda i: (i, 0)),
        ]
        out_specs = pl.BlockSpec((tn, M), lambda i: (i, 0))
        semantics = ("parallel",)
    else:                                        # tiny fallback
        grid = (1,)
        in_specs = [
            pl.BlockSpec((N, K), lambda i: (0, 0)),
            pl.BlockSpec((K, M), lambda i: (0, 0)),
            pl.BlockSpec((N, 1), lambda i: (0, 0)),
        ]
        out_specs = pl.BlockSpec((N, M), lambda i: (0, 0))
        semantics = ("arbitrary",)

    return pl.pallas_call(
        kernel,
        out_shape=jax.ShapeDtypeStruct((N, M), out_dtype),
        grid_spec=pltpu.PrefetchScalarGridSpec(
            num_scalar_prefetch=0,
            grid=grid,
            in_specs=in_specs,
            out_specs=out_specs,
        ),
        compiler_params=pltpu.CompilerParams(
            dimension_semantics=semantics,
            vmem_limit_bytes=32 * 1024 * 1024,
        ),
    )(w, p.astype(w.dtype), b)


# ----------------------------------------------------------------------------
# Pallas kernel: fused encode_fc -> decode_fc (latent never leaves VMEM).
# decode_fc weight / bias / output are streamed over the grid in lane chunks so
# the ~1 MB decode-weight DMA and the output writeback are pipelined.
# ----------------------------------------------------------------------------
def _fc_fused_kernel(x_ref, w1_ref, b1_ref, w2_ref, b2_ref, o_ref, lat_ref):
    @pl.when(pl.program_id(0) == 0)
    def _():
        lat_ref[...] = (
            jnp.dot(x_ref[...], w1_ref[...], preferred_element_type=jnp.float32)
            + b1_ref[...]
        )
    out = jnp.dot(lat_ref[...].astype(w2_ref.dtype), w2_ref[...],
                  preferred_element_type=jnp.float32) + b2_ref[...]
    o_ref[...] = out.astype(o_ref.dtype)


def fc_fused(flat, w1, b1, w2, b2, out_dtype):
    B, K1 = flat.shape
    _, L = w1.shape
    _, K2 = w2.shape
    # stream decode_fc output in 4 lane chunks when it divides cleanly
    tn = K2 // 4 if (K2 % 4 == 0 and (K2 // 4) % 128 == 0) else K2
    grid = (K2 // tn,)
    return pl.pallas_call(
        _fc_fused_kernel,
        out_shape=jax.ShapeDtypeStruct((B, K2), out_dtype),
        grid_spec=pltpu.PrefetchScalarGridSpec(
            num_scalar_prefetch=0,
            grid=grid,
            in_specs=[
                pl.BlockSpec((B, K1), lambda i: (0, 0)),   # flattened features
                pl.BlockSpec((K1, L), lambda i: (0, 0)),   # encode_fc weight (resident)
                pl.BlockSpec((1, L), lambda i: (0, 0)),    # encode_fc bias
                pl.BlockSpec((L, tn), lambda i: (0, i)),   # decode_fc weight chunk
                pl.BlockSpec((1, tn), lambda i: (0, i)),   # decode_fc bias chunk
            ],
            out_specs=pl.BlockSpec((B, tn), lambda i: (0, i)),
            scratch_shapes=[pltpu.VMEM((B, L), jnp.float32)],   # latent
        ),
        compiler_params=pltpu.CompilerParams(
            dimension_semantics=("arbitrary",),   # step 0 produces the latent
            vmem_limit_bytes=32 * 1024 * 1024,
        ),
    )(flat.astype(w1.dtype), w1, b1, w2, b2)


# ----------------------------------------------------------------------------
# Layer glue (channel-major [C, B, H, W]; pure data movement in XLA)
# ----------------------------------------------------------------------------
def conv_s2_cm(x_cm, w_mat, b, act, out_dtype):
    """Conv2d(k=4, stride=2, pad=1), channel-major in/out.

    x_cm: [C_in, B, H, W];  w_mat: [C_out, 16*C_in] with (ki, kj, ci) ordering.
    The padded input is split once into its 4 spatial parity phases; the 16
    im2col taps are then contiguous shifted views of those phases.
    """
    C_in, B, H, W = x_cm.shape
    OH, OW = H // 2, W // 2
    xp = jnp.pad(x_cm, ((0, 0), (0, 0), (1, 1), (1, 1)))
    # parity phases of the padded input: ph[p][q][i, j] = xp[2i+p, 2j+q]
    ph = [[xp[:, :, p::2, q::2] for q in range(2)] for p in range(2)]
    # tap (ki, kj): xp[2oh+ki, 2ow+kj] = ph[ki%2][kj%2][oh + ki//2, ow + kj//2]
    taps = [
        ph[ki % 2][kj % 2][:, :, ki // 2: ki // 2 + OH, kj // 2: kj // 2 + OW]
        for ki in range(4) for kj in range(4)
    ]
    p = jnp.stack(taps, axis=0).reshape(16 * C_in, B * OH * OW)
    y = matmul_bias_act_t(w_mat, p, b, act, out_dtype)        # [C_out, B*OH*OW]
    return y.reshape(-1, B, OH, OW)


def deconv_s2_cm(x_cm, w_mat, b, act, out_dtype):
    """ConvTranspose2d(k=4, stride=2, pad=1) via 4-phase sub-pixel decomposition.

    x_cm: [C_in, B, H, W];  w_mat: [4*C_out, 9*C_in]  (rows = (r, s, co),
    cols = (di, dj, ci) over a 3x3 stride-1 window, zero-padded taps).
    """
    C_in, B, H, W = x_cm.shape
    xp = jnp.pad(x_cm, ((0, 0), (0, 0), (1, 1), (1, 1)))
    taps = [xp[:, :, di:di + H, dj:dj + W] for di in range(3) for dj in range(3)]
    p = jnp.stack(taps, axis=0).reshape(9 * C_in, B * H * W)
    yp = matmul_bias_act_t(w_mat, p, b, act, out_dtype)       # [4*C_out, B*H*W]
    C_out = yp.shape[0] // 4
    y = yp.reshape(2, 2, C_out, B, H, W)
    # out[co, b, 2*ih + r, 2*iw + s] = y[r, s, co, b, ih, iw]  (pixel shuffle)
    # TODO(synk): this stays as an XLA transpose; an in-kernel lane interleave
    #             would need a stride-2 scatter along the lane dim.
    y = jnp.transpose(y, (2, 3, 4, 0, 5, 1)).reshape(C_out, B, 2 * H, 2 * W)
    return y


# ----------------------------------------------------------------------------
# Parameter init + one-time weight packing (transpose / phase split / bf16 cast)
# ----------------------------------------------------------------------------
def _pack_conv_weight(w_oihw):
    """torch Conv2d weight [C_out, C_in, 4, 4] -> [C_out, 16*C_in] (ki, kj, ci)."""
    C_out, C_in = w_oihw.shape[0], w_oihw.shape[1]
    return jnp.transpose(w_oihw, (0, 2, 3, 1)).reshape(C_out, 16 * C_in)


def _pack_deconv_weight(w_iohw):
    """torch ConvTranspose2d weight [C_in, C_out, 4, 4] -> [4*C_out, 9*C_in].

    Sub-pixel decomposition: output phase (r, s) at input location (ih, iw)
    reads the 3x3 window Xpad[ih + di, iw + dj]; only the (r, di) / (s, dj)
    pairs below carry a kernel tap, the rest of the combined matrix is zero.
    """
    w = np.asarray(w_iohw, dtype=np.float32)
    C_in, C_out = w.shape[0], w.shape[1]
    kmap = {(0, 0): 3, (0, 1): 1, (1, 1): 2, (1, 2): 0}   # (phase, window) -> k index
    Wc = np.zeros((4 * C_out, 9 * C_in), np.float32)
    for r in range(2):
        for s in range(2):
            for di in range(3):
                for dj in range(3):
                    if (r, di) in kmap and (s, dj) in kmap:
                        kh, kw = kmap[(r, di)], kmap[(s, dj)]
                        Wc[(2 * r + s) * C_out:(2 * r + s + 1) * C_out,
                           (3 * di + dj) * C_in:(3 * di + dj + 1) * C_in] = w[:, :, kh, kw].T
    return jnp.asarray(Wc)


def init_params(key, input_channels=1, latent_dim=128):
    ks = jax.random.split(key, 16)

    def u(k, shape, fan_in):
        bound = 1.0 / jnp.sqrt(fan_in)
        return jax.random.uniform(k, shape, jnp.float32, -bound, bound)

    p = {}
    # encoder convs: Conv2d(in, out, 4, stride=2, padding=1)
    enc_defs = [(16, input_channels), (32, 16), (64, 32)]
    for n, (co, ci) in enumerate(enc_defs, start=1):
        w = u(ks[2 * (n - 1)], (co, ci, 4, 4), ci * 16)
        b = u(ks[2 * (n - 1) + 1], (co,), ci * 16)
        p[f"enc{n}_w"] = _pack_conv_weight(w).astype(jnp.bfloat16)
        p[f"enc{n}_b"] = b.reshape(co, 1)
    # FC layers (stored as [in, out])
    p["fc_enc_w"] = u(ks[6], (8 * 8 * 64, latent_dim), 8 * 8 * 64).astype(jnp.bfloat16)
    p["fc_enc_b"] = u(ks[7], (latent_dim,), 8 * 8 * 64).reshape(1, latent_dim)
    p["fc_dec_w"] = u(ks[8], (latent_dim, 8 * 8 * 64), latent_dim).astype(jnp.bfloat16)
    p["fc_dec_b"] = u(ks[9], (8 * 8 * 64,), latent_dim).reshape(1, 8 * 8 * 64)
    # decoder conv-transposes: ConvTranspose2d(in, out, 4, 2, 1)
    dec_defs = [(64, 32), (32, 16), (16, input_channels)]
    for n, (ci, co) in enumerate(dec_defs, start=1):
        w = u(ks[10 + 2 * (n - 1)], (ci, co, 4, 4), ci * 16)
        b = u(ks[10 + 2 * (n - 1) + 1], (co,), ci * 16)
        p[f"dec{n}_w"] = _pack_deconv_weight(w).astype(jnp.bfloat16)
        p[f"dec{n}_b"] = jnp.tile(b, 4).reshape(4 * co, 1)
    return p


# ----------------------------------------------------------------------------
# Forward pass (matches LightweightAutoencoder.forward)
# ----------------------------------------------------------------------------
@jax.jit
def lightweight_autoencoder_forward(params, x_nchw):
    B = x_nchw.shape[0]
    # NCHW -> channel-major [C, B, H, W], bf16 activations between layers
    x = jnp.transpose(x_nchw.astype(jnp.bfloat16), (1, 0, 2, 3))

    # encoder: 3x (conv 4x4 s2 p1 + ReLU)   64 -> 32 -> 16 -> 8
    x = conv_s2_cm(x, params["enc1_w"], params["enc1_b"], "relu", jnp.bfloat16)
    x = conv_s2_cm(x, params["enc2_w"], params["enc2_b"], "relu", jnp.bfloat16)
    x = conv_s2_cm(x, params["enc3_w"], params["enc3_b"], "relu", jnp.bfloat16)  # [64, B, 8, 8]

    # flatten in torch (c, h, w) order, fused encode_fc -> decode_fc
    flat = jnp.transpose(x, (1, 0, 2, 3)).reshape(B, 64 * 8 * 8)
    dec_flat = fc_fused(flat, params["fc_enc_w"], params["fc_enc_b"],
                        params["fc_dec_w"], params["fc_dec_b"], jnp.bfloat16)

    # view(batch, 64, 8, 8) -> channel-major for the decoder
    y = jnp.transpose(dec_flat.reshape(B, 64, 8, 8), (1, 0, 2, 3))

    # decoder: 3x (conv-transpose 4x4 s2 p1), ReLU, ReLU, Sigmoid
    y = deconv_s2_cm(y, params["dec1_w"], params["dec1_b"], "relu", jnp.bfloat16)
    y = deconv_s2_cm(y, params["dec2_w"], params["dec2_b"], "relu", jnp.bfloat16)
    y = deconv_s2_cm(y, params["dec3_w"], params["dec3_b"], "sigmoid", jnp.float32)

    return jnp.transpose(y, (1, 0, 2, 3))  # back to NCHW, f32


if __name__ == "__main__":
    key = jax.random.PRNGKey(0)
    pkey, xkey = jax.random.split(key)
    params = init_params(pkey, input_channels=1, latent_dim=128)

    # encode_fc expects 8*8*64 => input spatial must be 64x64 (three stride-2 convs)
    x = jax.random.uniform(xkey, (2, 1, 64, 64), jnp.float32)

    out = lightweight_autoencoder_forward(params, x)
    out = jax.block_until_ready(out)

    assert out.shape == (2, 1, 64, 64), out.shape
    assert out.dtype == jnp.float32
    assert bool(jnp.all((out >= 0.0) & (out <= 1.0)))  # sigmoid output range
    assert bool(jnp.all(jnp.isfinite(out)))
    print("KERNEL_OK")
</pallas_src>

<mosaic_0001>
module attributes {stable_mosaic.version = 11 : i64} {
  func.func @_mm_bias_act_kernel(%arg0: i32, %arg1: memref<16x16xbf16, #tpu.memory_space<vmem>>, %arg2: memref<16x1024xbf16, #tpu.memory_space<vmem>>, %arg3: memref<16x1xf32, #tpu.memory_space<vmem>>, %arg4: memref<16x1024xbf16, #tpu.memory_space<vmem>>) attributes {dimension_semantics = [#tpu.dimension_semantics<parallel>], iteration_bounds = array<i64: 2>, scalar_prefetch = 0 : i64, scratch_operands = 0 : i64, tpu.core_type = #tpu.core_type<tc>, window_params = [{pipeline_mode = #tpu.pipeline_mode<synchronous>, transform_indices = @transform_0, window_bounds = array<i64: 16, 16>}, {transform_indices = @transform_1, window_bounds = array<i64: 16, 1024>}, {pipeline_mode = #tpu.pipeline_mode<synchronous>, transform_indices = @transform_2, window_bounds = array<i64: 16, 1>}, {transform_indices = @transform_3, window_bounds = array<i64: 16, 1024>}]} {
    %c0 = arith.constant 0 : index
    %c0_0 = arith.constant 0 : index
    %0 = vector.load %arg1[%c0, %c0_0] : memref<16x16xbf16, #tpu.memory_space<vmem>>, vector<16x16xbf16>
    %c0_1 = arith.constant 0 : index
    %c0_2 = arith.constant 0 : index
    %1 = vector.load %arg2[%c0_1, %c0_2] : memref<16x1024xbf16, #tpu.memory_space<vmem>>, vector<16x1024xbf16>
    %cst = arith.constant dense<0.000000e+00> : vector<16x1024xf32>
    %2 = tpu.matmul %0, %1, %cst {dimension_numbers = #tpu.dot_dimension_numbers<[1], [0], [0], [1], [0, 0, 1, 1], [], []>} : vector<16x16xbf16>, vector<16x1024xbf16>, vector<16x1024xf32> -> vector<16x1024xf32>
    %c0_3 = arith.constant 0 : index
    %c0_4 = arith.constant 0 : index
    %3 = vector.load %arg3[%c0_3, %c0_4] : memref<16x1xf32, #tpu.memory_space<vmem>>, vector<16x1xf32>
    %4 = vector.broadcast %3 : vector<16x1xf32> to vector<16x1024xf32>
    %5 = arith.addf %2, %4 : vector<16x1024xf32>
    %cst_5 = arith.constant 0.000000e+00 : f32
    %6 = vector.broadcast %cst_5 : f32 to vector<16x1024xf32>
    %7 = arith.maximumf %5, %6 : vector<16x1024xf32>
    %8 = arith.truncf %7 : vector<16x1024xf32> to vector<16x1024xbf16>
    %c0_6 = arith.constant 0 : index
    %c0_7 = arith.constant 0 : index
    %9 = vector.load %arg4[%c0_6, %c0_7] : memref<16x1024xbf16, #tpu.memory_space<vmem>>, vector<16x1024xbf16>
    tpu.vector_store %arg4[%c0_6, %c0_7], %8 {strides = array<i32>} : memref<16x1024xbf16, #tpu.memory_space<vmem>>, vector<16x1024xbf16>,
    return
  }
  func.func @transform_0(%arg0: i32) -> (i32, i32) {
    %c0_i32 = arith.constant 0 : i32
    %c0_i32_0 = arith.constant 0 : i32
    %c0_i32_1 = arith.constant 0 : i32
    return %c0_i32, %c0_i32_0 : i32, i32
  }
  func.func @transform_1(%arg0: i32) -> (i32, i32) {
    %c0_i32 = arith.constant 0 : i32
    %c0_i32_0 = arith.constant 0 : i32
    return %c0_i32, %arg0 : i32, i32
  }
  func.func @transform_2(%arg0: i32) -> (i32, i32) {
    %c0_i32 = arith.constant 0 : i32
    %c0_i32_0 = arith.constant 0 : i32
    %c0_i32_1 = arith.constant 0 : i32
    return %c0_i32, %c0_i32_0 : i32, i32
  }
  func.func @transform_3(%arg0: i32) -> (i32, i32) {
    %c0_i32 = arith.constant 0 : i32
    %c0_i32_0 = arith.constant 0 : i32
    return %c0_i32, %arg0 : i32, i32
  }
}

module attributes {stable_mosaic.version = 11 : i64} {
  func.func @_mm_bias_act_kernel(%arg0: i32, %arg1: memref<32x256xbf16, #tpu.memory_space<vmem>>, %arg2: memref<256x256xbf16, #tpu.memory_space<vmem>>, %arg3: memref<32x1xf32, #tpu.memory_space<vmem>>, %arg4: memref<32x256xbf16, #tpu.memory_space<vmem>>) attributes {dimension_semantics = [#tpu.dimension_semantics<parallel>], iteration_bounds = array<i64: 2>, scalar_prefetch = 0 : i64, scratch_operands = 0 : i64, tpu.core_type = #tpu.core_type<tc>, window_params = [{pipeline_mode = #tpu.pipeline_mode<synchronous>, transform_indices = @transform_0, window_bounds = array<i64: 32, 256>}, {transform_indices = @transform_1, window_bounds = array<i64: 256, 256>}, {pipeline_mode = #tpu.pipeline_mode<synchronous>, transform_indices = @transform_2, window_bounds = array<i64: 32, 1>}, {transform_indices = @transform_3, window_bounds = array<i64: 32, 256>}]} {
    %c0 = arith.constant 0 : index
    %c0_0 = arith.constant 0 : index
    %0 = vector.load %arg1[%c0, %c0_0] : memref<32x256xbf16, #tpu.memory_space<vmem>>, vector<32x256xbf16>
    %c0_1 = arith.constant 0 : index
    %c0_2 = arith.constant 0 : index
    %1 = vector.load %arg2[%c0_1, %c0_2] : memref<256x256xbf16, #tpu.memory_space<vmem>>, vector<256x256xbf16>
    %cst = arith.constant dense<0.000000e+00> : vector<32x256xf32>
    %2 = tpu.matmul %0, %1, %cst {dimension_numbers = #tpu.dot_dimension_numbers<[1], [0], [0], [1], [0, 0, 1, 1], [], []>} : vector<32x256xbf16>, vector<256x256xbf16>, vector<32x256xf32> -> vector<32x256xf32>
    %c0_3 = arith.constant 0 : index
    %c0_4 = arith.constant 0 : index
    %3 = vector.load %arg3[%c0_3, %c0_4] : memref<32x1xf32, #tpu.memory_space<vmem>>, vector<32x1xf32>
    %4 = vector.broadcast %3 : vector<32x1xf32> to vector<32x256xf32>
    %5 = arith.addf %2, %4 : vector<32x256xf32>
    %cst_5 = arith.constant 0.000000e+00 : f32
    %6 = vector.broadcast %cst_5 : f32 to vector<32x256xf32>
    %7 = arith.maximumf %5, %6 : vector<32x256xf32>
    %8 = arith.truncf %7 : vector<32x256xf32> to vector<32x256xbf16>
    %c0_6 = arith.constant 0 : index
    %c0_7 = arith.constant 0 : index
    %9 = vector.load %arg4[%c0_6, %c0_7] : memref<32x256xbf16, #tpu.memory_space<vmem>>, vector<32x256xbf16>
    tpu.vector_store %arg4[%c0_6, %c0_7], %8 {strides = array<i32>} : memref<32x256xbf16, #tpu.memory_space<vmem>>, vector<32x256xbf16>,
    return
  }
  func.func @transform_0(%arg0: i32) -> (i32, i32) {
    %c0_i32 = arith.constant 0 : i32
    %c0_i32_0 = arith.constant 0 : i32
    %c0_i32_1 = arith.constant 0 : i32
    return %c0_i32, %c0_i32_0 : i32, i32
  }
  func.func @transform_1(%arg0: i32) -> (i32, i32) {
    %c0_i32 = arith.constant 0 : i32
    %c0_i32_0 = arith.constant 0 : i32
    return %c0_i32, %arg0 : i32, i32
  }
  func.func @transform_2(%arg0: i32) -> (i32, i32) {
    %c0_i32 = arith.constant 0 : i32
    %c0_i32_0 = arith.constant 0 : i32
    %c0_i32_1 = arith.constant 0 : i32
    return %c0_i32, %c0_i32_0 : i32, i32
  }
  func.func @transform_3(%arg0: i32) -> (i32, i32) {
    %c0_i32 = arith.constant 0 : i32
    %c0_i32_0 = arith.constant 0 : i32
    return %c0_i32, %arg0 : i32, i32
  }
}

module attributes {stable_mosaic.version = 11 : i64} {
  func.func @_mm_bias_act_kernel(%arg0: i32, %arg1: memref<32x512xbf16, #tpu.memory_space<vmem>>, %arg2: memref<512x128xbf16, #tpu.memory_space<vmem>>, %arg3: memref<32x1xf32, #tpu.memory_space<vmem>>, %arg4: memref<32x128xbf16, #tpu.memory_space<vmem>>) attributes {dimension_semantics = [#tpu.dimension_semantics<parallel>], iteration_bounds = array<i64: 2>, scalar_prefetch = 0 : i64, scratch_operands = 0 : i64, tpu.core_type = #tpu.core_type<tc>, window_params = [{transform_indices = @transform_0, window_bounds = array<i64: 32, 512>}, {pipeline_mode = #tpu.pipeline_mode<synchronous>, transform_indices = @transform_1, window_bounds = array<i64: 512, 128>}, {transform_indices = @transform_2, window_bounds = array<i64: 32, 1>}, {transform_indices = @transform_3, window_bounds = array<i64: 32, 128>}]} {
    %c0 = arith.constant 0 : index
    %c0_0 = arith.constant 0 : index
    %0 = vector.load %arg1[%c0, %c0_0] : memref<32x512xbf16, #tpu.memory_space<vmem>>, vector<32x512xbf16>
    %c0_1 = arith.constant 0 : index
    %c0_2 = arith.constant 0 : index
    %1 = vector.load %arg2[%c0_1, %c0_2] : memref<512x128xbf16, #tpu.memory_space<vmem>>, vector<512x128xbf16>
    %cst = arith.constant dense<0.000000e+00> : vector<32x128xf32>
    %2 = tpu.matmul %0, %1, %cst {dimension_numbers = #tpu.dot_dimension_numbers<[1], [0], [0], [1], [0, 0, 1, 1], [], []>} : vector<32x512xbf16>, vector<512x128xbf16>, vector<32x128xf32> -> vector<32x128xf32>
    %c0_3 = arith.constant 0 : index
    %c0_4 = arith.constant 0 : index
    %3 = vector.load %arg3[%c0_3, %c0_4] : memref<32x1xf32, #tpu.memory_space<vmem>>, vector<32x1xf32>
    %4 = vector.broadcast %3 : vector<32x1xf32> to vector<32x128xf32>
    %5 = arith.addf %2, %4 : vector<32x128xf32>
    %cst_5 = arith.constant 0.000000e+00 : f32
    %6 = vector.broadcast %cst_5 : f32 to vector<32x128xf32>
    %7 = arith.maximumf %5, %6 : vector<32x128xf32>
    %8 = arith.truncf %7 : vector<32x128xf32> to vector<32x128xbf16>
    %c0_6 = arith.constant 0 : index
    %c0_7 = arith.constant 0 : index
    %9 = vector.load %arg4[%c0_6, %c0_7] : memref<32x128xbf16, #tpu.memory_space<vmem>>, vector<32x128xbf16>
    tpu.vector_store %arg4[%c0_6, %c0_7], %8 {strides = array<i32>} : memref<32x128xbf16, #tpu.memory_space<vmem>>, vector<32x128xbf16>,
    return
  }
  func.func @transform_0(%arg0: i32) -> (i32, i32) {
    %c0_i32 = arith.constant 0 : i32
    %c0_i32_0 = arith.constant 0 : i32
    return %arg0, %c0_i32 : i32, i32
  }
  func.func @transform_1(%arg0: i32) -> (i32, i32) {
    %c0_i32 = arith.constant 0 : i32
    %c0_i32_0 = arith.constant 0 : i32
    %c0_i32_1 = arith.constant 0 : i32
    return %c0_i32, %c0_i32_0 : i32, i32
  }
  func.func @transform_2(%arg0: i32) -> (i32, i32) {
    %c0_i32 = arith.constant 0 : i32
    %c0_i32_0 = arith.constant 0 : i32
    return %arg0, %c0_i32 : i32, i32
  }
  func.func @transform_3(%arg0: i32) -> (i32, i32) {
    %c0_i32 = arith.constant 0 : i32
    %c0_i32_0 = arith.constant 0 : i32
    return %arg0, %c0_i32 : i32, i32
  }
}

module attributes {stable_mosaic.version = 11 : i64} {
  func.func @_fc_fused_kernel(%arg0: i32, %arg1: memref<2x4096xbf16, #tpu.memory_space<vmem>>, %arg2: memref<4096x128xbf16, #tpu.memory_space<vmem>>, %arg3: memref<1x128xf32, #tpu.memory_space<vmem>>, %arg4: memref<128x1024xbf16, #tpu.memory_space<vmem>>, %arg5: memref<1x1024xf32, #tpu.memory_space<vmem>>, %arg6: memref<2x1024xbf16, #tpu.memory_space<vmem>>, %arg7: memref<2x128xf32, #tpu.memory_space<vmem>>) attributes {dimension_semantics = [#tpu.dimension_semantics<arbitrary>], iteration_bounds = array<i64: 4>, scalar_prefetch = 0 : i64, scratch_operands = 1 : i64, tpu.core_type = #tpu.core_type<tc>, window_params = [{pipeline_mode = #tpu.pipeline_mode<synchronous>, transform_indices = @transform_0, window_bounds = array<i64: 2, 4096>}, {pipeline_mode = #tpu.pipeline_mode<synchronous>, transform_indices = @transform_1, window_bounds = array<i64: 4096, 128>}, {pipeline_mode = #tpu.pipeline_mode<synchronous>, transform_indices = @transform_2, window_bounds = array<i64: 1, 128>}, {transform_indices = @transform_3, window_bounds = array<i64: 128, 1024>}, {transform_indices = @transform_4, window_bounds = array<i64: 1, 1024>}, {transform_indices = @transform_5, window_bounds = array<i64: 2, 1024>}]} {
    %c0_i32 = arith.constant 0 : i32
    %0 = arith.cmpi eq, %arg0, %c0_i32 : i32
    %1 = arith.extui %0 : i1 to i32
    %c0_i32_0 = arith.constant 0 : i32
    %2 = arith.cmpi ne, %1, %c0_i32_0 : i32
    scf.if %2 {
      %c0_8 = arith.constant 0 : index
      %c0_9 = arith.constant 0 : index
      %12 = vector.load %arg1[%c0_8, %c0_9] : memref<2x4096xbf16, #tpu.memory_space<vmem>>, vector<2x4096xbf16>
      %c0_10 = arith.constant 0 : index
      %c0_11 = arith.constant 0 : index
      %13 = vector.load %arg2[%c0_10, %c0_11] : memref<4096x128xbf16, #tpu.memory_space<vmem>>, vector<4096x128xbf16>
      %cst_12 = arith.constant dense<0.000000e+00> : vector<2x128xf32>
      %14 = tpu.matmul %12, %13, %cst_12 {dimension_numbers = #tpu.dot_dimension_numbers<[1], [0], [0], [1], [0, 0, 1, 1], [], []>} : vector<2x4096xbf16>, vector<4096x128xbf16>, vector<2x128xf32> -> vector<2x128xf32>
      %c0_13 = arith.constant 0 : index
      %c0_14 = arith.constant 0 : index
      %15 = vector.load %arg3[%c0_13, %c0_14] : memref<1x128xf32, #tpu.memory_space<vmem>>, vector<1x128xf32>
      %16 = vector.broadcast %15 : vector<1x128xf32> to vector<2x128xf32>
      %17 = arith.addf %14, %16 : vector<2x128xf32>
      %c0_15 = arith.constant 0 : index
      %c0_16 = arith.constant 0 : index
      %18 = vector.load %arg7[%c0_15, %c0_16] : memref<2x128xf32, #tpu.memory_space<vmem>>, vector<2x128xf32>
      tpu.vector_store %arg7[%c0_15, %c0_16], %17 {strides = array<i32>} : memref<2x128xf32, #tpu.memory_space<vmem>>, vector<2x128xf32>,
    } else {
    }
    %c0 = arith.constant 0 : index
    %c0_1 = arith.constant 0 : index
    %3 = vector.load %arg7[%c0, %c0_1] : memref<2x128xf32, #tpu.memory_space<vmem>>, vector<2x128xf32>
    %4 = arith.truncf %3 : vector<2x128xf32> to vector<2x128xbf16>
    %c0_2 = arith.constant 0 : index
    %c0_3 = arith.constant 0 : index
    %5 = vector.load %arg4[%c0_2, %c0_3] : memref<128x1024xbf16, #tpu.memory_space<vmem>>, vector<128x1024xbf16>
    %cst = arith.constant dense<0.000000e+00> : vector<2x1024xf32>
    %6 = tpu.matmul %4, %5, %cst {dimension_numbers = #tpu.dot_dimension_numbers<[1], [0], [0], [1], [0, 0, 1, 1], [], []>} : vector<2x128xbf16>, vector<128x1024xbf16>, vector<2x1024xf32> -> vector<2x1024xf32>
    %c0_4 = arith.constant 0 : index
    %c0_5 = arith.constant 0 : index
    %7 = vector.load %arg5[%c0_4, %c0_5] : memref<1x1024xf32, #tpu.memory_space<vmem>>, vector<1x1024xf32>
    %8 = vector.broadcast %7 : vector<1x1024xf32> to vector<2x1024xf32>
    %9 = arith.addf %6, %8 : vector<2x1024xf32>
    %10 = arith.truncf %9 : vector<2x1024xf32> to vector<2x1024xbf16>
    %c0_6 = arith.constant 0 : index
    %c0_7 = arith.constant 0 : index
    %11 = vector.load %arg6[%c0_6, %c0_7] : memref<2x1024xbf16, #tpu.memory_space<vmem>>, vector<2x1024xbf16>
    tpu.vector_store %arg6[%c0_6, %c0_7], %10 {strides = array<i32>} : memref<2x1024xbf16, #tpu.memory_space<vmem>>, vector<2x1024xbf16>,
    return
  }
  func.func @transform_0(%arg0: i32) -> (i32, i32) {
    %c0_i32 = arith.constant 0 : i32
    %c0_i32_0 = arith.constant 0 : i32
    %c0_i32_1 = arith.constant 0 : i32
    return %c0_i32, %c0_i32_0 : i32, i32
  }
  func.func @transform_1(%arg0: i32) -> (i32, i32) {
    %c0_i32 = arith.constant 0 : i32
    %c0_i32_0 = arith.constant 0 : i32
    %c0_i32_1 = arith.constant 0 : i32
    return %c0_i32, %c0_i32_0 : i32, i32
  }
  func.func @transform_2(%arg0: i32) -> (i32, i32) {
    %c0_i32 = arith.constant 0 : i32
    %c0_i32_0 = arith.constant 0 : i32
    %c0_i32_1 = arith.constant 0 : i32
    return %c0_i32, %c0_i32_0 : i32, i32
  }
  func.func @transform_3(%arg0: i32) -> (i32, i32) {
    %c0_i32 = arith.constant 0 : i32
    %c0_i32_0 = arith.constant 0 : i32
    return %c0_i32, %arg0 : i32, i32
  }
  func.func @transform_4(%arg0: i32) -> (i32, i32) {
    %c0_i32 = arith.constant 0 : i32
    %c0_i32_0 = arith.constant 0 : i32
    return %c0_i32, %arg0 : i32, i32
  }
  func.func @transform_5(%arg0: i32) -> (i32, i32) {
    %c0_i32 = arith.constant 0 : i32
    %c0_i32_0 = arith.constant 0 : i32
    return %c0_i32, %arg0 : i32, i32
  }
}

module attributes {stable_mosaic.version = 11 : i64} {
  func.func @_mm_bias_act_kernel(%arg0: i32, %arg1: memref<64x576xbf16, #tpu.memory_space<vmem>>, %arg2: memref<576x128xbf16, #tpu.memory_space<vmem>>, %arg3: memref<64x1xf32, #tpu.memory_space<vmem>>, %arg4: memref<64x128xbf16, #tpu.memory_space<vmem>>) attributes {dimension_semantics = [#tpu.dimension_semantics<parallel>], iteration_bounds = array<i64: 2>, scalar_prefetch = 0 : i64, scratch_operands = 0 : i64, tpu.core_type = #tpu.core_type<tc>, window_params = [{transform_indices = @transform_0, window_bounds = array<i64: 64, 576>}, {pipeline_mode = #tpu.pipeline_mode<synchronous>, transform_indices = @transform_1, window_bounds = array<i64: 576, 128>}, {transform_indices = @transform_2, window_bounds = array<i64: 64, 1>}, {transform_indices = @transform_3, window_bounds = array<i64: 64, 128>}]} {
    %c0 = arith.constant 0 : index
    %c0_0 = arith.constant 0 : index
    %0 = vector.load %arg1[%c0, %c0_0] : memref<64x576xbf16, #tpu.memory_space<vmem>>, vector<64x576xbf16>
    %c0_1 = arith.constant 0 : index
    %c0_2 = arith.constant 0 : index
    %1 = vector.load %arg2[%c0_1, %c0_2] : memref<576x128xbf16, #tpu.memory_space<vmem>>, vector<576x128xbf16>
    %cst = arith.constant dense<0.000000e+00> : vector<64x128xf32>
    %2 = tpu.matmul %0, %1, %cst {dimension_numbers = #tpu.dot_dimension_numbers<[1], [0], [0], [1], [0, 0, 1, 1], [], []>} : vector<64x576xbf16>, vector<576x128xbf16>, vector<64x128xf32> -> vector<64x128xf32>
    %c0_3 = arith.constant 0 : index
    %c0_4 = arith.constant 0 : index
    %3 = vector.load %arg3[%c0_3, %c0_4] : memref<64x1xf32, #tpu.memory_space<vmem>>, vector<64x1xf32>
    %4 = vector.broadcast %3 : vector<64x1xf32> to vector<64x128xf32>
    %5 = arith.addf %2, %4 : vector<64x128xf32>
    %cst_5 = arith.constant 0.000000e+00 : f32
    %6 = vector.broadcast %cst_5 : f32 to vector<64x128xf32>
    %7 = arith.maximumf %5, %6 : vector<64x128xf32>
    %8 = arith.truncf %7 : vector<64x128xf32> to vector<64x128xbf16>
    %c0_6 = arith.constant 0 : index
    %c0_7 = arith.constant 0 : index
    %9 = vector.load %arg4[%c0_6, %c0_7] : memref<64x128xbf16, #tpu.memory_space<vmem>>, vector<64x128xbf16>
    tpu.vector_store %arg4[%c0_6, %c0_7], %8 {strides = array<i32>} : memref<64x128xbf16, #tpu.memory_space<vmem>>, vector<64x128xbf16>,
    return
  }
  func.func @transform_0(%arg0: i32) -> (i32, i32) {
    %c0_i32 = arith.constant 0 : i32
    %c0_i32_0 = arith.constant 0 : i32
    return %arg0, %c0_i32 : i32, i32
  }
  func.func @transform_1(%arg0: i32) -> (i32, i32) {
    %c0_i32 = arith.constant 0 : i32
    %c0_i32_0 = arith.constant 0 : i32
    %c0_i32_1 = arith.constant 0 : i32
    return %c0_i32, %c0_i32_0 : i32, i32
  }
  func.func @transform_2(%arg0: i32) -> (i32, i32) {
    %c0_i32 = arith.constant 0 : i32
    %c0_i32_0 = arith.constant 0 : i32
    return %arg0, %c0_i32 : i32, i32
  }
  func.func @transform_3(%arg0: i32) -> (i32, i32) {
    %c0_i32 = arith.constant 0 : i32
    %c0_i32_0 = arith.constant 0 : i32
    return %arg0, %c0_i32 : i32, i32
  }
}

module attributes {stable_mosaic.version = 11 : i64} {
  func.func @_mm_bias_act_kernel(%arg0: i32, %arg1: memref<64x288xbf16, #tpu.memory_space<vmem>>, %arg2: memref<288x256xbf16, #tpu.memory_space<vmem>>, %arg3: memref<64x1xf32, #tpu.memory_space<vmem>>, %arg4: memref<64x256xbf16, #tpu.memory_space<vmem>>) attributes {dimension_semantics = [#tpu.dimension_semantics<parallel>], iteration_bounds = array<i64: 2>, scalar_prefetch = 0 : i64, scratch_operands = 0 : i64, tpu.core_type = #tpu.core_type<tc>, window_params = [{pipeline_mode = #tpu.pipeline_mode<synchronous>, transform_indices = @transform_0, window_bounds = array<i64: 64, 288>}, {transform_indices = @transform_1, window_bounds = array<i64: 288, 256>}, {pipeline_mode = #tpu.pipeline_mode<synchronous>, transform_indices = @transform_2, window_bounds = array<i64: 64, 1>}, {transform_indices = @transform_3, window_bounds = array<i64: 64, 256>}]} {
    %c0 = arith.constant 0 : index
    %c0_0 = arith.constant 0 : index
    %0 = vector.load %arg1[%c0, %c0_0] : memref<64x288xbf16, #tpu.memory_space<vmem>>, vector<64x288xbf16>
    %c0_1 = arith.constant 0 : index
    %c0_2 = arith.constant 0 : index
    %1 = vector.load %arg2[%c0_1, %c0_2] : memref<288x256xbf16, #tpu.memory_space<vmem>>, vector<288x256xbf16>
    %cst = arith.constant dense<0.000000e+00> : vector<64x256xf32>
    %2 = tpu.matmul %0, %1, %cst {dimension_numbers = #tpu.dot_dimension_numbers<[1], [0], [0], [1], [0, 0, 1, 1], [], []>} : vector<64x288xbf16>, vector<288x256xbf16>, vector<64x256xf32> -> vector<64x256xf32>
    %c0_3 = arith.constant 0 : index
    %c0_4 = arith.constant 0 : index
    %3 = vector.load %arg3[%c0_3, %c0_4] : memref<64x1xf32, #tpu.memory_space<vmem>>, vector<64x1xf32>
    %4 = vector.broadcast %3 : vector<64x1xf32> to vector<64x256xf32>
    %5 = arith.addf %2, %4 : vector<64x256xf32>
    %cst_5 = arith.constant 0.000000e+00 : f32
    %6 = vector.broadcast %cst_5 : f32 to vector<64x256xf32>
    %7 = arith.maximumf %5, %6 : vector<64x256xf32>
    %8 = arith.truncf %7 : vector<64x256xf32> to vector<64x256xbf16>
    %c0_6 = arith.constant 0 : index
    %c0_7 = arith.constant 0 : index
    %9 = vector.load %arg4[%c0_6, %c0_7] : memref<64x256xbf16, #tpu.memory_space<vmem>>, vector<64x256xbf16>
    tpu.vector_store %arg4[%c0_6, %c0_7], %8 {strides = array<i32>} : memref<64x256xbf16, #tpu.memory_space<vmem>>, vector<64x256xbf16>,
    return
  }
  func.func @transform_0(%arg0: i32) -> (i32, i32) {
    %c0_i32 = arith.constant 0 : i32
    %c0_i32_0 = arith.constant 0 : i32
    %c0_i32_1 = arith.constant 0 : i32
    return %c0_i32, %c0_i32_0 : i32, i32
  }
  func.func @transform_1(%arg0: i32) -> (i32, i32) {
    %c0_i32 = arith.constant 0 : i32
    %c0_i32_0 = arith.constant 0 : i32
    return %c0_i32, %arg0 : i32, i32
  }
  func.func @transform_2(%arg0: i32) -> (i32, i32) {
    %c0_i32 = arith.constant 0 : i32
    %c0_i32_0 = arith.constant 0 : i32
    %c0_i32_1 = arith.constant 0 : i32
    return %c0_i32, %c0_i32_0 : i32, i32
  }
  func.func @transform_3(%arg0: i32) -> (i32, i32) {
    %c0_i32 = arith.constant 0 : i32
    %c0_i32_0 = arith.constant 0 : i32
    return %c0_i32, %arg0 : i32, i32
  }
}

module attributes {stable_mosaic.version = 11 : i64} {
  func.func @_mm_bias_act_kernel(%arg0: i32, %arg1: memref<4x144xbf16, #tpu.memory_space<vmem>>, %arg2: memref<144x1024xbf16, #tpu.memory_space<vmem>>, %arg3: memref<4x1xf32, #tpu.memory_space<vmem>>, %arg4: memref<4x1024xf32, #tpu.memory_space<vmem>>) attributes {dimension_semantics = [#tpu.dimension_semantics<parallel>], iteration_bounds = array<i64: 2>, scalar_prefetch = 0 : i64, scratch_operands = 0 : i64, tpu.core_type = #tpu.core_type<tc>, window_params = [{pipeline_mode = #tpu.pipeline_mode<synchronous>, transform_indices = @transform_0, window_bounds = array<i64: 4, 144>}, {transform_indices = @transform_1, window_bounds = array<i64: 144, 1024>}, {pipeline_mode = #tpu.pipeline_mode<synchronous>, transform_indices = @transform_2, window_bounds = array<i64: 4, 1>}, {transform_indices = @transform_3, window_bounds = array<i64: 4, 1024>}]} {
    %c0 = arith.constant 0 : index
    %c0_0 = arith.constant 0 : index
    %0 = vector.load %arg1[%c0, %c0_0] : memref<4x144xbf16, #tpu.memory_space<vmem>>, vector<4x144xbf16>
    %c0_1 = arith.constant 0 : index
    %c0_2 = arith.constant 0 : index
    %1 = vector.load %arg2[%c0_1, %c0_2] : memref<144x1024xbf16, #tpu.memory_space<vmem>>, vector<144x1024xbf16>
    %cst = arith.constant dense<0.000000e+00> : vector<4x1024xf32>
    %2 = tpu.matmul %0, %1, %cst {dimension_numbers = #tpu.dot_dimension_numbers<[1], [0], [0], [1], [0, 0, 1, 1], [], []>} : vector<4x144xbf16>, vector<144x1024xbf16>, vector<4x1024xf32> -> vector<4x1024xf32>
    %c0_3 = arith.constant 0 : index
    %c0_4 = arith.constant 0 : index
    %3 = vector.load %arg3[%c0_3, %c0_4] : memref<4x1xf32, #tpu.memory_space<vmem>>, vector<4x1xf32>
    %4 = vector.broadcast %3 : vector<4x1xf32> to vector<4x1024xf32>
    %5 = arith.addf %2, %4 : vector<4x1024xf32>
    %cst_5 = arith.constant 0.000000e+00 : f32
    %6 = vector.broadcast %cst_5 : f32 to vector<4x1024xf32>
    %7 = arith.subf %6, %5 : vector<4x1024xf32>
    %8 = math.exp %7 : vector<4x1024xf32>
    %cst_6 = arith.constant 1.000000e+00 : f32
    %9 = vector.broadcast %cst_6 : f32 to vector<4x1024xf32>
    %10 = arith.addf %9, %8 : vector<4x1024xf32>
    %cst_7 = arith.constant 1.000000e+00 : f32
    %11 = vector.broadcast %cst_7 : f32 to vector<4x1024xf32>
    %12 = arith.divf %11, %10 : vector<4x1024xf32>
    %c0_8 = arith.constant 0 : index
    %c0_9 = arith.constant 0 : index
    %13 = vector.load %arg4[%c0_8, %c0_9] : memref<4x1024xf32, #tpu.memory_space<vmem>>, vector<4x1024xf32>
    tpu.vector_store %arg4[%c0_8, %c0_9], %12 {strides = array<i32>} : memref<4x1024xf32, #tpu.memory_space<vmem>>, vector<4x1024xf32>,
    return
  }
  func.func @transform_0(%arg0: i32) -> (i32, i32) {
    %c0_i32 = arith.constant 0 : i32
    %c0_i32_0 = arith.constant 0 : i32
    %c0_i32_1 = arith.constant 0 : i32
    return %c0_i32, %c0_i32_0 : i32, i32
  }
  func.func @transform_1(%arg0: i32) -> (i32, i32) {
    %c0_i32 = arith.constant 0 : i32
    %c0_i32_0 = arith.constant 0 : i32
    return %c0_i32, %arg0 : i32, i32
  }
  func.func @transform_2(%arg0: i32) -> (i32, i32) {
    %c0_i32 = arith.constant 0 : i32
    %c0_i32_0 = arith.constant 0 : i32
    %c0_i32_1 = arith.constant 0 : i32
    return %c0_i32, %c0_i32_0 : i32, i32
  }
  func.func @transform_3(%arg0: i32) -> (i32, i32) {
    %c0_i32 = arith.constant 0 : i32
    %c0_i32_0 = arith.constant 0 : i32
    return %c0_i32, %arg0 : i32, i32
  }
}

</mosaic_0001>

<bundles_post_ra>
// kernel: lightweight_autoencoder_forward.7
= control target key start
LH: loop header
LB: loop body
LE: loop exit
PB: predicated region body
PF: predicated region fallthrough
CT: control target
= control target key end

     0   :  { %8 = vsyncpa [#allocation3], 0  ;;  %s809_s12 = smov 0   ;;  %s811_s13 = smov 0   ;;  %s942_s0 = inlined_call_operand.hbm [shape: bf16[16,16], index: 0, kind: input, shape index: {}]   ;;  %s943_s1 = inlined_call_operand.vmem [shape: bf16[16,2048], index: 1, kind: input, shape index: {}]   ;;  %s944_s2 = inlined_call_operand.vmem [shape: f32[16,1], index: 2, kind: input, shape index: {}]   ;;  %s945_s3 = inlined_call_operand.vmem [shape: bf16[16,2048], index: 3, kind: output, shape index: {}]  }
   0x1   :  { %s813_s14 = smov 0  }
   0x2 LB: > { %s825_s15 = sadd.s32 4294967295, %s783_s14   ;;  %s828_s16 = sadd.s32 1, %s783_s14   ;;  %s783_s14 = sphi %s813_s14, %s959_s14   ;;  %s779_s13 = sphi %s811_s13, %s958_s13   ;;  %s775_s12 = sphi %s809_s12, %s957_s12  }
   0x3   : > { %s39_s17 = ssub.s32 %s783_s14, %s828_s16  ;;  %s42_s18 = sadd.s32 1, %s779_s13 }
   0x4   : > { %p40_p0 = scmp.eq.s32.totalorder %s39_s17, 0  ;;  %p49_p1 = scmp.ne.s32.totalorder %s779_s13, %s775_s12 }
   0x5   : > { %p50_p2 = scmp.eq.s32.totalorder %s783_s14, 0  ;;  %p100_p3 = scmp.eq.s32.totalorder %s825_s15, 1 }
   0x6   : > { %s838_s19 = scalar_select %p40_p0, %s779_s13, %s42_s18  }
   0x7   : > { %p840_p4 = por %p50_p2, %p49_p1  ;;  %p844_p5 = por %p100_p3, %p49_p1 }
   0x8   : > { %p643_p6 = scmp.ge.s32.totalorder %s783_s14, 1  ;;  %p113_p7 = scmp.lt.s32.totalorder %s783_s14, 3 }
   0x9   : > { %s948_s20 = scalar_select %p840_p4, 1, 0 }
   0xa   : > { %s949_s21 = scalar_select %p844_p5, 1, 0 }
   0xb   : > { %p946_p8 = scmp.eq.s32.totalorder %s825_s15, 0  ;;  %p851_p9 = pnand %p643_p6, %p113_p7 }
   0xc   : > { %s785_s23 = smov [#allocation2]   ;;  %s729_s28 = scalar_lea.hbm %s942_s0, 128 }
   0xd   : > { %s950_s22 = scalar_select %p851_p9, 1, 0 }
   0xe   : > { %s125_s24 = sshll.u32 %s785_s23, 4  ;;  %p693_p10 = pneg %p851_p9  ;;  %s126_s24 = int_to_ptr.vmem [resolvable:$true] %s125_s24 }
   0xf   : > { %p730_p12 = scmp.ne.s32.totalorder %s942_s0, %s729_s28  ;;  %p736_p2 = scmp.lt.u32.totalorder %s729_s28, %s942_s0 }
  0x10   : > { %p859_p11 = pnand %p946_p8, %p693_p10 }
  0x12   : > { %p731_p13 = pneg %p859_p11 }
  0x14   : > { %p732_p0 = pnand %p731_p13, %p730_p12 }
  0x16   : > { %p733_p1 = pneg %p732_p0 }
  0x18   : > { %p738_p3 = pnand %p736_p2, %p733_p1 }
  0x1a   : > { %741 = shalt.err (!%p738_p3)
}
  0x1b   : > { %s742_s6 = scalar_lea.vmem %s126_s24, 128  ;;  %p750_p8 = scmp.lt.s32.totalorder %s126_s24, %s126_s24 }
  0x1c   : > { %p743_p6 = scmp.ne.s32.totalorder %s126_s24, %s742_s6  ;;  %p751_p5 = scmp.lt.s32.totalorder %s742_s6, %s742_s6 }
  0x1e   : > { %p745_p7 = pnand %p743_p6, %p731_p13  ;;  %p752_p9 = por %p751_p5, %p750_p8 }
  0x20   : > { %p746_p10 = pneg %p745_p7 }
  0x22   : > { %p753_p4 = pnand %p752_p9, %p746_p10 }
  0x24   : > { %756 = shalt.err (!%p753_p4)
}
  0x25   : > { %s786_s7 = smov 64   ;;  %s787_s8 = smov 4  }
  0x26   : > { %696 = dma.hbm_to_vmem [thread:$0]  (!%p859_p11), %s942_s0, 128, %s126_s24, [#allocation3], %s786_s7, %s786_s7, %s787_s8  }
  0x27   : > { %p645_p12 = scmp.ge.s32.totalorder %s783_s14, 2 }
  0x28   : > { %p952_p0 = scmp.ne.s32.totalorder (!%p645_p12), %s948_s20, 0 }
  0x29   : > { %138 = sbr.rel (%p645_p12) target bundleno = 56 (0x38), region = 24 }
  0x30   : > { %141 = sbr.rel (!%p952_p0) target bundleno = 56 (0x38), region = 28  ;;  %s143_s11 = sand.u32 (%p952_p0), 1, %s779_s13  }
  0x31   : > { %s679_s17 = sshll.u32 (%p952_p0), %s783_s14, 5  ;;  %s646_s18 = sshll.u32 (%p952_p0), %s143_s11, 6 }
  0x32   : > { %s148_s27 = scalar_lea.vmem (%p952_p0), %s943_s1, %s679_s17  ;;  %s145_s25 = scalar_lea.vmem (%p952_p0), [#allocation4], %s646_s18 }
  0x33   : > { %v161_v0 = vld [vmem:[%s148_s27] sm:$0xff] (%p952_p0)  ;;  %v163_v1 = vld [vmem:[%s148_s27 + $0x8] sm:$0xff] (%p952_p0)  ;;  %v165_v2 = vld [vmem:[%s148_s27 + $0x10] sm:$0xff] (%p952_p0) }
  0x34   : > { %162 = vst [vmem:[%s145_s25] sm:$0xff] (%p952_p0), %v161_v0  ;;  %164 = vst [vmem:[%s145_s25 + $0x8] sm:$0xff] (%p952_p0), %v163_v1  ;;  %v167_v3 = vld [vmem:[%s148_s27 + $0x18] sm:$0xff] (%p952_p0)  ;;  %v169_v4 = vld [vmem:[%s148_s27 + $0x40] sm:$0xff] (%p952_p0) }
  0x35   : > { %166 = vst [vmem:[%s145_s25 + $0x10] sm:$0xff] (%p952_p0), %v165_v2  ;;  %v171_v5 = vld [vmem:[%s148_s27 + $0x48] sm:$0xff] (%p952_p0)  ;;  %168 = vst [vmem:[%s145_s25 + $0x18] sm:$0xff] (%p952_p0), %v167_v3  ;;  %v173_v6 = vld [vmem:[%s148_s27 + $0x50] sm:$0xff] (%p952_p0) }
  0x36   : > { %170 = vst [vmem:[%s145_s25 + $0x20] sm:$0xff] (%p952_p0), %v169_v4  ;;  %172 = vst [vmem:[%s145_s25 + $0x28] sm:$0xff] (%p952_p0), %v171_v5  ;;  %v175_v7 = vld [vmem:[%s148_s27 + $0x58] sm:$0xff] (%p952_p0) }
  0x37   : > { %174 = vst [vmem:[%s145_s25 + $0x30] sm:$0xff] %v173_v6  ;;  %176 = vst [vmem:[%s145_s25 + $0x38] sm:$0xff] %v175_v7 }
  0x38 PF: > { %p953_p4 = scmp.ne.s32.totalorder %s950_s22, 0 }
  0x39   : > { %p954_p5 = scmp.eq.s32.totalorder (!%p953_p4), %s825_s15, 0 }
  0x3a   : > { %185 = sbr.rel (%p953_p4) target bundleno = 315 (0x13b), region = 51 }
  0x41   : > { %770 = dma.done.wait (%p954_p5), [#allocation3], 128   ;;  %p955_p8 = pmov %p954_p5 }
  0x42   : > { %s192_s14 = sand.u32 1, %s775_s12   ;;  %v788_v8 = vmov 0   ;;  %v728_v17 = vld [vmem:[#allocation2] sm:$0xff]   ;;  %vm284_vm0 = vcmask 130048   ;;  %v228_v27 = vld [vmem:[%s944_s2 + $0x8] sm:$0xff]  ;;  %p956_p9 = scmp.ne.s32.totalorder %s949_s21, 0 }
  0x43   : > { %772 = vsyncadd (%p955_p8), [#allocation3], 4294967168  ;;  %s894_s20 = sshll.u32 %s192_s14, 6  ;;  %320 = vmatprep.mubr.bf16.mxu0 %v788_v8  ;;  %363 = vmatprep.mubr.bf16.mxu1 %v788_v8  ;;  %v227_v23 = vld [vmem:[%s944_s2] sm:$0xff]  ;;  %s688_s4 = sshll.u32 (%p956_p9), %s825_s15, 5 }
  0x44   : > { %727 = vset.pattern.permute.xlu0 %v788_v8  ;;  %s194_s24 = scalar_lea.vmem [#allocation4], %s894_s20  ;;  %s908_s30 = scalar_lea.vmem [#allocation5], %s894_s20 }
  0x45   : > { %v219_v9 = vld [vmem:[%s194_s24] sm:$0xff]  ;;  %v220_v11 = vld [vmem:[%s194_s24 + $0x8] sm:$0xff]  ;;  %v221_v18 = vld [vmem:[%s194_s24 + $0x10] sm:$0xff]  ;;  %231 = vperm.xlu0 %727, %v227_v23   ;;  %s541_s7 = scalar_lea.vmem (%p956_p9), %s945_s3, %s688_s4 }
  0x46   : > { %v223_v10 = vld [vmem:[%s194_s24 + $0x20] sm:$0xff]  ;;  %v224_v13 = vld [vmem:[%s194_s24 + $0x28] sm:$0xff]  ;;  %v225_v19 = vld [vmem:[%s194_s24 + $0x30] sm:$0xff] }
  0x47   : > { %v655_v12 = vcombine.high %v219_v9, %v223_v10  ;;  %v654_v14 = vcombine.low %v219_v9, %v223_v10  ;;  %v657_v15 = vcombine.high %v220_v11, %v224_v13  ;;  %v656_v16 = vcombine.low %v220_v11, %v224_v13  ;;  %v222_v21 = vld [vmem:[%s194_s24 + $0x18] sm:$0xff] }
  0x48   : > { %v659_v20 = vcombine.high %v221_v18, %v225_v19  ;;  %v226_v22 = vld [vmem:[%s194_s24 + $0x38] sm:$0xff]  ;;  %v658_v24 = vcombine.low %v221_v18, %v225_v19 }
  0x49   : > { %288 = vmatprep.subr.bf16.mxu0 %v655_v12  ;;  %331 = vmatprep.subr.bf16.mxu1 %v657_v15  ;;  %v661_v25 = vcombine.high %v222_v21, %v226_v22  ;;  %v660_v26 = vcombine.low %v222_v21, %v226_v22 }
  0x4a   : > { %289 = vmatpush1.bf16.msra.mxu0 %v654_v14  ;;  %332 = vmatpush1.bf16.msra.mxu1 %v656_v16 }
  0x4b   : > { %374 = vmatprep.subr.bf16.mxu0 %v659_v20  ;;  %417 = vmatprep.subr.bf16.mxu1 %v661_v25 }
  0x4c   : > { %236 = vperm.xlu0 %727, %v228_v27  }
  0x4d   : > { %662 = vmatmul.mubr.msk.bf16.vlgmr.msra.gmra.mrb[0].mxu0 %vm284_vm0, %v728_v17  ;;  %663 = vmatmul.mubr.msk.bf16.vlgmr.msra.gmra.mrb[0].mxu1 %vm284_vm0, %v728_v17 }
  0x4e   : > { %375 = vmatpush1.bf16.msra.mxu0 %v658_v24  ;;  %418 = vmatpush1.bf16.msra.mxu1 %v660_v26 }
  0x4f   : > { %406 = vmatprep.mubr.bf16.mxu0 %v788_v8  ;;  %449 = vmatprep.mubr.bf16.mxu1 %v788_v8 }
  0x55   : > { %664 = vmatmul.mubr.msk.bf16.vlgmr.msra.gmra.mrb[4].mxu0 %vm284_vm0, %v728_v17  ;;  %665 = vmatmul.mubr.msk.bf16.vlgmr.msra.gmra.mrb[4].mxu1 %vm284_vm0, %v728_v17 }
  0xc4   : > { %v232_v28 = vpop.permute.xlu0 %231 }
  0xcb   : > { %v237_v30 = vpop.permute.xlu0 %236 }
 0x120   : > { %v322_v29 = vpop.f32.mrb[0].mxu0  ;;  %v365_v32 = vpop.f32.mrb[0].mxu1 }
 0x121   : > { %v323_v31 = vadd.f32 %v322_v29, %v232_v28  ;;  %v324_v33 = vpop.f32.mrb[1].mxu0  ;;  %v366_v34 = vadd.f32 %v365_v32, %v232_v28  ;;  %v367_v36 = vpop.f32.mrb[1].mxu1 }
 0x122   : > { %v325_v35 = vadd.f32 %v324_v33, %v232_v28  ;;  %v326_v37 = vpop.f32.mrb[2].mxu0  ;;  %v368_v39 = vadd.f32 %v367_v36, %v232_v28  ;;  %v369_v41 = vpop.f32.mrb[2].mxu1 }
 0x123   : > { %v460_v38 = vmax.f32 %v323_v31, 0.0  ;;  %v327_v40 = vadd.f32 %v326_v37, %v237_v30  ;;  %v328_v42 = vpop.f32.mrb[3].mxu0  ;;  %v462_v43 = vmax.f32 %v366_v34, 0.0  ;;  %v370_v45 = vadd.f32 %v369_v41, %v237_v30  ;;  %v371_v47 = vpop.f32.mrb[3].mxu1 }
 0x124   : > { %v461_v44 = vmax.f32 %v325_v35, 0.0  ;;  %v329_v46 = vadd.f32 %v328_v42, %v237_v30  ;;  %v463_v48 = vmax.f32 %v368_v39, 0.0  ;;  %v372_v50 = vadd.f32 %v371_v47, %v237_v30 }
 0x125   : > { %v468_v49 = vmax.f32 %v327_v40, 0.0  ;;  %v470_v52 = vmax.f32 %v370_v45, 0.0 }
 0x126   : > { %v680_v51 = vpack.c.bf16 %v461_v44, %v460_v38  ;;  %v469_v53 = vmax.f32 %v329_v46, 0.0  ;;  %v681_v54 = vpack.c.bf16 %v463_v48, %v462_v43  ;;  %v471_v55 = vmax.f32 %v372_v50, 0.0 }
 0x128   : > { %524 = vst [vmem:[%s908_s30] sm:$0xff] %v680_v51  ;;  %v684_v56 = vpack.c.bf16 %v469_v53, %v468_v49  ;;  %v408_v57 = vpop.f32.mrb[4].mxu0  ;;  %525 = vst [vmem:[%s908_s30 + $0x8] sm:$0xff] %v681_v54  ;;  %v685_v58 = vpack.c.bf16 %v471_v55, %v470_v52  ;;  %v451_v60 = vpop.f32.mrb[4].mxu1 }
 0x129   : > { %v409_v59 = vadd.f32 %v408_v57, %v232_v28  ;;  %v410_v61 = vpop.f32.mrb[5].mxu0  ;;  %v452_v62 = vadd.f32 %v451_v60, %v232_v28  ;;  %v453_v0 = vpop.f32.mrb[5].mxu1 }
 0x12a   : > { %528 = vst [vmem:[%s908_s30 + $0x20] sm:$0xff] %v684_v56  ;;  %v411_v63 = vadd.f32 %v410_v61, %v232_v28  ;;  %v412_v1 = vpop.f32.mrb[6].mxu0  ;;  %529 = vst [vmem:[%s908_s30 + $0x28] sm:$0xff] %v685_v58  ;;  %v454_v3 = vadd.f32 %v453_v0, %v232_v28  ;;  %v455_v5 = vpop.f32.mrb[6].mxu1 }
 0x12b   : > { %v464_v2 = vmax.f32 %v409_v59, 0.0  ;;  %v413_v4 = vadd.f32 %v412_v1, %v237_v30  ;;  %v414_v6 = vpop.f32.mrb[7].mxu0  ;;  %v466_v7 = vmax.f32 %v452_v62, 0.0  ;;  %v456_v9 = vadd.f32 %v455_v5, %v237_v30  ;;  %v457_v11 = vpop.f32.mrb[7].mxu1 }
 0x12c   : > { %v465_v8 = vmax.f32 %v411_v63, 0.0  ;;  %v415_v10 = vadd.f32 %v414_v6, %v237_v30  ;;  %v467_v12 = vmax.f32 %v454_v3, 0.0  ;;  %v458_v14 = vadd.f32 %v457_v11, %v237_v30  ;;  %538 = sbr.rel (!%p956_p9) target bundleno = 315 (0x13b), region = 63 }
 0x12d   : > { %v472_v13 = vmax.f32 %v413_v4, 0.0  ;;  %v474_v16 = vmax.f32 %v456_v9, 0.0 }
 0x12e   : > { %v682_v15 = vpack.c.bf16 %v465_v8, %v464_v2  ;;  %v473_v17 = vmax.f32 %v415_v10, 0.0  ;;  %v683_v18 = vpack.c.bf16 %v467_v12, %v466_v7  ;;  %v475_v19 = vmax.f32 %v458_v14, 0.0 }
 0x12f   : > { %v554_v22 = vld [vmem:[%s908_s30] sm:$0xff] (%p956_p9)  ;;  %v556_v23 = vld [vmem:[%s908_s30 + $0x8] sm:$0xff] (%p956_p9) }
 0x130   : > { %526 = vst [vmem:[%s908_s30 + $0x10] sm:$0xff] %v682_v15  ;;  %v686_v20 = vpack.c.bf16 %v473_v17, %v472_v13  ;;  %527 = vst [vmem:[%s908_s30 + $0x18] sm:$0xff] %v683_v18  ;;  %v687_v21 = vpack.c.bf16 %v475_v19, %v474_v16 }
 0x131   : > { %v562_v26 = vld [vmem:[%s908_s30 + $0x20] sm:$0xff] (%p956_p9)  ;;  %v564_v27 = vld [vmem:[%s908_s30 + $0x28] sm:$0xff] (%p956_p9)  ;;  %555 = vst [vmem:[%s541_s7] sm:$0xff] (%p956_p9), %v554_v22  ;;  %557 = vst [vmem:[%s541_s7 + $0x8] sm:$0xff] (%p956_p9), %v556_v23 }
 0x132   : > { %530 = vst [vmem:[%s908_s30 + $0x30] sm:$0xff] %v686_v20  ;;  %531 = vst [vmem:[%s908_s30 + $0x38] sm:$0xff] %v687_v21 }
 0x133   : > { %563 = vst [vmem:[%s541_s7 + $0x40] sm:$0xff] %v562_v26  ;;  %565 = vst [vmem:[%s541_s7 + $0x48] sm:$0xff] %v564_v27 }
 0x137   : > { %v558_v24 = vld [vmem:[%s908_s30 + $0x10] sm:$0xff]  ;;  %v560_v25 = vld [vmem:[%s908_s30 + $0x18] sm:$0xff] }
 0x138   : > { %559 = vst [vmem:[%s541_s7 + $0x10] sm:$0xff] %v558_v24  ;;  %561 = vst [vmem:[%s541_s7 + $0x18] sm:$0xff] %v560_v25 }
 0x139   : > { %v566_v28 = vld [vmem:[%s908_s30 + $0x30] sm:$0xff]  ;;  %v568_v29 = vld [vmem:[%s908_s30 + $0x38] sm:$0xff] }
 0x13a   : > { %567 = vst [vmem:[%s541_s7 + $0x50] sm:$0xff] %v566_v28  ;;  %569 = vst [vmem:[%s541_s7 + $0x58] sm:$0xff] %v568_v29 }
 0x13b PF: > { %p11_p11 = scmp.ge.s32.totalorder %s828_s16, 4   ;;  %s957_s12 = smov %s779_s13 }
 0x13c   : > { %s958_s13 = smov %s838_s19  ;;  %s959_s14 = smov %s828_s16 }
 0x13d   :  { %13 = sbr.rel (!%p11_p11) target bundleno = 2 (0x2), region = 118 }
 0x144   :  { %585 = vsyncpa [#allocation3], 1 }
 0x145   :  { %587 = vsyncpa [#allocation3 + $0x1], 1 }

// kernel: lightweight_autoencoder_forward.8
= control target key start
LH: loop header
LB: loop body
LE: loop exit
PB: predicated region body
PF: predicated region fallthrough
CT: control target
= control target key end

     0   :  { %s984_s12 = smov 0   ;;  %s986_s13 = smov 0   ;;  %s1174_s0 = inlined_call_operand.vmem [shape: bf16[32,256], index: 0, kind: input, shape index: {}]   ;;  %s1175_s1 = inlined_call_operand.vmem [shape: bf16[256,512], index: 1, kind: input, shape index: {}]   ;;  %s1176_s2 = inlined_call_operand.vmem [shape: f32[32,1], index: 2, kind: input, shape index: {}]   ;;  %s1177_s3 = inlined_call_operand.vmem [shape: bf16[32,512], index: 3, kind: output, shape index: {}]  }
   0x1   :  { %s988_s14 = smov 0  }
   0x2 LB: > { %s765_s15 = sadd.s32 4294967295, %s961_s14   ;;  %s1001_s16 = sadd.s32 1, %s961_s14   ;;  %s961_s14 = sphi %s988_s14, %s1181_s14   ;;  %s957_s13 = sphi %s986_s13, %s1180_s13   ;;  %s953_s12 = sphi %s984_s12, %s1179_s12  }
   0x3   : > { %s38_s17 = ssub.s32 %s961_s14, %s1001_s16  ;;  %s41_s18 = sadd.s32 1, %s957_s13 }
   0x4   : > { %p39_p0 = scmp.eq.s32.totalorder %s38_s17, 0  ;;  %p48_p1 = scmp.ne.s32.totalorder %s957_s13, %s953_s12 }
   0x5   : > { %p49_p2 = scmp.eq.s32.totalorder %s961_s14, 0  ;;  %p99_p3 = scmp.eq.s32.totalorder %s765_s15, 1 }
   0x6   : > { %s1012_s19 = scalar_select %p39_p0, %s957_s13, %s41_s18  }
   0x7   : > { %p50_p4 = por %p49_p2, %p48_p1  ;;  %p1014_p5 = por %p99_p3, %p48_p1 }
   0x8   : > { %p768_p6 = scmp.ge.s32.totalorder %s961_s14, 2 }
   0xa   : > { %127 = sbr.rel (%p768_p6) target bundleno = 37 (0x25), region = 24 }
  0x11   : > { %130 = sbr.rel (!%p50_p4) target bundleno = 37 (0x25), region = 28  ;;  %s132_s21 = sand.u32 (%p50_p4), 1, %s957_s13  }
  0x12   : > { %s820_s22 = sshll.u32 (%p50_p4), %s961_s14, 3  ;;  %s769_s23 = sshll.u32 (%p50_p4), %s132_s21, 8 }
  0x13   : > { %s1024_s26 = scalar_lea.vmem (%p50_p4), %s1175_s1, %s820_s22  ;;  %s1029_s27 = scalar_lea.vmem (%p50_p4), [#allocation2], %s769_s23 }
  0x14   : > { %v227_v0 = vld [vmem:[%s1024_s26] sm:$0xff] (%p50_p4)  ;;  %v229_v1 = vld [vmem:[%s1024_s26 + $0x10] sm:$0xff] (%p50_p4) }
  0x15   : > { %v231_v2 = vld [vmem:[%s1024_s26 + $0x20] sm:$0xff] (%p50_p4)  ;;  %228 = vst [vmem:[%s1029_s27] sm:$0xff] (%p50_p4), %v227_v0  ;;  %230 = vst [vmem:[%s1029_s27 + $0x8] sm:$0xff] (%p50_p4), %v229_v1  ;;  %v233_v3 = vld [vmem:[%s1024_s26 + $0x30] sm:$0xff] (%p50_p4) }
  0x16   : > { %232 = vst [vmem:[%s1029_s27 + $0x10] sm:$0xff] (%p50_p4), %v231_v2  ;;  %v235_v4 = vld [vmem:[%s1024_s26 + $0x40] sm:$0xff] (%p50_p4)  ;;  %v237_v5 = vld [vmem:[%s1024_s26 + $0x50] sm:$0xff] (%p50_p4)  ;;  %234 = vst [vmem:[%s1029_s27 + $0x18] sm:$0xff] (%p50_p4), %v233_v3 }
  0x17   : > { %236 = vst [vmem:[%s1029_s27 + $0x20] sm:$0xff] (%p50_p4), %v235_v4  ;;  %238 = vst [vmem:[%s1029_s27 + $0x28] sm:$0xff] (%p50_p4), %v237_v5  ;;  %v239_v6 = vld [vmem:[%s1024_s26 + $0x60] sm:$0xff] (%p50_p4)  ;;  %v241_v7 = vld [vmem:[%s1024_s26 + $0x70] sm:$0xff] (%p50_p4) }
  0x18   : > { %v243_v8 = vld [vmem:[%s1024_s26 + $0x80] sm:$0xff]  ;;  %240 = vst [vmem:[%s1029_s27 + $0x30] sm:$0xff] %v239_v6  ;;  %242 = vst [vmem:[%s1029_s27 + $0x38] sm:$0xff] %v241_v7  ;;  %v245_v9 = vld [vmem:[%s1024_s26 + $0x90] sm:$0xff] }
  0x19   : > { %244 = vst [vmem:[%s1029_s27 + $0x40] sm:$0xff] %v243_v8  ;;  %v247_v10 = vld [vmem:[%s1024_s26 + $0xa0] sm:$0xff]  ;;  %v249_v11 = vld [vmem:[%s1024_s26 + $0xb0] sm:$0xff]  ;;  %246 = vst [vmem:[%s1029_s27 + $0x48] sm:$0xff] %v245_v9 }
  0x1a   : > { %248 = vst [vmem:[%s1029_s27 + $0x50] sm:$0xff] %v247_v10  ;;  %250 = vst [vmem:[%s1029_s27 + $0x58] sm:$0xff] %v249_v11  ;;  %v251_v12 = vld [vmem:[%s1024_s26 + $0xc0] sm:$0xff]  ;;  %v253_v13 = vld [vmem:[%s1024_s26 + $0xd0] sm:$0xff] }
  0x1b   : > { %v255_v14 = vld [vmem:[%s1024_s26 + $0xe0] sm:$0xff]  ;;  %252 = vst [vmem:[%s1029_s27 + $0x60] sm:$0xff] %v251_v12  ;;  %254 = vst [vmem:[%s1029_s27 + $0x68] sm:$0xff] %v253_v13  ;;  %v257_v15 = vld [vmem:[%s1024_s26 + $0xf0] sm:$0xff] }
  0x1c   : > { %256 = vst [vmem:[%s1029_s27 + $0x70] sm:$0xff] %v255_v14  ;;  %v259_v16 = vld [vmem:[%s1024_s26 + $0x100] sm:$0xff]  ;;  %v261_v17 = vld [vmem:[%s1024_s26 + $0x110] sm:$0xff]  ;;  %258 = vst [vmem:[%s1029_s27 + $0x78] sm:$0xff] %v257_v15 }
  0x1d   : > { %260 = vst [vmem:[%s1029_s27 + $0x80] sm:$0xff] %v259_v16  ;;  %262 = vst [vmem:[%s1029_s27 + $0x88] sm:$0xff] %v261_v17  ;;  %v263_v18 = vld [vmem:[%s1024_s26 + $0x120] sm:$0xff]  ;;  %v265_v19 = vld [vmem:[%s1024_s26 + $0x130] sm:$0xff] }
  0x1e   : > { %v267_v20 = vld [vmem:[%s1024_s26 + $0x140] sm:$0xff]  ;;  %264 = vst [vmem:[%s1029_s27 + $0x90] sm:$0xff] %v263_v18  ;;  %266 = vst [vmem:[%s1029_s27 + $0x98] sm:$0xff] %v265_v19  ;;  %v269_v21 = vld [vmem:[%s1024_s26 + $0x150] sm:$0xff] }
  0x1f   : > { %268 = vst [vmem:[%s1029_s27 + $0xa0] sm:$0xff] %v267_v20  ;;  %v271_v22 = vld [vmem:[%s1024_s26 + $0x160] sm:$0xff]  ;;  %v273_v23 = vld [vmem:[%s1024_s26 + $0x170] sm:$0xff]  ;;  %270 = vst [vmem:[%s1029_s27 + $0xa8] sm:$0xff] %v269_v21 }
  0x20   : > { %272 = vst [vmem:[%s1029_s27 + $0xb0] sm:$0xff] %v271_v22  ;;  %274 = vst [vmem:[%s1029_s27 + $0xb8] sm:$0xff] %v273_v23  ;;  %v275_v24 = vld [vmem:[%s1024_s26 + $0x180] sm:$0xff]  ;;  %v277_v25 = vld [vmem:[%s1024_s26 + $0x190] sm:$0xff] }
  0x21   : > { %v279_v26 = vld [vmem:[%s1024_s26 + $0x1a0] sm:$0xff]  ;;  %276 = vst [vmem:[%s1029_s27 + $0xc0] sm:$0xff] %v275_v24  ;;  %278 = vst [vmem:[%s1029_s27 + $0xc8] sm:$0xff] %v277_v25  ;;  %v281_v27 = vld [vmem:[%s1024_s26 + $0x1b0] sm:$0xff] }
  0x22   : > { %280 = vst [vmem:[%s1029_s27 + $0xd0] sm:$0xff] %v279_v26  ;;  %v283_v28 = vld [vmem:[%s1024_s26 + $0x1c0] sm:$0xff]  ;;  %v285_v29 = vld [vmem:[%s1024_s26 + $0x1d0] sm:$0xff]  ;;  %282 = vst [vmem:[%s1029_s27 + $0xd8] sm:$0xff] %v281_v27 }
  0x23   : > { %284 = vst [vmem:[%s1029_s27 + $0xe0] sm:$0xff] %v283_v28  ;;  %286 = vst [vmem:[%s1029_s27 + $0xe8] sm:$0xff] %v285_v29  ;;  %v287_v30 = vld [vmem:[%s1024_s26 + $0x1e0] sm:$0xff]  ;;  %v289_v31 = vld [vmem:[%s1024_s26 + $0x1f0] sm:$0xff] }
  0x24   : > { %288 = vst [vmem:[%s1029_s27 + $0xf0] sm:$0xff] %v287_v30  ;;  %290 = vst [vmem:[%s1029_s27 + $0xf8] sm:$0xff] %v289_v31 }
  0x25 PF: > { %p772_p7 = scmp.ge.s32.totalorder %s961_s14, 1  ;;  %p295_p8 = scmp.lt.s32.totalorder %s961_s14, 3 }
  0x27   : > { %p296_p9 = pnand %p772_p7, %p295_p8 }
  0x28   : > { %s302_s28 = sand.u32 (!%p296_p9), 1, %s953_s12   ;;  %v935_v32 = vld [vmem:[%s1174_s0 + $0x4] ss:$8 sps:$4 sm:$0xff] (!%p296_p9)   ;;  %v963_v33 = vmov (!%p296_p9), 0   ;;  %v938_v34 = vld [vmem:[%s1174_s0 + $0x14] ss:$8 sps:$4 sm:$0xff] (!%p296_p9)  }
  0x29   : > { %299 = sbr.rel (%p296_p9) target bundleno = 338 (0x152), region = 66  ;;  %s773_s29 = sshll.u32 (!%p296_p9), %s302_s28, 8  ;;  %884 = vset.pattern.permute.xlu1 (!%p296_p9), %v963_v33  ;;  %883 = vset.pattern.permute.xlu0 (!%p296_p9), %v963_v33  ;;  %v364_v35 = vld [vmem:[%s1176_s2 + $0x10] sm:$0xff] (!%p296_p9)  ;;  %v362_v49 = vld [vmem:[%s1176_s2] sm:$0xff] (!%p296_p9)  ;;  %v365_v50 = vld [vmem:[%s1176_s2 + $0x18] sm:$0xff] (!%p296_p9) }
  0x2a   : > { %s1106_s9 = scalar_lea.vmem (!%p296_p9), [#allocation2], %s773_s29  ;;  %598 = vmatprep.mubr.bf16.mxu0 (!%p296_p9), %v935_v32  ;;  %378 = vperm.xlu1 (!%p296_p9), %884, %v364_v35   ;;  %v363_v52 = vld [vmem:[%s1176_s2 + $0x8] sm:$0xff] (!%p296_p9)  ;;  %v936_v8 = vld [vmem:[%s1174_s0 + $0x10] ss:$8 sps:$4 sm:$0xff] (!%p296_p9)   ;;  %s774_s27 = sshll.u32 (!%p296_p9), %s302_s28, 5 }
  0x2b   : > { %v885_v36 = vld [vmem:[%s1106_s9 + $0x4] ss:$8 sps:$4 sm:$0xff] (!%p296_p9)   ;;  %v887_v37 = vld [vmem:[%s1106_s9] ss:$8 sps:$4 sm:$0xff] (!%p296_p9)   ;;  %608 = vmatprep.mubr.bf16.mxu1 (!%p296_p9), %v938_v34  ;;  %v888_v38 = vld [vmem:[%s1106_s9 + $0x14] ss:$8 sps:$4 sm:$0xff] (!%p296_p9)   ;;  %368 = vperm.xlu0 (!%p296_p9), %883, %v362_v49  }
  0x2c   : > { %566 = vmatprep.subr.bf16.mxu0 (!%p296_p9), %v885_v36  ;;  %826 = vmatprep.subr.bf16.mxu1 (!%p296_p9), %v885_v36  ;;  %v890_v39 = vld [vmem:[%s1106_s9 + $0x10] ss:$8 sps:$4 sm:$0xff] (!%p296_p9)   ;;  %v891_v40 = vld [vmem:[%s1106_s9 + $0x24] ss:$8 sps:$4 sm:$0xff] (!%p296_p9)   ;;  %v893_v41 = vld [vmem:[%s1106_s9 + $0x20] ss:$8 sps:$4 sm:$0xff] (!%p296_p9)  }
  0x2d   : > { %567 = vmatpush1.bf16.msra.mxu0 (!%p296_p9), %v887_v37  ;;  %842 = vmatpush1.bf16.msra.mxu1 (!%p296_p9), %v887_v37  ;;  %v894_v42 = vld [vmem:[%s1106_s9 + $0x34] ss:$8 sps:$4 sm:$0xff] (!%p296_p9)   ;;  %v896_v43 = vld [vmem:[%s1106_s9 + $0x30] ss:$8 sps:$4 sm:$0xff] (!%p296_p9)   ;;  %v897_v44 = vld [vmem:[%s1106_s9 + $0x44] ss:$8 sps:$4 sm:$0xff] (!%p296_p9)  }
  0x2e   : > { %568 = vmatprep.subr.bf16.mxu0 (!%p296_p9), %v888_v38  ;;  %827 = vmatprep.subr.bf16.mxu1 (!%p296_p9), %v888_v38  ;;  %v899_v45 = vld [vmem:[%s1106_s9 + $0x40] ss:$8 sps:$4 sm:$0xff] (!%p296_p9)   ;;  %v900_v46 = vld [vmem:[%s1106_s9 + $0x54] ss:$8 sps:$4 sm:$0xff] (!%p296_p9)   ;;  %v902_v47 = vld [vmem:[%s1106_s9 + $0x50] ss:$8 sps:$4 sm:$0xff] (!%p296_p9)  }
  0x2f   : > { %v903_v48 = vld [vmem:[%s1106_s9 + $0x64] ss:$8 sps:$4 sm:$0xff] (!%p296_p9)   ;;  %383 = vperm.xlu1 (!%p296_p9), %884, %v365_v50   ;;  %v905_v51 = vld [vmem:[%s1106_s9 + $0x60] ss:$8 sps:$4 sm:$0xff] (!%p296_p9)   ;;  %v906_v53 = vld [vmem:[%s1106_s9 + $0x74] ss:$8 sps:$4 sm:$0xff] (!%p296_p9)   ;;  %373 = vperm.xlu0 (!%p296_p9), %883, %v363_v52  }
  0x30   : > { %v908_v54 = vld [vmem:[%s1106_s9 + $0x70] ss:$8 sps:$4 sm:$0xff]   ;;  %v909_v55 = vld [vmem:[%s1106_s9 + $0x84] ss:$8 sps:$4 sm:$0xff]   ;;  %v911_v56 = vld [vmem:[%s1106_s9 + $0x80] ss:$8 sps:$4 sm:$0xff]  }
  0x31   : > { %569 = vmatpush1.bf16.msra.mxu0 %v890_v39  ;;  %843 = vmatpush1.bf16.msra.mxu1 %v890_v39  ;;  %v912_v57 = vld [vmem:[%s1106_s9 + $0x94] ss:$8 sps:$4 sm:$0xff]   ;;  %v914_v58 = vld [vmem:[%s1106_s9 + $0x90] ss:$8 sps:$4 sm:$0xff]   ;;  %v915_v59 = vld [vmem:[%s1106_s9 + $0xa4] ss:$8 sps:$4 sm:$0xff]  }
  0x32   : > { %570 = vmatprep.subr.bf16.mxu0 %v891_v40  ;;  %828 = vmatprep.subr.bf16.mxu1 %v891_v40  ;;  %v917_v60 = vld [vmem:[%s1106_s9 + $0xa0] ss:$8 sps:$4 sm:$0xff]   ;;  %v918_v61 = vld [vmem:[%s1106_s9 + $0xb4] ss:$8 sps:$4 sm:$0xff]   ;;  %v920_v62 = vld [vmem:[%s1106_s9 + $0xb0] ss:$8 sps:$4 sm:$0xff]  }
  0x33   : > { %v921_v63 = vld [vmem:[%s1106_s9 + $0xc4] ss:$8 sps:$4 sm:$0xff]   ;;  %v923_v0 = vld [vmem:[%s1106_s9 + $0xc0] ss:$8 sps:$4 sm:$0xff]   ;;  %v924_v1 = vld [vmem:[%s1106_s9 + $0xd4] ss:$8 sps:$4 sm:$0xff]  }
  0x34   : > { %v926_v2 = vld [vmem:[%s1106_s9 + $0xd0] ss:$8 sps:$4 sm:$0xff]   ;;  %v927_v3 = vld [vmem:[%s1106_s9 + $0xe4] ss:$8 sps:$4 sm:$0xff]   ;;  %v929_v4 = vld [vmem:[%s1106_s9 + $0xe0] ss:$8 sps:$4 sm:$0xff]  }
  0x35   : > { %571 = vmatpush1.bf16.msra.mxu0 %v893_v41  ;;  %844 = vmatpush1.bf16.msra.mxu1 %v893_v41  ;;  %v930_v5 = vld [vmem:[%s1106_s9 + $0xf4] ss:$8 sps:$4 sm:$0xff]   ;;  %v932_v6 = vld [vmem:[%s1106_s9 + $0xf0] ss:$8 sps:$4 sm:$0xff]   ;;  %v933_v7 = vld [vmem:[%s1174_s0] ss:$8 sps:$4 sm:$0xff]  }
  0x36   : > { %572 = vmatprep.subr.bf16.mxu0 %v894_v42  ;;  %829 = vmatprep.subr.bf16.mxu1 %v894_v42  ;;  %s323_s12 = scalar_lea.vmem [#allocation3], %s774_s27  ;;  %s825_s28 = sshll.u32 (%p1014_p5), %s765_s15, 3 }
  0x37   : > { %s664_s4 = scalar_lea.vmem (%p1014_p5), %s1177_s3, %s825_s28 }
  0x39   : > { %573 = vmatpush1.bf16.msra.mxu0 %v896_v43  ;;  %845 = vmatpush1.bf16.msra.mxu1 %v896_v43 }
  0x3a   : > { %574 = vmatprep.subr.bf16.mxu0 %v897_v44  ;;  %830 = vmatprep.subr.bf16.mxu1 %v897_v44 }
  0x3d   : > { %575 = vmatpush1.bf16.msra.mxu0 %v899_v45  ;;  %846 = vmatpush1.bf16.msra.mxu1 %v899_v45 }
  0x3e   : > { %576 = vmatprep.subr.bf16.mxu0 %v900_v46  ;;  %831 = vmatprep.subr.bf16.mxu1 %v900_v46 }
  0x41   : > { %577 = vmatpush1.bf16.msra.mxu0 %v902_v47  ;;  %847 = vmatpush1.bf16.msra.mxu1 %v902_v47 }
  0x42   : > { %578 = vmatprep.subr.bf16.mxu0 %v903_v48  ;;  %832 = vmatprep.subr.bf16.mxu1 %v903_v48 }
  0x45   : > { %579 = vmatpush1.bf16.msra.mxu0 %v905_v51  ;;  %848 = vmatpush1.bf16.msra.mxu1 %v905_v51 }
  0x46   : > { %580 = vmatprep.subr.bf16.mxu0 %v906_v53  ;;  %833 = vmatprep.subr.bf16.mxu1 %v906_v53 }
  0x49   : > { %581 = vmatpush1.bf16.msra.mxu0 %v908_v54  ;;  %849 = vmatpush1.bf16.msra.mxu1 %v908_v54 }
  0x4a   : > { %582 = vmatprep.subr.bf16.mxu0 %v909_v55  ;;  %834 = vmatprep.subr.bf16.mxu1 %v909_v55 }
  0x4d   : > { %583 = vmatpush1.bf16.msra.mxu0 %v911_v56  ;;  %850 = vmatpush1.bf16.msra.mxu1 %v911_v56 }
  0x4e   : > { %584 = vmatprep.subr.bf16.mxu0 %v912_v57  ;;  %835 = vmatprep.subr.bf16.mxu1 %v912_v57 }
  0x51   : > { %585 = vmatpush1.bf16.msra.mxu0 %v914_v58  ;;  %851 = vmatpush1.bf16.msra.mxu1 %v914_v58 }
  0x52   : > { %586 = vmatprep.subr.bf16.mxu0 %v915_v59  ;;  %836 = vmatprep.subr.bf16.mxu1 %v915_v59 }
  0x55   : > { %587 = vmatpush1.bf16.msra.mxu0 %v917_v60  ;;  %852 = vmatpush1.bf16.msra.mxu1 %v917_v60 }
  0x56   : > { %588 = vmatprep.subr.bf16.mxu0 %v918_v61  ;;  %837 = vmatprep.subr.bf16.mxu1 %v918_v61 }
  0x59   : > { %589 = vmatpush1.bf16.msra.mxu0 %v920_v62  ;;  %853 = vmatpush1.bf16.msra.mxu1 %v920_v62 }
  0x5a   : > { %590 = vmatprep.subr.bf16.mxu0 %v921_v63  ;;  %838 = vmatprep.subr.bf16.mxu1 %v921_v63 }
  0x5d   : > { %591 = vmatpush1.bf16.msra.mxu0 %v923_v0  ;;  %854 = vmatpush1.bf16.msra.mxu1 %v923_v0 }
  0x5e   : > { %592 = vmatprep.subr.bf16.mxu0 %v924_v1  ;;  %839 = vmatprep.subr.bf16.mxu1 %v924_v1 }
  0x61   : > { %593 = vmatpush1.bf16.msra.mxu0 %v926_v2  ;;  %855 = vmatpush1.bf16.msra.mxu1 %v926_v2 }
  0x62   : > { %594 = vmatprep.subr.bf16.mxu0 %v927_v3  ;;  %840 = vmatprep.subr.bf16.mxu1 %v927_v3 }
  0x65   : > { %595 = vmatpush1.bf16.msra.mxu0 %v929_v4  ;;  %856 = vmatpush1.bf16.msra.mxu1 %v929_v4 }
  0x66   : > { %596 = vmatprep.subr.bf16.mxu0 %v930_v5  ;;  %841 = vmatprep.subr.bf16.mxu1 %v930_v5 }
  0x69   : > { %597 = vmatpush1.bf16.msra.mxu0 %v932_v6  ;;  %857 = vmatpush1.bf16.msra.mxu1 %v932_v6 }
  0x6c   : > { %599 = vmatmul.mubr.bf16.vlgmr.msra.gmra.mrb[0].mxu0 %v933_v7  ;;  %609 = vmatmul.mubr.bf16.vlgmr.msra.gmra.mrb[0].mxu1 %v936_v8 }
  0xa9   : > { %v379_v9 = vpop.permute.xlu1 %378 }
  0xaa   : > { %v369_v10 = vpop.permute.xlu0 %368 }
  0xae   : > { %v384_v11 = vpop.permute.xlu1 %383  ;;  %v374_v12 = vpop.permute.xlu0 %373 }
 0x13f   : > { %v600_v13 = vpop.f32.mrb[0].mxu0  ;;  %v610_v14 = vpop.f32.mrb[0].mxu1 }
 0x140   : > { %v601_v15 = vadd.f32 %v600_v13, %v369_v10  ;;  %v611_v16 = vadd.f32 %v610_v14, %v379_v9  ;;  %v602_v17 = vpop.f32.mrb[1].mxu0  ;;  %v612_v18 = vpop.f32.mrb[1].mxu1 }
 0x141   : > { %v603_v19 = vadd.f32 %v602_v17, %v369_v10  ;;  %v613_v20 = vadd.f32 %v612_v18, %v379_v9  ;;  %v604_v21 = vpop.f32.mrb[2].mxu0  ;;  %v614_v22 = vpop.f32.mrb[2].mxu1 }
 0x142   : > { %v619_v23 = vmax.f32 %v601_v15, 0.0  ;;  %v623_v24 = vmax.f32 %v611_v16, 0.0  ;;  %v605_v25 = vadd.f32 %v604_v21, %v374_v12  ;;  %v615_v26 = vadd.f32 %v614_v22, %v384_v11  ;;  %v606_v27 = vpop.f32.mrb[3].mxu0  ;;  %v616_v28 = vpop.f32.mrb[3].mxu1 }
 0x143   : > { %v620_v29 = vmax.f32 %v603_v19, 0.0  ;;  %v624_v30 = vmax.f32 %v613_v20, 0.0  ;;  %v607_v31 = vadd.f32 %v606_v27, %v374_v12  ;;  %v617_v32 = vadd.f32 %v616_v28, %v384_v11  ;;  %661 = sbr.rel (!%p1014_p5) target bundleno = 338 (0x152), region = 74 }
 0x144   : > { %v621_v33 = vmax.f32 %v605_v25, 0.0  ;;  %v625_v34 = vmax.f32 %v615_v26, 0.0 }
 0x145   : > { %v821_v35 = vpack.c.bf16 %v620_v29, %v619_v23  ;;  %v823_v36 = vpack.c.bf16 %v624_v30, %v623_v24  ;;  %v622_v37 = vmax.f32 %v607_v31, 0.0  ;;  %v626_v38 = vmax.f32 %v617_v32, 0.0 }
 0x147   : > { %651 = vst [vmem:[%s323_s12] sm:$0xff] %v821_v35  ;;  %653 = vst [vmem:[%s323_s12 + $0x10] sm:$0xff] %v823_v36  ;;  %v822_v39 = vpack.c.bf16 %v622_v37, %v621_v33  ;;  %v824_v40 = vpack.c.bf16 %v626_v38, %v625_v34 }
 0x149   : > { %652 = vst [vmem:[%s323_s12 + $0x8] sm:$0xff] %v822_v39  ;;  %654 = vst [vmem:[%s323_s12 + $0x18] sm:$0xff] %v824_v40 }
 0x14e   : > { %v698_v41 = vld [vmem:[%s323_s12] sm:$0xff]  ;;  %v702_v43 = vld [vmem:[%s323_s12 + $0x10] sm:$0xff] }
 0x14f   : > { %699 = vst [vmem:[%s664_s4] sm:$0xff] %v698_v41  ;;  %703 = vst [vmem:[%s664_s4 + $0x20] sm:$0xff] %v702_v43 }
 0x150   : > { %v700_v42 = vld [vmem:[%s323_s12 + $0x8] sm:$0xff]  ;;  %v704_v44 = vld [vmem:[%s323_s12 + $0x18] sm:$0xff] }
 0x151   : > { %701 = vst [vmem:[%s664_s4 + $0x10] sm:$0xff] %v700_v42  ;;  %705 = vst [vmem:[%s664_s4 + $0x30] sm:$0xff] %v704_v44 }
 0x152 PF: > { %p10_p10 = scmp.ge.s32.totalorder %s1001_s16, 4   ;;  %s1179_s12 = smov %s957_s13 }
 0x153   : > { %s1180_s13 = smov %s1012_s19  ;;  %s1181_s14 = smov %s1001_s16 }
 0x154   :  { %12 = sbr.rel (!%p10_p10) target bundleno = 2 (0x2), region = 143 }

// kernel: lightweight_autoencoder_forward.9
= control target key start
LH: loop header
LB: loop body
LE: loop exit
PB: predicated region body
PF: predicated region fallthrough
CT: control target
= control target key end

     0   :  { %s932_s12 = smov 0   ;;  %s1055_s0 = inlined_call_operand.vmem [shape: bf16[64,512], index: 0, kind: input, shape index: {}]   ;;  %s1056_s1 = inlined_call_operand.vmem [shape: bf16[512,128], index: 1, kind: input, shape index: {}]   ;;  %s1057_s2 = inlined_call_operand.vmem [shape: f32[64,1], index: 2, kind: input, shape index: {}]   ;;  %s1058_s3 = inlined_call_operand.vmem [shape: bf16[64,128], index: 3, kind: output, shape index: {}]  }
   0x1 LB: > { %s718_s13 = sadd.s32 4294967295, %s909_s12   ;;  %p722_p0 = scmp.ge.s32.totalorder %s909_s12, 1  ;;  %s909_s12 = sphi %s932_s12, %s13_s12  }
   0x2   : > { %p150_p1 = scmp.lt.s32.totalorder %s909_s12, 3 }
   0x4   : > { %p151_p2 = pnand %p722_p0, %p150_p1 }
   0x5   : > { %v859_v0 = vld [vmem:[%s1056_s1 + $0x40] sm:$0xff] (!%p151_p2)   ;;  %v911_v4 = vmov (!%p151_p2), 0   ;;  %v863_v5 = vld [vmem:[%s1056_s1 + $0x48] sm:$0xff] (!%p151_p2)   ;;  %v867_v9 = vld [vmem:[%s1056_s1 + $0x50] sm:$0xff] (!%p151_p2)   ;;  %s723_s21 = sshll.u32 (!%p151_p2), %s718_s13, 2 }
   0x6   : > { %154 = sbr.rel (%p151_p2) target bundleno = 273 (0x111), region = 32  ;;  %v860_v1 = vld [vmem:[%s1056_s1 + $0xc0] sm:$0xff] (!%p151_p2)   ;;  %792 = vmatprep.subr.bf16.mxu0 (!%p151_p2), %v859_v0  ;;  %857 = vset.pattern.permute.xlu0 (!%p151_p2), %v911_v4  ;;  %v864_v6 = vld [vmem:[%s1056_s1 + $0xc8] sm:$0xff] (!%p151_p2)   ;;  %v868_v10 = vld [vmem:[%s1056_s1 + $0xd0] sm:$0xff] (!%p151_p2)   ;;  %p181_p3 = scmp.lt.s32.totalorder (!%p151_p2), %s723_s21, 7 }
   0x7   : > { %v861_v2 = vld [vmem:[%s1056_s1] sm:$0xff] (!%p151_p2)   ;;  %820 = vmatprep.subr.bf16.mxu1 (!%p151_p2), %v860_v1  ;;  %858 = vset.pattern.permute.xlu1 (!%p151_p2), %v911_v4  ;;  %v865_v7 = vld [vmem:[%s1056_s1 + $0x8] sm:$0xff] (!%p151_p2)   ;;  %v869_v11 = vld [vmem:[%s1056_s1 + $0x10] sm:$0xff] (!%p151_p2)  }
   0x8   : > { %v862_v3 = vld [vmem:[%s1056_s1 + $0x80] sm:$0xff] (!%p151_p2)   ;;  %793 = vmatpush3.bf16.msra.mxu0 (!%p151_p2), %v861_v2  ;;  %v866_v8 = vld [vmem:[%s1056_s1 + $0x88] sm:$0xff] (!%p151_p2)   ;;  %v870_v12 = vld [vmem:[%s1056_s1 + $0x90] sm:$0xff] (!%p151_p2)  }
   0x9   : > { %821 = vmatpush3.bf16.msra.mxu1 (!%p151_p2), %v862_v3  ;;  %794 = vmatprep.subr.bf16.mxu0 (!%p151_p2), %v863_v5  ;;  %v871_v13 = vld [vmem:[%s1056_s1 + $0x58] sm:$0xff] (!%p151_p2)   ;;  %v875_v17 = vld [vmem:[%s1056_s1 + $0x60] sm:$0xff] (!%p151_p2)   ;;  %v879_v21 = vld [vmem:[%s1056_s1 + $0x68] sm:$0xff] (!%p151_p2)  }
   0xa   : > { %822 = vmatprep.subr.bf16.mxu1 (!%p151_p2), %v864_v6  ;;  %v872_v14 = vld [vmem:[%s1056_s1 + $0xd8] sm:$0xff] (!%p151_p2)   ;;  %v876_v18 = vld [vmem:[%s1056_s1 + $0xe0] sm:$0xff] (!%p151_p2)   ;;  %v880_v22 = vld [vmem:[%s1056_s1 + $0xe8] sm:$0xff] (!%p151_p2)  }
   0xb   : > { %v873_v15 = vld [vmem:[%s1056_s1 + $0x18] sm:$0xff] (!%p151_p2)   ;;  %v877_v19 = vld [vmem:[%s1056_s1 + $0x20] sm:$0xff] (!%p151_p2)   ;;  %v881_v23 = vld [vmem:[%s1056_s1 + $0x28] sm:$0xff] (!%p151_p2)  }
   0xc   : > { %795 = vmatpush3.bf16.msra.mxu0 (!%p151_p2), %v865_v7  ;;  %v874_v16 = vld [vmem:[%s1056_s1 + $0x98] sm:$0xff] (!%p151_p2)   ;;  %v878_v20 = vld [vmem:[%s1056_s1 + $0xa0] sm:$0xff] (!%p151_p2)   ;;  %v882_v24 = vld [vmem:[%s1056_s1 + $0xa8] sm:$0xff] (!%p151_p2)  }
   0xd   : > { %823 = vmatpush3.bf16.msra.mxu1 %v866_v8  ;;  %796 = vmatprep.subr.bf16.mxu0 %v867_v9  ;;  %s1060_s21 = smov (!%p181_p3, %s723_s21), 7  ;;  %v883_v25 = vld [vmem:[%s1056_s1 + $0x70] sm:$0xff]   ;;  %v887_v29 = vld [vmem:[%s1056_s1 + $0x78] sm:$0xff]  }
   0xe   : > { %824 = vmatprep.subr.bf16.mxu1 %v868_v10  ;;  %v884_v26 = vld [vmem:[%s1056_s1 + $0xf0] sm:$0xff]   ;;  %s776_s18 = sshll.u32 %s1060_s21, 4  ;;  %v888_v30 = vld [vmem:[%s1056_s1 + $0xf8] sm:$0xff]   ;;  %s727_s5 = sshll.u32 %s1060_s21, 3 }
   0xf   : > { %v885_v27 = vld [vmem:[%s1056_s1 + $0x30] sm:$0xff]   ;;  %s185_s28 = scalar_lea.vmem %s1055_s0, %s776_s18  ;;  %v889_v31 = vld [vmem:[%s1056_s1 + $0x38] sm:$0xff]   ;;  %s191_s8 = scalar_lea.vmem %s1057_s2, %s727_s5 }
  0x10   : > { %797 = vmatpush3.bf16.msra.mxu0 %v869_v11  ;;  %v886_v28 = vld [vmem:[%s1056_s1 + $0xb0] sm:$0xff]   ;;  %v890_v32 = vld [vmem:[%s1056_s1 + $0xb8] sm:$0xff]   ;;  %v272_v39 = vld [vmem:[%s191_s8] sm:$0xff]  ;;  %s729_s9 = sshll.u32 %s1060_s21, 2 }
  0x11   : > { %825 = vmatpush3.bf16.msra.mxu1 %v870_v12  ;;  %798 = vmatprep.subr.bf16.mxu0 %v871_v13  ;;  %v891_v33 = vld [vmem:[%s185_s28] ss:$16 sps:$4 sm:$0xff]   ;;  %v893_v34 = vld [vmem:[%s185_s28 + $0x4] ss:$16 sps:$4 sm:$0xff]   ;;  %v894_v35 = vld [vmem:[%s185_s28 + $0x8] ss:$16 sps:$4 sm:$0xff]   ;;  %s197_s14 = scalar_lea.vmem %s1058_s3, %s729_s9 }
  0x12   : > { %826 = vmatprep.subr.bf16.mxu1 %v872_v14  ;;  %v896_v36 = vld [vmem:[%s185_s28 + $0xc] ss:$16 sps:$4 sm:$0xff]   ;;  %560 = vmatprep.mubr.bf16.mxu0 %v893_v34  ;;  %v897_v37 = vld [vmem:[%s185_s28 + $0x24] ss:$16 sps:$4 sm:$0xff]   ;;  %v901_v42 = vld [vmem:[%s185_s28 + $0x20] ss:$16 sps:$4 sm:$0xff]  }
  0x13   : > { %609 = vmatprep.mubr.bf16.mxu1 %v896_v36  ;;  %v899_v38 = vld [vmem:[%s185_s28 + $0x2c] ss:$16 sps:$4 sm:$0xff]   ;;  %v274_v40 = vld [vmem:[%s191_s8 + $0x10] sm:$0xff]  ;;  %278 = vperm.xlu0 %857, %v272_v39   ;;  %v902_v44 = vld [vmem:[%s185_s28 + $0x28] ss:$16 sps:$4 sm:$0xff]  }
  0x14   : > { %799 = vmatpush3.bf16.msra.mxu0 %v873_v15  ;;  %288 = vperm.xlu1 %858, %v274_v40   ;;  %v273_v41 = vld [vmem:[%s191_s8 + $0x8] sm:$0xff]  ;;  %v275_v43 = vld [vmem:[%s191_s8 + $0x18] sm:$0xff] }
  0x15   : > { %827 = vmatpush3.bf16.msra.mxu1 %v874_v16  ;;  %800 = vmatprep.subr.bf16.mxu0 %v875_v17 }
  0x16   : > { %828 = vmatprep.subr.bf16.mxu1 %v876_v18 }
  0x17   : > { %283 = vperm.xlu0 %857, %v273_v41  }
  0x18   : > { %801 = vmatpush3.bf16.msra.mxu0 %v877_v19  ;;  %293 = vperm.xlu1 %858, %v275_v43  }
  0x19   : > { %829 = vmatpush3.bf16.msra.mxu1 %v878_v20  ;;  %802 = vmatprep.subr.bf16.mxu0 %v879_v21 }
  0x1a   : > { %830 = vmatprep.subr.bf16.mxu1 %v880_v22 }
  0x1c   : > { %803 = vmatpush3.bf16.msra.mxu0 %v881_v23 }
  0x1d   : > { %831 = vmatpush3.bf16.msra.mxu1 %v882_v24  ;;  %804 = vmatprep.subr.bf16.mxu0 %v883_v25 }
  0x1e   : > { %832 = vmatprep.subr.bf16.mxu1 %v884_v26 }
  0x20   : > { %805 = vmatpush3.bf16.msra.mxu0 %v885_v27 }
  0x21   : > { %833 = vmatpush3.bf16.msra.mxu1 %v886_v28  ;;  %806 = vmatprep.subr.bf16.mxu0 %v887_v29 }
  0x22   : > { %834 = vmatprep.subr.bf16.mxu1 %v888_v30 }
  0x24   : > { %807 = vmatpush3.bf16.msra.mxu0 %v889_v31 }
  0x25   : > { %835 = vmatpush3.bf16.msra.mxu1 %v890_v32 }
  0x27   : > { %561 = vmatmul.mubr.bf16.vlgmr.msra.gmra.mrb[0].mxu0 %v891_v33 }
  0x28   : > { %610 = vmatmul.mubr.bf16.vlgmr.msra.gmra.mrb[0].mxu1 %v894_v35  ;;  %568 = vmatprep.mubr.bf16.mxu0 %v897_v37 }
  0x29   : > { %617 = vmatprep.mubr.bf16.mxu1 %v899_v38 }
  0x2f   : > { %569 = vmatmul.mubr.bf16.gmra.mrb[4].mxu0 %v901_v42 }
  0x30   : > { %618 = vmatmul.mubr.bf16.gmra.mrb[4].mxu1 %v902_v44 }
  0x92   : > { %v279_v45 = vpop.permute.xlu0 %278 }
  0x93   : > { %v289_v62 = vpop.permute.xlu1 %288 }
  0x96   : > { %v284_v47 = vpop.permute.xlu0 %283 }
  0x97   : > { %v294_v15 = vpop.permute.xlu1 %293 }
  0xfa   : > { %v808_v46 = vpop.f32.mrb[0].mxu0 }
  0xfb   : > { %v836_v48 = vpop.f32.mrb[0].mxu1  ;;  %v809_v49 = vpop.f32.mrb[1].mxu0 }
  0xfc   : > { %v810_v50 = vadd.f32 %v809_v49, %v808_v46  ;;  %v837_v51 = vpop.f32.mrb[1].mxu1  ;;  %v811_v52 = vpop.f32.mrb[2].mxu0 }
  0xfd   : > { %v838_v53 = vadd.f32 %v837_v51, %v836_v48  ;;  %v839_v54 = vpop.f32.mrb[2].mxu1  ;;  %v812_v55 = vpop.f32.mrb[3].mxu0 }
  0xfe   : > { %v563_v56 = vadd.f32 %v810_v50, %v279_v45  ;;  %v813_v57 = vadd.f32 %v812_v55, %v811_v52  ;;  %v840_v58 = vpop.f32.mrb[3].mxu1 }
  0xff   : > { %v841_v59 = vadd.f32 %v840_v58, %v839_v54 }
 0x100   : > { %v612_v60 = vadd.f32 %v838_v53, %v563_v56  ;;  %v566_v61 = vadd.f32 %v813_v57, %v284_v47 }
 0x102   : > { %v615_v63 = vadd.f32 %v841_v59, %v566_v61  ;;  %v814_v0 = vpop.f32.mrb[4].mxu0  ;;  %v626_v3 = vmax.f32 %v612_v60, 0.0 }
 0x103   : > { %v842_v1 = vpop.f32.mrb[4].mxu1  ;;  %v815_v2 = vpop.f32.mrb[5].mxu0 }
 0x104   : > { %v627_v4 = vmax.f32 %v615_v63, 0.0  ;;  %v816_v5 = vadd.f32 %v815_v2, %v814_v0  ;;  %v843_v6 = vpop.f32.mrb[5].mxu1  ;;  %v817_v7 = vpop.f32.mrb[6].mxu0 }
 0x105   : > { %v844_v8 = vadd.f32 %v843_v6, %v842_v1  ;;  %v845_v9 = vpop.f32.mrb[6].mxu1  ;;  %v818_v10 = vpop.f32.mrb[7].mxu0 }
 0x106   : > { %v784_v11 = vpack.c.bf16 %v627_v4, %v626_v3  ;;  %v571_v12 = vadd.f32 %v816_v5, %v289_v62  ;;  %v819_v13 = vadd.f32 %v818_v10, %v817_v7  ;;  %v846_v14 = vpop.f32.mrb[7].mxu1 }
 0x107   : > { %v847_v16 = vadd.f32 %v846_v14, %v845_v9 }
 0x108   : > { %785 = vst [vmem:[%s197_s14] sm:$0xff] %v784_v11   ;;  %v620_v17 = vadd.f32 %v844_v8, %v571_v12  ;;  %v574_v18 = vadd.f32 %v819_v13, %v294_v15 }
 0x10a   : > { %v623_v19 = vadd.f32 %v847_v16, %v574_v18  ;;  %v628_v20 = vmax.f32 %v620_v17, 0.0 }
 0x10c   : > { %v629_v21 = vmax.f32 %v623_v19, 0.0 }
 0x10e   : > { %v789_v22 = vpack.c.bf16 %v629_v21, %v628_v20 }
 0x110   : > { %791 = vst [vmem:[%s197_s14 + $0x8] sm:$0xff] %v789_v22  }
 0x111 PF: > { %s13_s12 = sadd.s32 1, %s909_s12  }
 0x112   : > { %p10_p4 = scmp.ge.s32.totalorder %s13_s12, 4  }
 0x114   :  { %12 = sbr.rel (!%p10_p4) target bundleno = 1 (0x1), region = 65 }

// kernel: lightweight_autoencoder_forward.10
= control target key start
LH: loop header
LB: loop body
LE: loop exit
PB: predicated region body
PF: predicated region fallthrough
CT: control target
= control target key end

     0   :  { %s5087_s18 = smov 0   ;;  %s5089_s19 = smov 0   ;;  %s6195_s0 = inlined_call_operand.vmem [shape: bf16[2,4096], index: 0, kind: input, shape index: {}]   ;;  %s6196_s1 = inlined_call_operand.vmem [shape: bf16[4096,128], index: 1, kind: input, shape index: {}]   ;;  %s6197_s2 = inlined_call_operand.vmem [shape: f32[1,128], index: 2, kind: input, shape index: {}]   ;;  %s6198_s3 = inlined_call_operand.vmem [shape: bf16[128,4096], index: 3, kind: input, shape index: {}]   ;;  %s6199_s4 = inlined_call_operand.vmem [shape: f32[1,4096], index: 4, kind: input, shape index: {}]   ;;  %s6200_s5 = inlined_call_operand.vmem [shape: bf16[2,4096], index: 5, kind: output, shape index: {}]  }
   0x1   :  { %s5091_s20 = smov 0  }
   0x2 LB: > { %s4051_s21 = sadd.s32 4294967295, %s5052_s20   ;;  %s5104_s22 = sadd.s32 1, %s5052_s20   ;;  %s5052_s20 = sphi %s5091_s20, %s6203_s20   ;;  %s5048_s19 = sphi %s5089_s19, %s6202_s19   ;;  %s5044_s18 = sphi %s5087_s18, %s6201_s18  }
   0x3   : > { %s82_s23 = ssub.s32 %s5052_s20, %s5104_s22  ;;  %s85_s24 = sadd.s32 1, %s5048_s19 }
   0x4   : > { %p83_p0 = scmp.eq.s32.totalorder %s82_s23, 0  ;;  %p92_p1 = scmp.ne.s32.totalorder %s5048_s19, %s5044_s18 }
   0x5   : > { %p93_p2 = scmp.eq.s32.totalorder %s5052_s20, 0  ;;  %p4054_p4 = scmp.ge.s32.totalorder %s5052_s20, 4 }
   0x6   : > { %s5113_s25 = scalar_select %p83_p0, %s5048_s19, %s85_s24  }
   0x7   : > { %p94_p3 = por %p93_p2, %p92_p1  ;;  %179 = sbr.rel (%p4054_p4) target bundleno = 50 (0x32), region = 28 }
   0xe   : > { %182 = sbr.rel (!%p94_p3) target bundleno = 50 (0x32), region = 32  ;;  %s184_s26 = sand.u32 (%p94_p3), 1, %s5048_s19  }
   0xf   : > { %s4390_s27 = sshll.u32 (%p94_p3), %s5052_s20, 5  ;;  %s4055_s28 = sshll.u32 (%p94_p3), %s184_s26, 9 }
  0x10   : > { %s5121_s6 = scalar_lea.vmem (%p94_p3), %s6198_s3, %s4390_s27  ;;  %s5126_s7 = scalar_lea.vmem (%p94_p3), [#allocation3], %s4055_s28 }
  0x11   : > { %v202_v0 = vld [vmem:[%s5121_s6] sm:$0xff] (%p94_p3)  ;;  %v204_v1 = vld [vmem:[%s5121_s6 + $0x8] sm:$0xff] (%p94_p3)  ;;  %v206_v2 = vld [vmem:[%s5121_s6 + $0x10] sm:$0xff] (%p94_p3) }
  0x12   : > { %203 = vst [vmem:[%s5126_s7] sm:$0xff] (%p94_p3), %v202_v0  ;;  %205 = vst [vmem:[%s5126_s7 + $0x8] sm:$0xff] (%p94_p3), %v204_v1  ;;  %v208_v3 = vld [vmem:[%s5121_s6 + $0x18] sm:$0xff] (%p94_p3)  ;;  %v210_v4 = vld [vmem:[%s5121_s6 + $0x80] sm:$0xff] (%p94_p3) }
  0x13   : > { %207 = vst [vmem:[%s5126_s7 + $0x10] sm:$0xff] (%p94_p3), %v206_v2  ;;  %v212_v5 = vld [vmem:[%s5121_s6 + $0x88] sm:$0xff] (%p94_p3)  ;;  %209 = vst [vmem:[%s5126_s7 + $0x18] sm:$0xff] (%p94_p3), %v208_v3  ;;  %v214_v6 = vld [vmem:[%s5121_s6 + $0x90] sm:$0xff] (%p94_p3) }
  0x14   : > { %211 = vst [vmem:[%s5126_s7 + $0x20] sm:$0xff] (%p94_p3), %v210_v4  ;;  %213 = vst [vmem:[%s5126_s7 + $0x28] sm:$0xff] (%p94_p3), %v212_v5  ;;  %v216_v7 = vld [vmem:[%s5121_s6 + $0x98] sm:$0xff] (%p94_p3)  ;;  %v218_v8 = vld [vmem:[%s5121_s6 + $0x100] sm:$0xff] (%p94_p3) }
  0x15   : > { %215 = vst [vmem:[%s5126_s7 + $0x30] sm:$0xff] %v214_v6  ;;  %217 = vst [vmem:[%s5126_s7 + $0x38] sm:$0xff] %v216_v7  ;;  %v220_v9 = vld [vmem:[%s5121_s6 + $0x108] sm:$0xff]  ;;  %v222_v10 = vld [vmem:[%s5121_s6 + $0x110] sm:$0xff] }
  0x16   : > { %219 = vst [vmem:[%s5126_s7 + $0x40] sm:$0xff] %v218_v8  ;;  %v224_v11 = vld [vmem:[%s5121_s6 + $0x118] sm:$0xff]  ;;  %221 = vst [vmem:[%s5126_s7 + $0x48] sm:$0xff] %v220_v9  ;;  %v226_v12 = vld [vmem:[%s5121_s6 + $0x180] sm:$0xff] }
  0x17   : > { %223 = vst [vmem:[%s5126_s7 + $0x50] sm:$0xff] %v222_v10  ;;  %225 = vst [vmem:[%s5126_s7 + $0x58] sm:$0xff] %v224_v11  ;;  %v228_v13 = vld [vmem:[%s5121_s6 + $0x188] sm:$0xff]  ;;  %v230_v14 = vld [vmem:[%s5121_s6 + $0x190] sm:$0xff] }
  0x18   : > { %227 = vst [vmem:[%s5126_s7 + $0x60] sm:$0xff] %v226_v12  ;;  %229 = vst [vmem:[%s5126_s7 + $0x68] sm:$0xff] %v228_v13  ;;  %v232_v15 = vld [vmem:[%s5121_s6 + $0x198] sm:$0xff]  ;;  %v234_v16 = vld [vmem:[%s5121_s6 + $0x200] sm:$0xff] }
  0x19   : > { %231 = vst [vmem:[%s5126_s7 + $0x70] sm:$0xff] %v230_v14  ;;  %v236_v17 = vld [vmem:[%s5121_s6 + $0x208] sm:$0xff]  ;;  %233 = vst [vmem:[%s5126_s7 + $0x78] sm:$0xff] %v232_v15  ;;  %v238_v18 = vld [vmem:[%s5121_s6 + $0x210] sm:$0xff] }
  0x1a   : > { %235 = vst [vmem:[%s5126_s7 + $0x80] sm:$0xff] %v234_v16  ;;  %237 = vst [vmem:[%s5126_s7 + $0x88] sm:$0xff] %v236_v17  ;;  %v240_v19 = vld [vmem:[%s5121_s6 + $0x218] sm:$0xff]  ;;  %v242_v20 = vld [vmem:[%s5121_s6 + $0x280] sm:$0xff] }
  0x1b   : > { %239 = vst [vmem:[%s5126_s7 + $0x90] sm:$0xff] %v238_v18  ;;  %241 = vst [vmem:[%s5126_s7 + $0x98] sm:$0xff] %v240_v19  ;;  %v244_v21 = vld [vmem:[%s5121_s6 + $0x288] sm:$0xff]  ;;  %v246_v22 = vld [vmem:[%s5121_s6 + $0x290] sm:$0xff] }
  0x1c   : > { %243 = vst [vmem:[%s5126_s7 + $0xa0] sm:$0xff] %v242_v20  ;;  %v248_v23 = vld [vmem:[%s5121_s6 + $0x298] sm:$0xff]  ;;  %245 = vst [vmem:[%s5126_s7 + $0xa8] sm:$0xff] %v244_v21  ;;  %v250_v24 = vld [vmem:[%s5121_s6 + $0x300] sm:$0xff] }
  0x1d   : > { %247 = vst [vmem:[%s5126_s7 + $0xb0] sm:$0xff] %v246_v22  ;;  %249 = vst [vmem:[%s5126_s7 + $0xb8] sm:$0xff] %v248_v23  ;;  %v252_v25 = vld [vmem:[%s5121_s6 + $0x308] sm:$0xff]  ;;  %v254_v26 = vld [vmem:[%s5121_s6 + $0x310] sm:$0xff] }
  0x1e   : > { %251 = vst [vmem:[%s5126_s7 + $0xc0] sm:$0xff] %v250_v24  ;;  %253 = vst [vmem:[%s5126_s7 + $0xc8] sm:$0xff] %v252_v25  ;;  %v256_v27 = vld [vmem:[%s5121_s6 + $0x318] sm:$0xff]  ;;  %v258_v28 = vld [vmem:[%s5121_s6 + $0x380] sm:$0xff] }
  0x1f   : > { %255 = vst [vmem:[%s5126_s7 + $0xd0] sm:$0xff] %v254_v26  ;;  %v260_v29 = vld [vmem:[%s5121_s6 + $0x388] sm:$0xff]  ;;  %257 = vst [vmem:[%s5126_s7 + $0xd8] sm:$0xff] %v256_v27  ;;  %v262_v30 = vld [vmem:[%s5121_s6 + $0x390] sm:$0xff] }
  0x20   : > { %259 = vst [vmem:[%s5126_s7 + $0xe0] sm:$0xff] %v258_v28  ;;  %261 = vst [vmem:[%s5126_s7 + $0xe8] sm:$0xff] %v260_v29  ;;  %v264_v31 = vld [vmem:[%s5121_s6 + $0x398] sm:$0xff]  ;;  %v266_v32 = vld [vmem:[%s5121_s6 + $0x400] sm:$0xff] }
  0x21   : > { %263 = vst [vmem:[%s5126_s7 + $0xf0] sm:$0xff] %v262_v30  ;;  %265 = vst [vmem:[%s5126_s7 + $0xf8] sm:$0xff] %v264_v31  ;;  %v268_v33 = vld [vmem:[%s5121_s6 + $0x408] sm:$0xff]  ;;  %v270_v34 = vld [vmem:[%s5121_s6 + $0x410] sm:$0xff] }
  0x22   : > { %267 = vst [vmem:[%s5126_s7 + $0x100] sm:$0xff] %v266_v32  ;;  %v272_v35 = vld [vmem:[%s5121_s6 + $0x418] sm:$0xff]  ;;  %269 = vst [vmem:[%s5126_s7 + $0x108] sm:$0xff] %v268_v33  ;;  %v274_v36 = vld [vmem:[%s5121_s6 + $0x480] sm:$0xff] }
  0x23   : > { %271 = vst [vmem:[%s5126_s7 + $0x110] sm:$0xff] %v270_v34  ;;  %273 = vst [vmem:[%s5126_s7 + $0x118] sm:$0xff] %v272_v35  ;;  %v276_v37 = vld [vmem:[%s5121_s6 + $0x488] sm:$0xff]  ;;  %v278_v38 = vld [vmem:[%s5121_s6 + $0x490] sm:$0xff] }
  0x24   : > { %275 = vst [vmem:[%s5126_s7 + $0x120] sm:$0xff] %v274_v36  ;;  %277 = vst [vmem:[%s5126_s7 + $0x128] sm:$0xff] %v276_v37  ;;  %v280_v39 = vld [vmem:[%s5121_s6 + $0x498] sm:$0xff]  ;;  %v282_v40 = vld [vmem:[%s5121_s6 + $0x500] sm:$0xff] }
  0x25   : > { %279 = vst [vmem:[%s5126_s7 + $0x130] sm:$0xff] %v278_v38  ;;  %v284_v41 = vld [vmem:[%s5121_s6 + $0x508] sm:$0xff]  ;;  %281 = vst [vmem:[%s5126_s7 + $0x138] sm:$0xff] %v280_v39  ;;  %v286_v42 = vld [vmem:[%s5121_s6 + $0x510] sm:$0xff] }
  0x26   : > { %283 = vst [vmem:[%s5126_s7 + $0x140] sm:$0xff] %v282_v40  ;;  %285 = vst [vmem:[%s5126_s7 + $0x148] sm:$0xff] %v284_v41  ;;  %v288_v43 = vld [vmem:[%s5121_s6 + $0x518] sm:$0xff]  ;;  %v290_v44 = vld [vmem:[%s5121_s6 + $0x580] sm:$0xff] }
  0x27   : > { %287 = vst [vmem:[%s5126_s7 + $0x150] sm:$0xff] %v286_v42  ;;  %289 = vst [vmem:[%s5126_s7 + $0x158] sm:$0xff] %v288_v43  ;;  %v292_v45 = vld [vmem:[%s5121_s6 + $0x588] sm:$0xff]  ;;  %v294_v46 = vld [vmem:[%s5121_s6 + $0x590] sm:$0xff] }
  0x28   : > { %291 = vst [vmem:[%s5126_s7 + $0x160] sm:$0xff] %v290_v44  ;;  %v296_v47 = vld [vmem:[%s5121_s6 + $0x598] sm:$0xff]  ;;  %293 = vst [vmem:[%s5126_s7 + $0x168] sm:$0xff] %v292_v45  ;;  %v298_v48 = vld [vmem:[%s5121_s6 + $0x600] sm:$0xff] }
  0x29   : > { %295 = vst [vmem:[%s5126_s7 + $0x170] sm:$0xff] %v294_v46  ;;  %297 = vst [vmem:[%s5126_s7 + $0x178] sm:$0xff] %v296_v47  ;;  %v300_v49 = vld [vmem:[%s5121_s6 + $0x608] sm:$0xff]  ;;  %v302_v50 = vld [vmem:[%s5121_s6 + $0x610] sm:$0xff] }
  0x2a   : > { %299 = vst [vmem:[%s5126_s7 + $0x180] sm:$0xff] %v298_v48  ;;  %301 = vst [vmem:[%s5126_s7 + $0x188] sm:$0xff] %v300_v49  ;;  %v304_v51 = vld [vmem:[%s5121_s6 + $0x618] sm:$0xff]  ;;  %v306_v52 = vld [vmem:[%s5121_s6 + $0x680] sm:$0xff] }
  0x2b   : > { %303 = vst [vmem:[%s5126_s7 + $0x190] sm:$0xff] %v302_v50  ;;  %v308_v53 = vld [vmem:[%s5121_s6 + $0x688] sm:$0xff]  ;;  %305 = vst [vmem:[%s5126_s7 + $0x198] sm:$0xff] %v304_v51  ;;  %v310_v54 = vld [vmem:[%s5121_s6 + $0x690] sm:$0xff] }
  0x2c   : > { %307 = vst [vmem:[%s5126_s7 + $0x1a0] sm:$0xff] %v306_v52  ;;  %309 = vst [vmem:[%s5126_s7 + $0x1a8] sm:$0xff] %v308_v53  ;;  %v312_v55 = vld [vmem:[%s5121_s6 + $0x698] sm:$0xff]  ;;  %v314_v56 = vld [vmem:[%s5121_s6 + $0x700] sm:$0xff] }
  0x2d   : > { %311 = vst [vmem:[%s5126_s7 + $0x1b0] sm:$0xff] %v310_v54  ;;  %313 = vst [vmem:[%s5126_s7 + $0x1b8] sm:$0xff] %v312_v55  ;;  %v316_v57 = vld [vmem:[%s5121_s6 + $0x708] sm:$0xff]  ;;  %v318_v58 = vld [vmem:[%s5121_s6 + $0x710] sm:$0xff] }
  0x2e   : > { %315 = vst [vmem:[%s5126_s7 + $0x1c0] sm:$0xff] %v314_v56  ;;  %v320_v59 = vld [vmem:[%s5121_s6 + $0x718] sm:$0xff]  ;;  %317 = vst [vmem:[%s5126_s7 + $0x1c8] sm:$0xff] %v316_v57  ;;  %v322_v60 = vld [vmem:[%s5121_s6 + $0x780] sm:$0xff] }
  0x2f   : > { %319 = vst [vmem:[%s5126_s7 + $0x1d0] sm:$0xff] %v318_v58  ;;  %321 = vst [vmem:[%s5126_s7 + $0x1d8] sm:$0xff] %v320_v59  ;;  %v324_v61 = vld [vmem:[%s5121_s6 + $0x788] sm:$0xff]  ;;  %v326_v62 = vld [vmem:[%s5121_s6 + $0x790] sm:$0xff] }
  0x30   : > { %323 = vst [vmem:[%s5126_s7 + $0x1e0] sm:$0xff] %v322_v60  ;;  %325 = vst [vmem:[%s5126_s7 + $0x1e8] sm:$0xff] %v324_v61  ;;  %v328_v63 = vld [vmem:[%s5121_s6 + $0x798] sm:$0xff] }
  0x31   : > { %327 = vst [vmem:[%s5126_s7 + $0x1f0] sm:$0xff] %v326_v62  ;;  %329 = vst [vmem:[%s5126_s7 + $0x1f8] sm:$0xff] %v328_v63 }
  0x32 PF: > { %p4058_p5 = scmp.ge.s32.totalorder %s5052_s20, 1  ;;  %p342_p6 = scmp.lt.s32.totalorder %s5052_s20, 5 }
  0x34   : > { %p343_p7 = pnand %p4058_p5, %p342_p6 }
  0x35   : > { %s349_s8 = sand.u32 (!%p343_p7), 1, %s5044_s18   ;;  %s4060_s9 = sshll.u32 (!%p343_p7), %s4051_s21, 3 }
  0x36   : > { %346 = sbr.rel (%p343_p7) target bundleno = 834 (0x342), region = 59  ;;  %s4059_s10 = sshll.u32 (!%p343_p7), %s349_s8, 9 }
  0x37   : > { %p381_p8 = scmp.lt.s32.totalorder (!%p343_p7), %s4060_s9, 31  ;;  %s5268_s17 = scalar_lea.vmem (!%p343_p7), [#allocation3], %s4059_s10 }
  0x38   : > { %p4062_p9 = scmp.ne.s32.totalorder (!%p343_p7), %s4051_s21, 0 }
  0x3d   : > { %s6205_s9 = smov (!%p381_p8, %s4060_s9), 31  ;;  %394 = sbr.rel (%p4062_p9) target bundleno = 540 (0x21c), region = 67 }
  0x3e   : > { %s383_s13 = scalar_lea.vmem %s6199_s4, %s6205_s9  ;;  %s388_s16 = scalar_lea.vmem %s6200_s5, %s6205_s9  ;;  %v4770_v0 = vld [vmem:[%s6196_s1 + $0x40] sm:$0xff] (!%p4062_p9)   ;;  %v4774_v4 = vld [vmem:[%s6196_s1 + $0x48] sm:$0xff] (!%p4062_p9)   ;;  %v4778_v8 = vld [vmem:[%s6196_s1 + $0x50] sm:$0xff] (!%p4062_p9)   ;;  %v926_v28 = vlaneseq (!%p4062_p9)  ;;  %v5054_v36 = vmov (!%p4062_p9), 1966171168  }
  0x3f   : > { %v4771_v1 = vld [vmem:[%s6196_s1 + $0xc0] sm:$0xff] (!%p4062_p9)   ;;  %4391 = vmatprep.subr.bf16.mxu0 (!%p4062_p9), %v4770_v0  ;;  %v4775_v5 = vld [vmem:[%s6196_s1 + $0xc8] sm:$0xff] (!%p4062_p9)   ;;  %v4779_v9 = vld [vmem:[%s6196_s1 + $0xd0] sm:$0xff] (!%p4062_p9)   ;;  %v924_v37 = vunpack.c.l.s4 (!%p4062_p9), %v5054_v36 }
  0x40   : > { %v4772_v2 = vld [vmem:[%s6196_s1] sm:$0xff] (!%p4062_p9)   ;;  %4413 = vmatprep.subr.bf16.mxu1 (!%p4062_p9), %v4771_v1  ;;  %v4776_v6 = vld [vmem:[%s6196_s1 + $0x8] sm:$0xff] (!%p4062_p9)   ;;  %v4780_v10 = vld [vmem:[%s6196_s1 + $0x10] sm:$0xff] (!%p4062_p9)   ;;  %v927_v33 = vshrl.u32 (!%p4062_p9), %v926_v28, 7 }
  0x41   : > { %v4773_v3 = vld [vmem:[%s6196_s1 + $0x80] sm:$0xff] (!%p4062_p9)   ;;  %4392 = vmatpush3.bf16.msra.mxu0 (!%p4062_p9), %v4772_v2  ;;  %v4777_v7 = vld [vmem:[%s6196_s1 + $0x88] sm:$0xff] (!%p4062_p9)   ;;  %v4781_v11 = vld [vmem:[%s6196_s1 + $0x90] sm:$0xff] (!%p4062_p9)   ;;  %v925_v40 = vunpack.c.0.s8 (!%p4062_p9), %v924_v37 }
  0x42   : > { %4414 = vmatpush3.bf16.msra.mxu1 (!%p4062_p9), %v4773_v3  ;;  %4393 = vmatprep.subr.bf16.mxu0 (!%p4062_p9), %v4774_v4  ;;  %v4782_v12 = vld [vmem:[%s6196_s1 + $0x58] sm:$0xff] (!%p4062_p9)   ;;  %v4786_v16 = vld [vmem:[%s6196_s1 + $0x60] sm:$0xff] (!%p4062_p9)   ;;  %v4790_v20 = vld [vmem:[%s6196_s1 + $0x68] sm:$0xff] (!%p4062_p9)  }
  0x43   : > { %4415 = vmatprep.subr.bf16.mxu1 (!%p4062_p9), %v4775_v5  ;;  %v4783_v13 = vld [vmem:[%s6196_s1 + $0xd8] sm:$0xff] (!%p4062_p9)   ;;  %v4787_v17 = vld [vmem:[%s6196_s1 + $0xe0] sm:$0xff] (!%p4062_p9)   ;;  %v4791_v21 = vld [vmem:[%s6196_s1 + $0xe8] sm:$0xff] (!%p4062_p9)   ;;  %v5377_v41 = vsub.s32 (!%p4062_p9), %v925_v40, %v927_v33 }
  0x44   : > { %v4784_v14 = vld [vmem:[%s6196_s1 + $0x18] sm:$0xff]   ;;  %v4788_v18 = vld [vmem:[%s6196_s1 + $0x20] sm:$0xff]   ;;  %v4792_v22 = vld [vmem:[%s6196_s1 + $0x28] sm:$0xff]  }
  0x45   : > { %4394 = vmatpush3.bf16.msra.mxu0 %v4776_v6  ;;  %v4785_v15 = vld [vmem:[%s6196_s1 + $0x98] sm:$0xff]   ;;  %v4789_v19 = vld [vmem:[%s6196_s1 + $0xa0] sm:$0xff]   ;;  %v4793_v23 = vld [vmem:[%s6196_s1 + $0xa8] sm:$0xff]  }
  0x46   : > { %4416 = vmatpush3.bf16.msra.mxu1 %v4777_v7  ;;  %4395 = vmatprep.subr.bf16.mxu0 %v4778_v8  ;;  %v4794_v24 = vld [vmem:[%s6196_s1 + $0x70] sm:$0xff]   ;;  %v4798_v29 = vld [vmem:[%s6196_s1 + $0x78] sm:$0xff]   ;;  %v395_v34 = vld [vmem:[%s6195_s0] sm:$0xff] }
  0x47   : > { %4417 = vmatprep.subr.bf16.mxu1 %v4779_v9  ;;  %v4795_v25 = vld [vmem:[%s6196_s1 + $0xf0] sm:$0xff]   ;;  %v4799_v30 = vld [vmem:[%s6196_s1 + $0xf8] sm:$0xff]   ;;  %v4803_v35 = vld [vmem:[%s6196_s1 + $0x140] sm:$0xff]   ;;  %v922_v39 = vcombine.high %v395_v34, %v395_v34  ;;  %v929_v42 = vrot.slane %v395_v34, %v5377_v41 }
  0x48   : > { %v4796_v26 = vld [vmem:[%s6196_s1 + $0x30] sm:$0xff]   ;;  %v4800_v31 = vld [vmem:[%s6196_s1 + $0x38] sm:$0xff]   ;;  %v4804_v38 = vld [vmem:[%s6196_s1 + $0x1c0] sm:$0xff]  }
  0x49   : > { %4396 = vmatpush3.bf16.msra.mxu0 %v4780_v10  ;;  %v4797_v27 = vld [vmem:[%s6196_s1 + $0xb0] sm:$0xff]   ;;  %v4801_v32 = vld [vmem:[%s6196_s1 + $0xb8] sm:$0xff]   ;;  %v5381_v43 = vrot.slane %v922_v39, %v5377_v41  ;;  %v937_v44 = vcombine.high %v929_v42, %v929_v42  ;;  %v945_v45 = vrot.slane %v929_v42, %v5377_v41  ;;  %v4805_v47 = vld [vmem:[%s6196_s1 + $0x100] sm:$0xff]  }
  0x4a   : > { %4418 = vmatpush3.bf16.msra.mxu1 %v4781_v11  ;;  %4397 = vmatprep.subr.bf16.mxu0 %v4782_v12  ;;  %v4806_v49 = vld [vmem:[%s6196_s1 + $0x180] sm:$0xff]   ;;  %v4807_v52 = vld [vmem:[%s6196_s1 + $0x148] sm:$0xff]   ;;  %v4811_v58 = vld [vmem:[%s6196_s1 + $0x150] sm:$0xff]  }
  0x4b   : > { %4419 = vmatprep.subr.bf16.mxu1 %v4783_v13  ;;  %v938_v46 = vcombine.high %v5381_v43, %v5381_v43  ;;  %v959_v48 = vrot.slane %v937_v44, %v5377_v41  ;;  %v967_v51 = vcombine.high %v945_v45, %v945_v45  ;;  %v4808_v54 = vld [vmem:[%s6196_s1 + $0x1c8] sm:$0xff]   ;;  %v4812_v59 = vld [vmem:[%s6196_s1 + $0x1d0] sm:$0xff]   ;;  %v4815_v62 = vld [vmem:[%s6196_s1 + $0x158] sm:$0xff]  }
  0x4c   : > { %v4809_v55 = vld [vmem:[%s6196_s1 + $0x108] sm:$0xff]   ;;  %v4813_v60 = vld [vmem:[%s6196_s1 + $0x110] sm:$0xff]   ;;  %v4816_v63 = vld [vmem:[%s6196_s1 + $0x1d8] sm:$0xff]  }
  0x4d   : > { %4398 = vmatpush3.bf16.msra.mxu0 %v4784_v14  ;;  %v966_v50 = vrot.slane %v938_v46, %v5377_v41  ;;  %2718 = vmatprep.mubr.bf16.mxu0 %v959_v48  ;;  %v969_v53 = vcombine.high %v959_v48, %v959_v48  ;;  %v4810_v57 = vld [vmem:[%s6196_s1 + $0x188] sm:$0xff]   ;;  %v4814_v61 = vld [vmem:[%s6196_s1 + $0x190] sm:$0xff]   ;;  %v4817_v0 = vld [vmem:[%s6196_s1 + $0x118] sm:$0xff]  }
  0x4e   : > { %4420 = vmatpush3.bf16.msra.mxu1 %v4785_v15  ;;  %4399 = vmatprep.subr.bf16.mxu0 %v4786_v16  ;;  %v4818_v1 = vld [vmem:[%s6196_s1 + $0x198] sm:$0xff]   ;;  %v4819_v2 = vld [vmem:[%s6196_s1 + $0x160] sm:$0xff]   ;;  %v4823_v6 = vld [vmem:[%s6196_s1 + $0x168] sm:$0xff]  }
  0x4f   : > { %4421 = vmatprep.subr.bf16.mxu1 %v4787_v17  ;;  %v970_v56 = vcombine.high %v966_v50, %v966_v50  ;;  %2758 = vmatprep.mubr.bf16.mxu1 %v969_v53  ;;  %v4820_v3 = vld [vmem:[%s6196_s1 + $0x1e0] sm:$0xff]   ;;  %v4824_v7 = vld [vmem:[%s6196_s1 + $0x1e8] sm:$0xff]   ;;  %v4827_v10 = vld [vmem:[%s6196_s1 + $0x170] sm:$0xff]  }
  0x50   : > { %v4821_v4 = vld [vmem:[%s6196_s1 + $0x120] sm:$0xff]   ;;  %v4825_v8 = vld [vmem:[%s6196_s1 + $0x128] sm:$0xff]   ;;  %v4828_v11 = vld [vmem:[%s6196_s1 + $0x1f0] sm:$0xff]  }
  0x51   : > { %4400 = vmatpush3.bf16.msra.mxu0 %v4788_v18  ;;  %v4822_v5 = vld [vmem:[%s6196_s1 + $0x1a0] sm:$0xff]   ;;  %v4826_v9 = vld [vmem:[%s6196_s1 + $0x1a8] sm:$0xff]   ;;  %v4829_v12 = vld [vmem:[%s6196_s1 + $0x130] sm:$0xff]   ;;  %v952_v18 = vrot.slane %v5381_v43, %v5377_v41 }
  0x52   : > { %4422 = vmatpush3.bf16.msra.mxu1 %v4789_v19  ;;  %4401 = vmatprep.subr.bf16.mxu0 %v4790_v20  ;;  %v4830_v13 = vld [vmem:[%s6196_s1 + $0x1b0] sm:$0xff]   ;;  %v4831_v14 = vld [vmem:[%s6196_s1 + $0x178] sm:$0xff]   ;;  %v4835_v19 = vld [vmem:[%s6196_s1 + $0x240] sm:$0xff]  }
  0x53   : > { %4423 = vmatprep.subr.bf16.mxu1 %v4791_v21  ;;  %v4832_v15 = vld [vmem:[%s6196_s1 + $0x1f8] sm:$0xff]   ;;  %v4836_v20 = vld [vmem:[%s6196_s1 + $0x2c0] sm:$0xff]   ;;  %v4843_v28 = vld [vmem:[%s6196_s1 + $0x250] sm:$0xff]  }
  0x54   : > { %v4833_v16 = vld [vmem:[%s6196_s1 + $0x138] sm:$0xff]   ;;  %v4837_v21 = vld [vmem:[%s6196_s1 + $0x200] sm:$0xff]   ;;  %v4855_v40 = vld [vmem:[%s6196_s1 + $0x268] sm:$0xff]  }
  0x55   : > { %4402 = vmatpush3.bf16.msra.mxu0 %v4792_v22  ;;  %v4834_v17 = vld [vmem:[%s6196_s1 + $0x1b8] sm:$0xff]   ;;  %v4838_v22 = vld [vmem:[%s6196_s1 + $0x280] sm:$0xff]   ;;  %v4856_v42 = vld [vmem:[%s6196_s1 + $0x2e8] sm:$0xff]  }
  0x56   : > { %4424 = vmatpush3.bf16.msra.mxu1 %v4793_v23  ;;  %4403 = vmatprep.subr.bf16.mxu0 %v4794_v24  ;;  %v968_v23 = vcombine.high %v952_v18, %v952_v18  ;;  %v4839_v24 = vld [vmem:[%s6196_s1 + $0x248] sm:$0xff]   ;;  %v4848_v33 = vld [vmem:[%s6196_s1 + $0x2d8] sm:$0xff]   ;;  %v4851_v36 = vld [vmem:[%s6196_s1 + $0x260] sm:$0xff]  }
  0x57   : > { %4425 = vmatprep.subr.bf16.mxu1 %v4795_v25  ;;  %v4840_v25 = vld [vmem:[%s6196_s1 + $0x2c8] sm:$0xff]   ;;  %v4849_v34 = vld [vmem:[%s6196_s1 + $0x218] sm:$0xff]   ;;  %v4852_v37 = vld [vmem:[%s6196_s1 + $0x2e0] sm:$0xff]  }
  0x58   : > { %v4854_v39 = vld [vmem:[%s6196_s1 + $0x2a0] sm:$0xff]   ;;  %v4857_v43 = vld [vmem:[%s6196_s1 + $0x228] sm:$0xff]  }
  0x59   : > { %4404 = vmatpush3.bf16.msra.mxu0 %v4796_v26  ;;  %v4841_v26 = vld [vmem:[%s6196_s1 + $0x208] sm:$0xff]  }
  0x5a   : > { %4426 = vmatpush3.bf16.msra.mxu1 %v4797_v27  ;;  %4405 = vmatprep.subr.bf16.mxu0 %v4798_v29  ;;  %v4842_v27 = vld [vmem:[%s6196_s1 + $0x288] sm:$0xff]   ;;  %v4844_v29 = vld [vmem:[%s6196_s1 + $0x2d0] sm:$0xff]  }
  0x5b   : > { %4427 = vmatprep.subr.bf16.mxu1 %v4799_v30  ;;  %v4845_v30 = vld [vmem:[%s6196_s1 + $0x210] sm:$0xff]   ;;  %v4858_v44 = vld [vmem:[%s6196_s1 + $0x2a8] sm:$0xff]  }
  0x5c   : > { %v396_v46 = vld [vmem:[%s6195_s0 + $0x8] sm:$0xff] }
  0x5d   : > { %4406 = vmatpush3.bf16.msra.mxu0 %v4800_v31  ;;  %v4846_v31 = vld [vmem:[%s6196_s1 + $0x290] sm:$0xff]   ;;  %v978_v48 = vrot.slane %v396_v46, %v5377_v41 }
  0x5e   : > { %4428 = vmatpush3.bf16.msra.mxu1 %v4801_v32  ;;  %4435 = vmatprep.subr.bf16.mxu0 %v4803_v35  ;;  %v4847_v32 = vld [vmem:[%s6196_s1 + $0x258] sm:$0xff]  }
  0x5f   : > { %4457 = vmatprep.subr.bf16.mxu1 %v4804_v38  ;;  %v4850_v35 = vld [vmem:[%s6196_s1 + $0x298] sm:$0xff]   ;;  %v4853_v38 = vld [vmem:[%s6196_s1 + $0x220] sm:$0xff]  }
  0x60   : > { %2719 = vmatmul.mubr.bf16.vlgmr.msra.gmra.mrb[0].mxu0 %v945_v45  ;;  %v4859_v45 = vld [vmem:[%s6196_s1 + $0x270] sm:$0xff]  }
  0x61   : > { %4436 = vmatpush3.bf16.msra.mxu0 %v4805_v47  ;;  %2759 = vmatmul.mubr.bf16.vlgmr.msra.gmra.mrb[0].mxu1 %v967_v51  ;;  %v4860_v47 = vld [vmem:[%s6196_s1 + $0x2f0] sm:$0xff]  }
  0x62   : > { %4437 = vmatprep.subr.bf16.mxu0 %v4807_v52  ;;  %4458 = vmatpush3.bf16.msra.mxu1 %v4806_v49  ;;  %v971_v49 = vcombine.high %v396_v46, %v396_v46  ;;  %v4862_v51 = vld [vmem:[%s6196_s1 + $0x2b0] sm:$0xff]   ;;  %v986_v52 = vcombine.high %v978_v48, %v978_v48 }
  0x63   : > { %2798 = vmatprep.mubr.bf16.mxu0 %v966_v50  ;;  %4459 = vmatprep.subr.bf16.mxu1 %v4808_v54  ;;  %v4861_v50 = vld [vmem:[%s6196_s1 + $0x230] sm:$0xff]   ;;  %v4863_v54 = vld [vmem:[%s6196_s1 + $0x278] sm:$0xff]  }
  0x64   : > { %2838 = vmatprep.mubr.bf16.mxu1 %v970_v56  ;;  %v5569_v53 = vrot.slane %v971_v49, %v5377_v41  ;;  %v1008_v56 = vrot.slane %v986_v52, %v5377_v41  ;;  %v4910_v46 = vld [vmem:[%s6196_s1 + $0x410] sm:$0xff]   ;;  %v4913_v49 = vld [vmem:[%s6196_s1 + $0x4d8] sm:$0xff]   ;;  %v4916_v52 = vld [vmem:[%s6196_s1 + $0x460] sm:$0xff]  }
  0x65   : > { %4438 = vmatpush3.bf16.msra.mxu0 %v4809_v55  ;;  %v4864_v55 = vld [vmem:[%s6196_s1 + $0x2f8] sm:$0xff]  }
  0x66   : > { %4439 = vmatprep.subr.bf16.mxu0 %v4811_v58  ;;  %4460 = vmatpush3.bf16.msra.mxu1 %v4810_v57  ;;  %v987_v57 = vcombine.high %v5569_v53, %v5569_v53  ;;  %v4865_v58 = vld [vmem:[%s6196_s1 + $0x238] sm:$0xff]  }
  0x67   : > { %4461 = vmatprep.subr.bf16.mxu1 %v4812_v59  ;;  %v4866_v59 = vld [vmem:[%s6196_s1 + $0x2b8] sm:$0xff]  }
  0x69   : > { %4440 = vmatpush3.bf16.msra.mxu0 %v4813_v60  ;;  %v1018_v60 = vcombine.high %v1008_v56, %v1008_v56 }
  0x6a   : > { %4441 = vmatprep.subr.bf16.mxu0 %v4815_v62  ;;  %4462 = vmatpush3.bf16.msra.mxu1 %v4814_v61  ;;  %v994_v61 = vrot.slane %v978_v48, %v5377_v41  ;;  %v4867_v62 = vld [vmem:[%s6196_s1 + $0x340] sm:$0xff]   ;;  %v4912_v48 = vld [vmem:[%s6196_s1 + $0x458] sm:$0xff]  }
  0x6b   : > { %4463 = vmatprep.subr.bf16.mxu1 %v4816_v63  ;;  %v4868_v63 = vld [vmem:[%s6196_s1 + $0x3c0] sm:$0xff]  }
  0x6d   : > { %4442 = vmatpush3.bf16.msra.mxu0 %v4817_v0  ;;  %v1015_v0 = vrot.slane %v987_v57, %v5377_v41  ;;  %v4921_v57 = vld [vmem:[%s6196_s1 + $0x4e8] sm:$0xff]  }
  0x6e   : > { %4443 = vmatprep.subr.bf16.mxu0 %v4819_v2  ;;  %4464 = vmatpush3.bf16.msra.mxu1 %v4818_v1  ;;  %v4869_v1 = vld [vmem:[%s6196_s1 + $0x300] sm:$0xff]  }
  0x6f   : > { %4465 = vmatprep.subr.bf16.mxu1 %v4820_v3  ;;  %v4870_v2 = vld [vmem:[%s6196_s1 + $0x380] sm:$0xff]   ;;  %v1016_v3 = vcombine.high %v994_v61, %v994_v61 }
  0x71   : > { %4444 = vmatpush3.bf16.msra.mxu0 %v4821_v4  ;;  %v4871_v4 = vld [vmem:[%s6196_s1 + $0x348] sm:$0xff]  }
  0x72   : > { %4445 = vmatprep.subr.bf16.mxu0 %v4823_v6  ;;  %4466 = vmatpush3.bf16.msra.mxu1 %v4822_v5  ;;  %v4872_v5 = vld [vmem:[%s6196_s1 + $0x3c8] sm:$0xff]   ;;  %v1019_v6 = vcombine.high %v1015_v0, %v1015_v0 }
  0x73   : > { %4467 = vmatprep.subr.bf16.mxu1 %v4824_v7  ;;  %v4873_v7 = vld [vmem:[%s6196_s1 + $0x308] sm:$0xff]  }
  0x75   : > { %4446 = vmatpush3.bf16.msra.mxu0 %v4825_v8  ;;  %v4874_v8 = vld [vmem:[%s6196_s1 + $0x388] sm:$0xff]  }
  0x76   : > { %4447 = vmatprep.subr.bf16.mxu0 %v4827_v10  ;;  %4468 = vmatpush3.bf16.msra.mxu1 %v4826_v9  ;;  %v4875_v9 = vld [vmem:[%s6196_s1 + $0x350] sm:$0xff]  }
  0x77   : > { %4469 = vmatprep.subr.bf16.mxu1 %v4828_v11  ;;  %v4876_v10 = vld [vmem:[%s6196_s1 + $0x3d0] sm:$0xff]  }
  0x78   : > { %v4877_v11 = vld [vmem:[%s6196_s1 + $0x310] sm:$0xff]  }
  0x79   : > { %4448 = vmatpush3.bf16.msra.mxu0 %v4829_v12  ;;  %v4878_v12 = vld [vmem:[%s6196_s1 + $0x390] sm:$0xff]  }
  0x7a   : > { %4449 = vmatprep.subr.bf16.mxu0 %v4831_v14  ;;  %4470 = vmatpush3.bf16.msra.mxu1 %v4830_v13  ;;  %v4879_v13 = vld [vmem:[%s6196_s1 + $0x358] sm:$0xff]  }
  0x7b   : > { %4471 = vmatprep.subr.bf16.mxu1 %v4832_v15  ;;  %v4880_v14 = vld [vmem:[%s6196_s1 + $0x3d8] sm:$0xff]  }
  0x7c   : > { %v4881_v15 = vld [vmem:[%s6196_s1 + $0x318] sm:$0xff]  }
  0x7d   : > { %4450 = vmatpush3.bf16.msra.mxu0 %v4833_v16  ;;  %v4882_v16 = vld [vmem:[%s6196_s1 + $0x398] sm:$0xff]  }
  0x7e   : > { %4479 = vmatprep.subr.bf16.mxu0 %v4835_v19  ;;  %4472 = vmatpush3.bf16.msra.mxu1 %v4834_v17  ;;  %v4883_v17 = vld [vmem:[%s6196_s1 + $0x360] sm:$0xff]  }
  0x7f   : > { %4501 = vmatprep.subr.bf16.mxu1 %v4836_v20  ;;  %v4885_v19 = vld [vmem:[%s6196_s1 + $0x320] sm:$0xff]  }
  0x80   : > { %2799 = vmatmul.mubr.bf16.vlgmr.msra.gmra.mrb[4].mxu0 %v952_v18  ;;  %v4884_v18 = vld [vmem:[%s6196_s1 + $0x3e0] sm:$0xff]  }
  0x81   : > { %4480 = vmatpush3.bf16.msra.mxu0 %v4837_v21  ;;  %2839 = vmatmul.mubr.bf16.vlgmr.msra.gmra.mrb[4].mxu1 %v968_v23  ;;  %v4886_v20 = vld [vmem:[%s6196_s1 + $0x3a0] sm:$0xff]   ;;  %v4887_v21 = vld [vmem:[%s6196_s1 + $0x368] sm:$0xff]  }
  0x82   : > { %4481 = vmatprep.subr.bf16.mxu0 %v4839_v24  ;;  %4502 = vmatpush3.bf16.msra.mxu1 %v4838_v22  ;;  %v4888_v22 = vld [vmem:[%s6196_s1 + $0x3e8] sm:$0xff]  }
  0x83   : > { %4503 = vmatprep.subr.bf16.mxu1 %v4840_v25  ;;  %2878 = vmatprep.mubr.bf16.mxu0 %v1008_v56  ;;  %v4889_v23 = vld [vmem:[%s6196_s1 + $0x328] sm:$0xff]   ;;  %v4891_v25 = vld [vmem:[%s6196_s1 + $0x370] sm:$0xff]  }
  0x84   : > { %2918 = vmatprep.mubr.bf16.mxu1 %v1018_v60  ;;  %v4890_v24 = vld [vmem:[%s6196_s1 + $0x3a8] sm:$0xff]   ;;  %v4924_v60 = vld [vmem:[%s6196_s1 + $0x470] sm:$0xff]  }
  0x85   : > { %4482 = vmatpush3.bf16.msra.mxu0 %v4841_v26  ;;  %v4892_v26 = vld [vmem:[%s6196_s1 + $0x3f0] sm:$0xff]   ;;  %v4920_v56 = vld [vmem:[%s6196_s1 + $0x468] sm:$0xff]  }
  0x86   : > { %4483 = vmatprep.subr.bf16.mxu0 %v4843_v28  ;;  %4504 = vmatpush3.bf16.msra.mxu1 %v4842_v27  ;;  %v4893_v27 = vld [vmem:[%s6196_s1 + $0x330] sm:$0xff]  }
  0x87   : > { %4505 = vmatprep.subr.bf16.mxu1 %v4844_v29  ;;  %v4894_v28 = vld [vmem:[%s6196_s1 + $0x3b0] sm:$0xff]   ;;  %v4895_v29 = vld [vmem:[%s6196_s1 + $0x378] sm:$0xff]  }
  0x89   : > { %4484 = vmatpush3.bf16.msra.mxu0 %v4845_v30  ;;  %v4896_v30 = vld [vmem:[%s6196_s1 + $0x3f8] sm:$0xff]  }
  0x8a   : > { %4485 = vmatprep.subr.bf16.mxu0 %v4847_v32  ;;  %4506 = vmatpush3.bf16.msra.mxu1 %v4846_v31  ;;  %v4897_v31 = vld [vmem:[%s6196_s1 + $0x338] sm:$0xff]  }
  0x8b   : > { %4507 = vmatprep.subr.bf16.mxu1 %v4848_v33  ;;  %v4898_v32 = vld [vmem:[%s6196_s1 + $0x3b8] sm:$0xff]   ;;  %v1001_v33 = vrot.slane %v5569_v53, %v5377_v41  ;;  %v4917_v53 = vld [vmem:[%s6196_s1 + $0x4e0] sm:$0xff]  }
  0x8d   : > { %4486 = vmatpush3.bf16.msra.mxu0 %v4849_v34  ;;  %v4900_v34 = vld [vmem:[%s6196_s1 + $0x440] sm:$0xff]  }
  0x8e   : > { %4487 = vmatprep.subr.bf16.mxu0 %v4851_v36  ;;  %4508 = vmatpush3.bf16.msra.mxu1 %v4850_v35  ;;  %v4901_v35 = vld [vmem:[%s6196_s1 + $0x4c0] sm:$0xff]  }
  0x8f   : > { %4509 = vmatprep.subr.bf16.mxu1 %v4852_v37  ;;  %v4902_v36 = vld [vmem:[%s6196_s1 + $0x400] sm:$0xff]  }
  0x90   : > { %v4903_v37 = vld [vmem:[%s6196_s1 + $0x480] sm:$0xff]  }
  0x91   : > { %4488 = vmatpush3.bf16.msra.mxu0 %v4853_v38  ;;  %v1017_v38 = vcombine.high %v1001_v33, %v1001_v33 }
  0x92   : > { %4489 = vmatprep.subr.bf16.mxu0 %v4855_v40  ;;  %4510 = vmatpush3.bf16.msra.mxu1 %v4854_v39  ;;  %v4904_v39 = vld [vmem:[%s6196_s1 + $0x448] sm:$0xff]  }
  0x93   : > { %4511 = vmatprep.subr.bf16.mxu1 %v4856_v42  ;;  %v4905_v40 = vld [vmem:[%s6196_s1 + $0x4c8] sm:$0xff]  }
  0x94   : > { %v4906_v42 = vld [vmem:[%s6196_s1 + $0x408] sm:$0xff]  }
  0x95   : > { %4490 = vmatpush3.bf16.msra.mxu0 %v4857_v43  ;;  %v4907_v43 = vld [vmem:[%s6196_s1 + $0x488] sm:$0xff]  }
  0x96   : > { %4491 = vmatprep.subr.bf16.mxu0 %v4859_v45  ;;  %4512 = vmatpush3.bf16.msra.mxu1 %v4858_v44  ;;  %v4908_v44 = vld [vmem:[%s6196_s1 + $0x450] sm:$0xff]  }
  0x97   : > { %4513 = vmatprep.subr.bf16.mxu1 %v4860_v47  ;;  %v4909_v45 = vld [vmem:[%s6196_s1 + $0x4d0] sm:$0xff]  }
  0x98   : > { %v4911_v47 = vld [vmem:[%s6196_s1 + $0x490] sm:$0xff]  }
  0x99   : > { %4492 = vmatpush3.bf16.msra.mxu0 %v4861_v50  ;;  %v4914_v50 = vld [vmem:[%s6196_s1 + $0x418] sm:$0xff]  }
  0x9a   : > { %4493 = vmatprep.subr.bf16.mxu0 %v4863_v54  ;;  %4514 = vmatpush3.bf16.msra.mxu1 %v4862_v51  ;;  %v4915_v51 = vld [vmem:[%s6196_s1 + $0x498] sm:$0xff]   ;;  %v4918_v54 = vld [vmem:[%s6196_s1 + $0x420] sm:$0xff]  }
  0x9b   : > { %4515 = vmatprep.subr.bf16.mxu1 %v4864_v55  ;;  %v4919_v55 = vld [vmem:[%s6196_s1 + $0x4a0] sm:$0xff]  }
  0x9d   : > { %4494 = vmatpush3.bf16.msra.mxu0 %v4865_v58  ;;  %v4922_v58 = vld [vmem:[%s6196_s1 + $0x428] sm:$0xff]  }
  0x9e   : > { %4523 = vmatprep.subr.bf16.mxu0 %v4867_v62  ;;  %4516 = vmatpush3.bf16.msra.mxu1 %v4866_v59  ;;  %v4923_v59 = vld [vmem:[%s6196_s1 + $0x4a8] sm:$0xff]   ;;  %v4925_v62 = vld [vmem:[%s6196_s1 + $0x4f0] sm:$0xff]  }
  0x9f   : > { %4545 = vmatprep.subr.bf16.mxu1 %v4868_v63 }
  0xa0   : > { %2879 = vmatmul.mubr.bf16.vlgmr.msra.gmra.mrb[8].mxu0 %v994_v61  ;;  %v397_v61 = vld [vmem:[%s6195_s0 + $0x10] sm:$0xff] }
  0xa1   : > { %4524 = vmatpush3.bf16.msra.mxu0 %v4869_v1  ;;  %2958 = vmatprep.mubr.bf16.mxu0 %v1015_v0  ;;  %v1027_v63 = vrot.slane %v397_v61, %v5377_v41  ;;  %v1020_v0 = vcombine.high %v397_v61, %v397_v61  ;;  %v4926_v1 = vld [vmem:[%s6196_s1 + $0x430] sm:$0xff]  }
  0xa2   : > { %2919 = vmatmul.mubr.bf16.vlgmr.msra.gmra.mrb[8].mxu1 %v1016_v3  ;;  %4525 = vmatprep.subr.bf16.mxu0 %v4871_v4  ;;  %v4975_v61 = vld [vmem:[%s6196_s1 + $0x610] sm:$0xff]  }
  0xa3   : > { %4546 = vmatpush3.bf16.msra.mxu1 %v4870_v2  ;;  %2998 = vmatprep.mubr.bf16.mxu1 %v1019_v6  ;;  %v4927_v2 = vld [vmem:[%s6196_s1 + $0x4b0] sm:$0xff]   ;;  %v1035_v3 = vcombine.high %v1027_v63, %v1027_v63  ;;  %v5775_v4 = vrot.slane %v1020_v0, %v5377_v41  ;;  %v4929_v6 = vld [vmem:[%s6196_s1 + $0x4f8] sm:$0xff]  }
  0xa4   : > { %4547 = vmatprep.subr.bf16.mxu1 %v4872_v5  ;;  %v4928_v5 = vld [vmem:[%s6196_s1 + $0x478] sm:$0xff]  }
  0xa5   : > { %4526 = vmatpush3.bf16.msra.mxu0 %v4873_v7  ;;  %v1057_v7 = vrot.slane %v1035_v3, %v5377_v41  ;;  %v4978_v0 = vld [vmem:[%s6196_s1 + $0x6d8] sm:$0xff]   ;;  %v4981_v3 = vld [vmem:[%s6196_s1 + $0x660] sm:$0xff]  }
  0xa6   : > { %4527 = vmatprep.subr.bf16.mxu0 %v4875_v9  ;;  %v4930_v9 = vld [vmem:[%s6196_s1 + $0x438] sm:$0xff]  }
  0xa7   : > { %4548 = vmatpush3.bf16.msra.mxu1 %v4874_v8  ;;  %v1036_v8 = vcombine.high %v5775_v4, %v5775_v4 }
  0xa8   : > { %4549 = vmatprep.subr.bf16.mxu1 %v4876_v10  ;;  %v4931_v10 = vld [vmem:[%s6196_s1 + $0x4b8] sm:$0xff]  }
  0xa9   : > { %4528 = vmatpush3.bf16.msra.mxu0 %v4877_v11  ;;  %v1067_v11 = vcombine.high %v1057_v7, %v1057_v7 }
  0xaa   : > { %4529 = vmatprep.subr.bf16.mxu0 %v4879_v13  ;;  %v4932_v13 = vld [vmem:[%s6196_s1 + $0x540] sm:$0xff]  }
  0xab   : > { %4550 = vmatpush3.bf16.msra.mxu1 %v4878_v12  ;;  %v1043_v12 = vrot.slane %v1027_v63, %v5377_v41  ;;  %v4977_v63 = vld [vmem:[%s6196_s1 + $0x658] sm:$0xff]  }
  0xac   : > { %4551 = vmatprep.subr.bf16.mxu1 %v4880_v14  ;;  %v4933_v14 = vld [vmem:[%s6196_s1 + $0x5c0] sm:$0xff]  }
  0xad   : > { %4530 = vmatpush3.bf16.msra.mxu0 %v4881_v15  ;;  %v1064_v15 = vrot.slane %v1036_v8, %v5377_v41  ;;  %v4986_v8 = vld [vmem:[%s6196_s1 + $0x6e8] sm:$0xff]  }
  0xae   : > { %4531 = vmatprep.subr.bf16.mxu0 %v4883_v17  ;;  %v4935_v17 = vld [vmem:[%s6196_s1 + $0x580] sm:$0xff]  }
  0xaf   : > { %4552 = vmatpush3.bf16.msra.mxu1 %v4882_v16  ;;  %v4934_v16 = vld [vmem:[%s6196_s1 + $0x500] sm:$0xff]  }
  0xb0   : > { %4553 = vmatprep.subr.bf16.mxu1 %v4884_v18  ;;  %v1065_v18 = vcombine.high %v1043_v12, %v1043_v12 }
  0xb1   : > { %4532 = vmatpush3.bf16.msra.mxu0 %v4885_v19  ;;  %v4936_v19 = vld [vmem:[%s6196_s1 + $0x548] sm:$0xff]  }
  0xb2   : > { %4533 = vmatprep.subr.bf16.mxu0 %v4887_v21  ;;  %v1068_v21 = vcombine.high %v1064_v15, %v1064_v15 }
  0xb3   : > { %4554 = vmatpush3.bf16.msra.mxu1 %v4886_v20  ;;  %v4937_v20 = vld [vmem:[%s6196_s1 + $0x5c8] sm:$0xff]  }
  0xb4   : > { %4555 = vmatprep.subr.bf16.mxu1 %v4888_v22  ;;  %v4938_v22 = vld [vmem:[%s6196_s1 + $0x508] sm:$0xff]  }
  0xb5   : > { %4534 = vmatpush3.bf16.msra.mxu0 %v4889_v23  ;;  %v4939_v23 = vld [vmem:[%s6196_s1 + $0x588] sm:$0xff]  }
  0xb6   : > { %4535 = vmatprep.subr.bf16.mxu0 %v4891_v25  ;;  %v4941_v25 = vld [vmem:[%s6196_s1 + $0x5d0] sm:$0xff]  }
  0xb7   : > { %4556 = vmatpush3.bf16.msra.mxu1 %v4890_v24  ;;  %v4940_v24 = vld [vmem:[%s6196_s1 + $0x550] sm:$0xff]  }
  0xb8   : > { %4557 = vmatprep.subr.bf16.mxu1 %v4892_v26  ;;  %v4942_v26 = vld [vmem:[%s6196_s1 + $0x510] sm:$0xff]  }
  0xb9   : > { %4536 = vmatpush3.bf16.msra.mxu0 %v4893_v27  ;;  %v4943_v27 = vld [vmem:[%s6196_s1 + $0x590] sm:$0xff]  }
  0xba   : > { %4537 = vmatprep.subr.bf16.mxu0 %v4895_v29  ;;  %v4945_v29 = vld [vmem:[%s6196_s1 + $0x5d8] sm:$0xff]  }
  0xbb   : > { %4558 = vmatpush3.bf16.msra.mxu1 %v4894_v28  ;;  %v4944_v28 = vld [vmem:[%s6196_s1 + $0x558] sm:$0xff]  }
  0xbc   : > { %4559 = vmatprep.subr.bf16.mxu1 %v4896_v30  ;;  %v4946_v30 = vld [vmem:[%s6196_s1 + $0x518] sm:$0xff]  }
  0xbd   : > { %4538 = vmatpush3.bf16.msra.mxu0 %v4897_v31  ;;  %v4947_v31 = vld [vmem:[%s6196_s1 + $0x598] sm:$0xff]  }
  0xbe   : > { %4567 = vmatprep.subr.bf16.mxu0 %v4900_v34  ;;  %v4950_v34 = vld [vmem:[%s6196_s1 + $0x520] sm:$0xff]  }
  0xbf   : > { %4560 = vmatpush3.bf16.msra.mxu1 %v4898_v32  ;;  %v4948_v32 = vld [vmem:[%s6196_s1 + $0x560] sm:$0xff]  }
  0xc0   : > { %2959 = vmatmul.mubr.bf16.vlgmr.msra.gmra.mrb[12].mxu0 %v1001_v33  ;;  %4589 = vmatprep.subr.bf16.mxu1 %v4901_v35  ;;  %v4949_v33 = vld [vmem:[%s6196_s1 + $0x5e0] sm:$0xff]  }
  0xc1   : > { %4568 = vmatpush3.bf16.msra.mxu0 %v4902_v36  ;;  %3038 = vmatprep.mubr.bf16.mxu0 %v1057_v7  ;;  %v4951_v35 = vld [vmem:[%s6196_s1 + $0x5a0] sm:$0xff]   ;;  %v4952_v36 = vld [vmem:[%s6196_s1 + $0x568] sm:$0xff]  }
  0xc2   : > { %2999 = vmatmul.mubr.bf16.vlgmr.msra.gmra.mrb[12].mxu1 %v1017_v38  ;;  %4569 = vmatprep.subr.bf16.mxu0 %v4904_v39  ;;  %v4954_v38 = vld [vmem:[%s6196_s1 + $0x528] sm:$0xff]  }
  0xc3   : > { %4590 = vmatpush3.bf16.msra.mxu1 %v4903_v37  ;;  %3078 = vmatprep.mubr.bf16.mxu1 %v1067_v11  ;;  %v4953_v37 = vld [vmem:[%s6196_s1 + $0x5e8] sm:$0xff]   ;;  %v4989_v11 = vld [vmem:[%s6196_s1 + $0x670] sm:$0xff]  }
  0xc4   : > { %4591 = vmatprep.subr.bf16.mxu1 %v4905_v40  ;;  %v4955_v39 = vld [vmem:[%s6196_s1 + $0x5a8] sm:$0xff]   ;;  %v4956_v40 = vld [vmem:[%s6196_s1 + $0x570] sm:$0xff]  }
  0xc5   : > { %4570 = vmatpush3.bf16.msra.mxu0 %v4906_v42  ;;  %v4957_v42 = vld [vmem:[%s6196_s1 + $0x5f0] sm:$0xff]   ;;  %v4985_v7 = vld [vmem:[%s6196_s1 + $0x668] sm:$0xff]  }
  0xc6   : > { %4571 = vmatprep.subr.bf16.mxu0 %v4908_v44  ;;  %v4959_v44 = vld [vmem:[%s6196_s1 + $0x5b0] sm:$0xff]  }
  0xc7   : > { %4592 = vmatpush3.bf16.msra.mxu1 %v4907_v43  ;;  %v4958_v43 = vld [vmem:[%s6196_s1 + $0x530] sm:$0xff]  }
  0xc8   : > { %4593 = vmatprep.subr.bf16.mxu1 %v4909_v45  ;;  %v4960_v45 = vld [vmem:[%s6196_s1 + $0x578] sm:$0xff]  }
  0xc9   : > { %4572 = vmatpush3.bf16.msra.mxu0 %v4910_v46  ;;  %v4961_v46 = vld [vmem:[%s6196_s1 + $0x5f8] sm:$0xff]  }
  0xca   : > { %4573 = vmatprep.subr.bf16.mxu0 %v4912_v48  ;;  %v4963_v48 = vld [vmem:[%s6196_s1 + $0x5b8] sm:$0xff]  }
  0xcb   : > { %4594 = vmatpush3.bf16.msra.mxu1 %v4911_v47  ;;  %v4962_v47 = vld [vmem:[%s6196_s1 + $0x538] sm:$0xff]  }
  0xcc   : > { %4595 = vmatprep.subr.bf16.mxu1 %v4913_v49  ;;  %v1050_v49 = vrot.slane %v5775_v4, %v5377_v41  ;;  %v4982_v4 = vld [vmem:[%s6196_s1 + $0x6e0] sm:$0xff]  }
  0xcd   : > { %4574 = vmatpush3.bf16.msra.mxu0 %v4914_v50  ;;  %v4965_v50 = vld [vmem:[%s6196_s1 + $0x640] sm:$0xff]  }
  0xce   : > { %4575 = vmatprep.subr.bf16.mxu0 %v4916_v52  ;;  %v4967_v52 = vld [vmem:[%s6196_s1 + $0x600] sm:$0xff]  }
  0xcf   : > { %4596 = vmatpush3.bf16.msra.mxu1 %v4915_v51  ;;  %v4966_v51 = vld [vmem:[%s6196_s1 + $0x6c0] sm:$0xff]  }
  0xd0   : > { %4597 = vmatprep.subr.bf16.mxu1 %v4917_v53  ;;  %v4968_v53 = vld [vmem:[%s6196_s1 + $0x680] sm:$0xff]  }
  0xd1   : > { %4576 = vmatpush3.bf16.msra.mxu0 %v4918_v54  ;;  %v1066_v54 = vcombine.high %v1050_v49, %v1050_v49 }
  0xd2   : > { %4577 = vmatprep.subr.bf16.mxu0 %v4920_v56  ;;  %v4970_v56 = vld [vmem:[%s6196_s1 + $0x6c8] sm:$0xff]  }
  0xd3   : > { %4598 = vmatpush3.bf16.msra.mxu1 %v4919_v55  ;;  %v4969_v55 = vld [vmem:[%s6196_s1 + $0x648] sm:$0xff]  }
  0xd4   : > { %4599 = vmatprep.subr.bf16.mxu1 %v4921_v57  ;;  %v4971_v57 = vld [vmem:[%s6196_s1 + $0x608] sm:$0xff]  }
  0xd5   : > { %4578 = vmatpush3.bf16.msra.mxu0 %v4922_v58  ;;  %v4972_v58 = vld [vmem:[%s6196_s1 + $0x688] sm:$0xff]  }
  0xd6   : > { %4579 = vmatprep.subr.bf16.mxu0 %v4924_v60  ;;  %v4974_v60 = vld [vmem:[%s6196_s1 + $0x6d0] sm:$0xff]  }
  0xd7   : > { %4600 = vmatpush3.bf16.msra.mxu1 %v4923_v59  ;;  %v4973_v59 = vld [vmem:[%s6196_s1 + $0x650] sm:$0xff]  }
  0xd8   : > { %4601 = vmatprep.subr.bf16.mxu1 %v4925_v62  ;;  %v4976_v62 = vld [vmem:[%s6196_s1 + $0x690] sm:$0xff]  }
  0xd9   : > { %4580 = vmatpush3.bf16.msra.mxu0 %v4926_v1  ;;  %v4979_v1 = vld [vmem:[%s6196_s1 + $0x618] sm:$0xff]  }
  0xda   : > { %4581 = vmatprep.subr.bf16.mxu0 %v4928_v5  ;;  %v4983_v5 = vld [vmem:[%s6196_s1 + $0x620] sm:$0xff]  }
  0xdb   : > { %4602 = vmatpush3.bf16.msra.mxu1 %v4927_v2  ;;  %v4980_v2 = vld [vmem:[%s6196_s1 + $0x698] sm:$0xff]  }
  0xdc   : > { %4603 = vmatprep.subr.bf16.mxu1 %v4929_v6  ;;  %v4984_v6 = vld [vmem:[%s6196_s1 + $0x6a0] sm:$0xff]  }
  0xdd   : > { %4582 = vmatpush3.bf16.msra.mxu0 %v4930_v9  ;;  %v4987_v9 = vld [vmem:[%s6196_s1 + $0x628] sm:$0xff]  }
  0xde   : > { %4611 = vmatprep.subr.bf16.mxu0 %v4932_v13  ;;  %v4990_v13 = vld [vmem:[%s6196_s1 + $0x6f0] sm:$0xff]  }
  0xdf   : > { %4604 = vmatpush3.bf16.msra.mxu1 %v4931_v10  ;;  %v4988_v10 = vld [vmem:[%s6196_s1 + $0x6a8] sm:$0xff]  }
  0xe0   : > { %3039 = vmatmul.mubr.bf16.vlgmr.msra.gmra.mrb[16].mxu0 %v1043_v12  ;;  %4633 = vmatprep.subr.bf16.mxu1 %v4933_v14  ;;  %v398_v12 = vld [vmem:[%s6195_s0 + $0x18] sm:$0xff] }
  0xe1   : > { %4612 = vmatpush3.bf16.msra.mxu0 %v4934_v16  ;;  %3118 = vmatprep.mubr.bf16.mxu0 %v1064_v15  ;;  %v1076_v14 = vrot.slane %v398_v12, %v5377_v41  ;;  %v1069_v15 = vcombine.high %v398_v12, %v398_v12  ;;  %v4991_v16 = vld [vmem:[%s6196_s1 + $0x630] sm:$0xff]  }
  0xe2   : > { %3079 = vmatmul.mubr.bf16.vlgmr.msra.gmra.mrb[16].mxu1 %v1065_v18  ;;  %4613 = vmatprep.subr.bf16.mxu0 %v4936_v19 }
  0xe3   : > { %4634 = vmatpush3.bf16.msra.mxu1 %v4935_v17  ;;  %3158 = vmatprep.mubr.bf16.mxu1 %v1068_v21  ;;  %v4993_v17 = vld [vmem:[%s6196_s1 + $0x678] sm:$0xff]   ;;  %v1084_v18 = vcombine.high %v1076_v14, %v1076_v14  ;;  %v5981_v19 = vrot.slane %v1069_v15, %v5377_v41 }
  0xe4   : > { %4635 = vmatprep.subr.bf16.mxu1 %v4937_v20  ;;  %v4992_v20 = vld [vmem:[%s6196_s1 + $0x6b0] sm:$0xff]   ;;  %v4994_v21 = vld [vmem:[%s6196_s1 + $0x6f8] sm:$0xff]  }
  0xe5   : > { %4614 = vmatpush3.bf16.msra.mxu0 %v4938_v22  ;;  %v1106_v22 = vrot.slane %v1084_v18, %v5377_v41  ;;  %v1099_v12 = vrot.slane %v5981_v19, %v5377_v41 }
  0xe6   : > { %4615 = vmatprep.subr.bf16.mxu0 %v4940_v24  ;;  %v4995_v24 = vld [vmem:[%s6196_s1 + $0x638] sm:$0xff]  }
  0xe7   : > { %4636 = vmatpush3.bf16.msra.mxu1 %v4939_v23  ;;  %v1085_v23 = vcombine.high %v5981_v19, %v5981_v19 }
  0xe8   : > { %4637 = vmatprep.subr.bf16.mxu1 %v4941_v25  ;;  %v1116_v25 = vcombine.high %v1106_v22, %v1106_v22 }
  0xe9   : > { %4616 = vmatpush3.bf16.msra.mxu0 %v4942_v26  ;;  %v1092_v26 = vrot.slane %v1076_v14, %v5377_v41  ;;  %v1115_v14 = vcombine.high %v1099_v12, %v1099_v12 }
  0xea   : > { %4617 = vmatprep.subr.bf16.mxu0 %v4944_v28  ;;  %v4996_v28 = vld [vmem:[%s6196_s1 + $0x6b8] sm:$0xff]  }
  0xeb   : > { %4638 = vmatpush3.bf16.msra.mxu1 %v4943_v27  ;;  %v4997_v27 = vld [vmem:[%s6196_s1 + $0x740] sm:$0xff]  }
  0xec   : > { %4639 = vmatprep.subr.bf16.mxu1 %v4945_v29  ;;  %v1113_v29 = vrot.slane %v1085_v23, %v5377_v41 }
  0xed   : > { %4618 = vmatpush3.bf16.msra.mxu0 %v4946_v30  ;;  %v4998_v30 = vld [vmem:[%s6196_s1 + $0x7c0] sm:$0xff]  }
  0xee   : > { %4619 = vmatprep.subr.bf16.mxu0 %v4948_v32  ;;  %v1114_v32 = vcombine.high %v1092_v26, %v1092_v26 }
  0xef   : > { %4640 = vmatpush3.bf16.msra.mxu1 %v4947_v31  ;;  %v4999_v31 = vld [vmem:[%s6196_s1 + $0x700] sm:$0xff]  }
  0xf0   : > { %4641 = vmatprep.subr.bf16.mxu1 %v4949_v33  ;;  %v5001_v33 = vld [vmem:[%s6196_s1 + $0x748] sm:$0xff]  }
  0xf1   : > { %4620 = vmatpush3.bf16.msra.mxu0 %v4950_v34  ;;  %v5000_v34 = vld [vmem:[%s6196_s1 + $0x780] sm:$0xff]  }
  0xf2   : > { %4621 = vmatprep.subr.bf16.mxu0 %v4952_v36  ;;  %v5002_v36 = vld [vmem:[%s6196_s1 + $0x7c8] sm:$0xff]  }
  0xf3   : > { %4642 = vmatpush3.bf16.msra.mxu1 %v4951_v35  ;;  %v1117_v35 = vcombine.high %v1113_v29, %v1113_v29 }
  0xf4   : > { %4643 = vmatprep.subr.bf16.mxu1 %v4953_v37  ;;  %v5003_v37 = vld [vmem:[%s6196_s1 + $0x708] sm:$0xff]  }
  0xf5   : > { %4622 = vmatpush3.bf16.msra.mxu0 %v4954_v38  ;;  %v5005_v38 = vld [vmem:[%s6196_s1 + $0x750] sm:$0xff]  }
  0xf6   : > { %4623 = vmatprep.subr.bf16.mxu0 %v4956_v40  ;;  %v5006_v40 = vld [vmem:[%s6196_s1 + $0x7d0] sm:$0xff]  }
  0xf7   : > { %4644 = vmatpush3.bf16.msra.mxu1 %v4955_v39  ;;  %v5004_v39 = vld [vmem:[%s6196_s1 + $0x788] sm:$0xff]  }
  0xf8   : > { %4645 = vmatprep.subr.bf16.mxu1 %v4957_v42  ;;  %v5007_v42 = vld [vmem:[%s6196_s1 + $0x710] sm:$0xff]  }
  0xf9   : > { %4624 = vmatpush3.bf16.msra.mxu0 %v4958_v43  ;;  %v5009_v43 = vld [vmem:[%s6196_s1 + $0x758] sm:$0xff]  }
  0xfa   : > { %4625 = vmatprep.subr.bf16.mxu0 %v4960_v45  ;;  %v5010_v45 = vld [vmem:[%s6196_s1 + $0x7d8] sm:$0xff]  }
  0xfb   : > { %4646 = vmatpush3.bf16.msra.mxu1 %v4959_v44  ;;  %v5008_v44 = vld [vmem:[%s6196_s1 + $0x790] sm:$0xff]  }
  0xfc   : > { %4647 = vmatprep.subr.bf16.mxu1 %v4961_v46  ;;  %v5011_v46 = vld [vmem:[%s6196_s1 + $0x718] sm:$0xff]  }
  0xfd   : > { %4626 = vmatpush3.bf16.msra.mxu0 %v4962_v47  ;;  %v5013_v47 = vld [vmem:[%s6196_s1 + $0x760] sm:$0xff]  }
  0xfe   : > { %4655 = vmatprep.subr.bf16.mxu0 %v4965_v50  ;;  %v5015_v50 = vld [vmem:[%s6196_s1 + $0x720] sm:$0xff]  }
  0xff   : > { %4648 = vmatpush3.bf16.msra.mxu1 %v4963_v48  ;;  %v5012_v48 = vld [vmem:[%s6196_s1 + $0x798] sm:$0xff]  }
 0x100   : > { %3119 = vmatmul.mubr.bf16.vlgmr.msra.gmra.mrb[20].mxu0 %v1050_v49  ;;  %4677 = vmatprep.subr.bf16.mxu1 %v4966_v51  ;;  %v5014_v49 = vld [vmem:[%s6196_s1 + $0x7e0] sm:$0xff]   ;;  %v5017_v51 = vld [vmem:[%s6196_s1 + $0x768] sm:$0xff]  }
 0x101   : > { %4656 = vmatpush3.bf16.msra.mxu0 %v4967_v52  ;;  %3198 = vmatprep.mubr.bf16.mxu0 %v1106_v22  ;;  %v5016_v52 = vld [vmem:[%s6196_s1 + $0x7a0] sm:$0xff]  }
 0x102   : > { %3159 = vmatmul.mubr.bf16.vlgmr.msra.gmra.mrb[20].mxu1 %v1066_v54  ;;  %4657 = vmatprep.subr.bf16.mxu0 %v4969_v55  ;;  %v5019_v54 = vld [vmem:[%s6196_s1 + $0x728] sm:$0xff]   ;;  %v5021_v55 = vld [vmem:[%s6196_s1 + $0x770] sm:$0xff]  }
 0x103   : > { %4678 = vmatpush3.bf16.msra.mxu1 %v4968_v53  ;;  %3238 = vmatprep.mubr.bf16.mxu1 %v1116_v25  ;;  %v5018_v53 = vld [vmem:[%s6196_s1 + $0x7e8] sm:$0xff]  }
 0x104   : > { %4679 = vmatprep.subr.bf16.mxu1 %v4970_v56 }
 0x105   : > { %4658 = vmatpush3.bf16.msra.mxu0 %v4971_v57  ;;  %v5020_v57 = vld [vmem:[%s6196_s1 + $0x7a8] sm:$0xff]  }
 0x106   : > { %4659 = vmatprep.subr.bf16.mxu0 %v4973_v59 }
 0x107   : > { %4680 = vmatpush3.bf16.msra.mxu1 %v4972_v58  ;;  %v4063_v58 = vld [vmem:[%s6197_s2] ss:$0 sm:$0xff] }
 0x108   : > { %4681 = vmatprep.subr.bf16.mxu1 %v4974_v60  ;;  %v5022_v60 = vld [vmem:[%s6196_s1 + $0x7f0] sm:$0xff]  }
 0x109   : > { %4660 = vmatpush3.bf16.msra.mxu0 %v4975_v61 }
 0x10a   : > { %4661 = vmatprep.subr.bf16.mxu0 %v4977_v63 }
 0x10b   : > { %4682 = vmatpush3.bf16.msra.mxu1 %v4976_v62 }
 0x10c   : > { %4683 = vmatprep.subr.bf16.mxu1 %v4978_v0  ;;  %v5023_v0 = vld [vmem:[%s6196_s1 + $0x730] sm:$0xff]  }
 0x10d   : > { %4662 = vmatpush3.bf16.msra.mxu0 %v4979_v1 }
 0x10e   : > { %4663 = vmatprep.subr.bf16.mxu0 %v4981_v3  ;;  %v5025_v3 = vld [vmem:[%s6196_s1 + $0x778] sm:$0xff]  }
 0x10f   : > { %4684 = vmatpush3.bf16.msra.mxu1 %v4980_v2 }
 0x110   : > { %4685 = vmatprep.subr.bf16.mxu1 %v4982_v4 }
 0x111   : > { %4664 = vmatpush3.bf16.msra.mxu0 %v4983_v5 }
 0x112   : > { %4665 = vmatprep.subr.bf16.mxu0 %v4985_v7  ;;  %v5024_v7 = vld [vmem:[%s6196_s1 + $0x7b0] sm:$0xff]  }
 0x113   : > { %4686 = vmatpush3.bf16.msra.mxu1 %v4984_v6 }
 0x114   : > { %4687 = vmatprep.subr.bf16.mxu1 %v4986_v8 }
 0x115   : > { %4666 = vmatpush3.bf16.msra.mxu0 %v4987_v9  ;;  %v5026_v9 = vld [vmem:[%s6196_s1 + $0x7f8] sm:$0xff]  }
 0x116   : > { %4667 = vmatprep.subr.bf16.mxu0 %v4989_v11  ;;  %v5027_v11 = vld [vmem:[%s6196_s1 + $0x738] sm:$0xff]  }
 0x117   : > { %4688 = vmatpush3.bf16.msra.mxu1 %v4988_v10 }
 0x118   : > { %4689 = vmatprep.subr.bf16.mxu1 %v4990_v13  ;;  %v5028_v13 = vld [vmem:[%s6196_s1 + $0x7b8] sm:$0xff]  }
 0x119   : > { %4668 = vmatpush3.bf16.msra.mxu0 %v4991_v16 }
 0x11a   : > { %4669 = vmatprep.subr.bf16.mxu0 %v4993_v17 }
 0x11b   : > { %4690 = vmatpush3.bf16.msra.mxu1 %v4992_v20 }
 0x11c   : > { %4691 = vmatprep.subr.bf16.mxu1 %v4994_v21 }
 0x11d   : > { %4670 = vmatpush3.bf16.msra.mxu0 %v4995_v24 }
 0x11e   : > { %4699 = vmatprep.subr.bf16.mxu0 %v4997_v27 }
 0x11f   : > { %4692 = vmatpush3.bf16.msra.mxu1 %v4996_v28 }
 0x120   : > { %3199 = vmatmul.mubr.bf16.vlgmr.msra.gmra.mrb[24].mxu0 %v1092_v26  ;;  %4721 = vmatprep.subr.bf16.mxu1 %v4998_v30 }
 0x121   : > { %4700 = vmatpush3.bf16.msra.mxu0 %v4999_v31  ;;  %3278 = vmatprep.mubr.bf16.mxu0 %v1113_v29 }
 0x122   : > { %3239 = vmatmul.mubr.bf16.vlgmr.msra.gmra.mrb[24].mxu1 %v1114_v32  ;;  %4701 = vmatprep.subr.bf16.mxu0 %v5001_v33 }
 0x123   : > { %4722 = vmatpush3.bf16.msra.mxu1 %v5000_v34  ;;  %3318 = vmatprep.mubr.bf16.mxu1 %v1117_v35 }
 0x124   : > { %4723 = vmatprep.subr.bf16.mxu1 %v5002_v36 }
 0x125   : > { %4702 = vmatpush3.bf16.msra.mxu0 %v5003_v37 }
 0x126   : > { %4703 = vmatprep.subr.bf16.mxu0 %v5005_v38 }
 0x127   : > { %4724 = vmatpush3.bf16.msra.mxu1 %v5004_v39 }
 0x128   : > { %4725 = vmatprep.subr.bf16.mxu1 %v5006_v40 }
 0x129   : > { %4704 = vmatpush3.bf16.msra.mxu0 %v5007_v42 }
 0x12a   : > { %4705 = vmatprep.subr.bf16.mxu0 %v5009_v43 }
 0x12b   : > { %4726 = vmatpush3.bf16.msra.mxu1 %v5008_v44 }
 0x12c   : > { %4727 = vmatprep.subr.bf16.mxu1 %v5010_v45 }
 0x12d   : > { %4706 = vmatpush3.bf16.msra.mxu0 %v5011_v46 }
 0x12e   : > { %4707 = vmatprep.subr.bf16.mxu0 %v5013_v47 }
 0x12f   : > { %4728 = vmatpush3.bf16.msra.mxu1 %v5012_v48 }
 0x130   : > { %4729 = vmatprep.subr.bf16.mxu1 %v5014_v49 }
 0x131   : > { %4708 = vmatpush3.bf16.msra.mxu0 %v5015_v50 }
 0x132   : > { %4709 = vmatprep.subr.bf16.mxu0 %v5017_v51 }
 0x133   : > { %4730 = vmatpush3.bf16.msra.mxu1 %v5016_v52  ;;  %v4407_v56 = vpop.f32.mrb[0].mxu0 }
 0x134   : > { %v4408_v59 = vpop.f32.mrb[1].mxu0  ;;  %4731 = vmatprep.subr.bf16.mxu1 %v5018_v53  ;;  %v4429_v61 = vpop.f32.mrb[0].mxu1 }
 0x135   : > { %v4409_v62 = vadd.f32 %v4408_v59, %v4407_v56  ;;  %v4410_v63 = vpop.f32.mrb[2].mxu0  ;;  %4710 = vmatpush3.bf16.msra.mxu0 %v5019_v54  ;;  %v4430_v1 = vpop.f32.mrb[1].mxu1 }
 0x136   : > { %v4411_v2 = vpop.f32.mrb[3].mxu0  ;;  %4711 = vmatprep.subr.bf16.mxu0 %v5021_v55  ;;  %v4431_v5 = vadd.f32 %v4430_v1, %v4429_v61  ;;  %v4432_v6 = vpop.f32.mrb[2].mxu1 }
 0x137   : > { %v2721_v4 = vadd.f32 %v4409_v62, %v4063_v58  ;;  %4732 = vmatpush3.bf16.msra.mxu1 %v5020_v57  ;;  %v4433_v8 = vpop.f32.mrb[3].mxu1 }
 0x138   : > { %4733 = vmatprep.subr.bf16.mxu1 %v5022_v60 }
 0x139   : > { %v2761_v10 = vadd.f32 %v4431_v5, %v2721_v4  ;;  %4712 = vmatpush3.bf16.msra.mxu0 %v5023_v0 }
 0x13a   : > { %4713 = vmatprep.subr.bf16.mxu0 %v5025_v3 }
 0x13b   : > { %4734 = vmatpush3.bf16.msra.mxu1 %v5024_v7 }
 0x13c   : > { %4735 = vmatprep.subr.bf16.mxu1 %v5026_v9 }
 0x13d   : > { %4714 = vmatpush3.bf16.msra.mxu0 %v5027_v11 }
 0x13f   : > { %4736 = vmatpush3.bf16.msra.mxu1 %v5028_v13 }
 0x140   : > { %3279 = vmatmul.mubr.bf16.vlgmr.msra.gmra.mrb[28].mxu0 %v1099_v12 }
 0x142   : > { %3319 = vmatmul.mubr.bf16.vlgmr.msra.gmra.mrb[28].mxu1 %v1115_v14 }
 0x153   : > { %v4451_v15 = vpop.f32.mrb[4].mxu0 }
 0x154   : > { %v4452_v16 = vpop.f32.mrb[5].mxu0  ;;  %v4473_v17 = vpop.f32.mrb[4].mxu1 }
 0x155   : > { %v4453_v18 = vadd.f32 %v4452_v16, %v4451_v15  ;;  %v4454_v20 = vpop.f32.mrb[6].mxu0  ;;  %v4474_v21 = vpop.f32.mrb[5].mxu1 }
 0x156   : > { %v4455_v22 = vpop.f32.mrb[7].mxu0  ;;  %v4475_v41 = vadd.f32 %v4474_v21, %v4473_v17  ;;  %v4476_v19 = vpop.f32.mrb[6].mxu1 }
 0x157   : > { %v2801_v23 = vadd.f32 %v4453_v18, %v2761_v10  ;;  %v4477_v24 = vpop.f32.mrb[7].mxu1 }
 0x159   : > { %v2841_v25 = vadd.f32 %v4475_v41, %v2801_v23 }
 0x173   : > { %v4495_v26 = vpop.f32.mrb[8].mxu0 }
 0x174   : > { %v4496_v27 = vpop.f32.mrb[9].mxu0 }
 0x175   : > { %v4517_v28 = vpop.f32.mrb[8].mxu1  ;;  %v4497_v29 = vadd.f32 %v4496_v27, %v4495_v26  ;;  %v4498_v30 = vpop.f32.mrb[10].mxu0 }
 0x176   : > { %v4518_v31 = vpop.f32.mrb[9].mxu1  ;;  %v4499_v32 = vpop.f32.mrb[11].mxu0 }
 0x177   : > { %v2881_v33 = vadd.f32 %v4497_v29, %v2841_v25  ;;  %v4519_v34 = vadd.f32 %v4518_v31, %v4517_v28  ;;  %v4520_v35 = vpop.f32.mrb[10].mxu1 }
 0x178   : > { %v4521_v36 = vpop.f32.mrb[11].mxu1 }
 0x179   : > { %v2921_v37 = vadd.f32 %v4519_v34, %v2881_v33 }
 0x193   : > { %v4539_v38 = vpop.f32.mrb[12].mxu0 }
 0x194   : > { %v4540_v39 = vpop.f32.mrb[13].mxu0 }
 0x195   : > { %v4561_v40 = vpop.f32.mrb[12].mxu1  ;;  %v4541_v42 = vadd.f32 %v4540_v39, %v4539_v38  ;;  %v4542_v43 = vpop.f32.mrb[14].mxu0 }
 0x196   : > { %v4562_v44 = vpop.f32.mrb[13].mxu1  ;;  %v4543_v45 = vpop.f32.mrb[15].mxu0 }
 0x197   : > { %v2961_v46 = vadd.f32 %v4541_v42, %v2921_v37  ;;  %v4563_v47 = vadd.f32 %v4562_v44, %v4561_v40  ;;  %v4564_v48 = vpop.f32.mrb[14].mxu1 }
 0x198   : > { %v4565_v49 = vpop.f32.mrb[15].mxu1 }
 0x199   : > { %v3001_v50 = vadd.f32 %v4563_v47, %v2961_v46 }
 0x1b3   : > { %v4583_v51 = vpop.f32.mrb[16].mxu0 }
 0x1b4   : > { %v4584_v52 = vpop.f32.mrb[17].mxu0 }
 0x1b5   : > { %v4605_v53 = vpop.f32.mrb[16].mxu1  ;;  %v4585_v54 = vadd.f32 %v4584_v52, %v4583_v51  ;;  %v4586_v55 = vpop.f32.mrb[18].mxu0 }
 0x1b6   : > { %v4606_v56 = vpop.f32.mrb[17].mxu1  ;;  %v4587_v57 = vpop.f32.mrb[19].mxu0 }
 0x1b7   : > { %v3041_v58 = vadd.f32 %v4585_v54, %v3001_v50  ;;  %v4607_v59 = vadd.f32 %v4606_v56, %v4605_v53  ;;  %v4608_v60 = vpop.f32.mrb[18].mxu1 }
 0x1b8   : > { %v4609_v61 = vpop.f32.mrb[19].mxu1 }
 0x1b9   : > { %v3081_v62 = vadd.f32 %v4607_v59, %v3041_v58 }
 0x1d3   : > { %v4627_v63 = vpop.f32.mrb[20].mxu0 }
 0x1d4   : > { %v4628_v0 = vpop.f32.mrb[21].mxu0 }
 0x1d5   : > { %v4649_v1 = vpop.f32.mrb[20].mxu1  ;;  %v4629_v2 = vadd.f32 %v4628_v0, %v4627_v63  ;;  %v4630_v3 = vpop.f32.mrb[22].mxu0 }
 0x1d6   : > { %v4650_v4 = vpop.f32.mrb[21].mxu1  ;;  %v4631_v5 = vpop.f32.mrb[23].mxu0 }
 0x1d7   : > { %v3121_v6 = vadd.f32 %v4629_v2, %v3081_v62  ;;  %v4651_v7 = vadd.f32 %v4650_v4, %v4649_v1  ;;  %v4652_v8 = vpop.f32.mrb[22].mxu1 }
 0x1d8   : > { %v4653_v9 = vpop.f32.mrb[23].mxu1 }
 0x1d9   : > { %v3161_v10 = vadd.f32 %v4651_v7, %v3121_v6 }
 0x1f3   : > { %v4671_v11 = vpop.f32.mrb[24].mxu0 }
 0x1f4   : > { %v4672_v12 = vpop.f32.mrb[25].mxu0 }
 0x1f5   : > { %v4693_v13 = vpop.f32.mrb[24].mxu1  ;;  %v4673_v14 = vadd.f32 %v4672_v12, %v4671_v11  ;;  %v4674_v15 = vpop.f32.mrb[26].mxu0 }
 0x1f6   : > { %v4694_v16 = vpop.f32.mrb[25].mxu1  ;;  %v4675_v17 = vpop.f32.mrb[27].mxu0 }
 0x1f7   : > { %v3201_v18 = vadd.f32 %v4673_v14, %v3161_v10  ;;  %v4695_v20 = vadd.f32 %v4694_v16, %v4693_v13  ;;  %v4696_v21 = vpop.f32.mrb[26].mxu1 }
 0x1f8   : > { %v4697_v22 = vpop.f32.mrb[27].mxu1 }
 0x1f9   : > { %v3241_v23 = vadd.f32 %v4695_v20, %v3201_v18 }
 0x213   : > { %v4715_v41 = vpop.f32.mrb[28].mxu0 }
 0x214   : > { %v4716_v19 = vpop.f32.mrb[29].mxu0 }
 0x215   : > { %v4737_v24 = vpop.f32.mrb[28].mxu1  ;;  %v4717_v25 = vadd.f32 %v4716_v19, %v4715_v41  ;;  %v4718_v26 = vpop.f32.mrb[30].mxu0 }
 0x216   : > { %v4738_v27 = vpop.f32.mrb[29].mxu1  ;;  %v4719_v28 = vpop.f32.mrb[31].mxu0 }
 0x217   : > { %v3281_v29 = vadd.f32 %v4717_v25, %v3241_v23  ;;  %v4739_v30 = vadd.f32 %v4738_v27, %v4737_v24  ;;  %v4740_v31 = vpop.f32.mrb[30].mxu1 }
 0x218   : > { %v4741_v32 = vpop.f32.mrb[31].mxu1 }
 0x219   : > { %v3321_v33 = vadd.f32 %v4739_v30, %v3281_v29 }
 0x21b   : > { %3326 = vst [vmem:[#allocation2] sm:$0x3] %v3321_v33 }
 0x21c PF: > { %v3329_v34 = vld [vmem:[%s5268_s17] sm:$0xff]  ;;  %v3330_v36 = vld [vmem:[%s5268_s17 + $0x8] sm:$0xff]  ;;  %v5055_v43 = vmov 0   ;;  %v3331_v33 = vld [vmem:[%s5268_s17 + $0x10] sm:$0xff] }
 0x21d   : > { %v3333_v35 = vld [vmem:[%s5268_s17 + $0x20] sm:$0xff]  ;;  %v3334_v38 = vld [vmem:[%s5268_s17 + $0x28] sm:$0xff]  ;;  %3787 = vmatprep.mubr.bf16.mxu0 %v5055_v43  ;;  %3828 = vmatprep.mubr.bf16.mxu1 %v5055_v43 }
 0x21e   : > { %v4321_v37 = vcombine.high %v3329_v34, %v3333_v35  ;;  %v4320_v39 = vcombine.low %v3329_v34, %v3333_v35  ;;  %v3337_v40 = vld [vmem:[%s5268_s17 + $0x40] sm:$0xff]  ;;  %v4323_v44 = vcombine.high %v3330_v36, %v3334_v38  ;;  %v4322_v45 = vcombine.low %v3330_v36, %v3334_v38  ;;  %v3338_v47 = vld [vmem:[%s5268_s17 + $0x48] sm:$0xff]  ;;  %v3335_v34 = vld [vmem:[%s5268_s17 + $0x30] sm:$0xff] }
 0x21f   : > { %v3341_v42 = vld [vmem:[%s5268_s17 + $0x60] sm:$0xff]  ;;  %v3342_v48 = vld [vmem:[%s5268_s17 + $0x68] sm:$0xff]  ;;  %v3332_v35 = vld [vmem:[%s5268_s17 + $0x18] sm:$0xff] }
 0x220   : > { %v4329_v46 = vcombine.high %v3337_v40, %v3341_v42  ;;  %v3345_v49 = vld [vmem:[%s5268_s17 + $0x80] sm:$0xff]  ;;  %3755 = vmatprep.subr.bf16.mxu0 %v4321_v37  ;;  %v4331_v50 = vcombine.high %v3338_v47, %v3342_v48  ;;  %v3346_v52 = vld [vmem:[%s5268_s17 + $0x88] sm:$0xff]  ;;  %3796 = vmatprep.subr.bf16.mxu1 %v4323_v44  ;;  %v4328_v54 = vcombine.low %v3337_v40, %v3341_v42  ;;  %v3336_v36 = vld [vmem:[%s5268_s17 + $0x38] sm:$0xff] }
 0x221   : > { %v3349_v51 = vld [vmem:[%s5268_s17 + $0xa0] sm:$0xff]  ;;  %v3350_v53 = vld [vmem:[%s5268_s17 + $0xa8] sm:$0xff]  ;;  %3756 = vmatpush1.bf16.msra.mxu0 %v4320_v39  ;;  %3797 = vmatpush1.bf16.msra.mxu1 %v4322_v45  ;;  %v4330_v55 = vcombine.low %v3338_v47, %v3342_v48  ;;  %v4325_v40 = vcombine.high %v3331_v33, %v3335_v34  ;;  %v4327_v42 = vcombine.high %v3332_v35, %v3336_v36  ;;  %v3339_v44 = vld [vmem:[%s5268_s17 + $0x50] sm:$0xff] }
 0x222   : > { %3757 = vmatprep.subr.bf16.mxu0 %v4329_v46  ;;  %v4337_v56 = vcombine.high %v3345_v49, %v3349_v51  ;;  %3798 = vmatprep.subr.bf16.mxu1 %v4331_v50  ;;  %v4339_v57 = vcombine.high %v3346_v52, %v3350_v53  ;;  %v3353_v58 = vld [vmem:[%s5268_s17 + $0xc0] sm:$0xff]  ;;  %v3354_v60 = vld [vmem:[%s5268_s17 + $0xc8] sm:$0xff]  ;;  %v4336_v62 = vcombine.low %v3345_v49, %v3349_v51  ;;  %v3327_v38 = vld [vmem:[#allocation2] sm:$0x3] }
 0x223   : > { %v3357_v59 = vld [vmem:[%s5268_s17 + $0xe0] sm:$0xff]  ;;  %v3358_v61 = vld [vmem:[%s5268_s17 + $0xe8] sm:$0xff]  ;;  %v4338_v63 = vcombine.low %v3346_v52, %v3350_v53  ;;  %v3343_v45 = vld [vmem:[%s5268_s17 + $0x70] sm:$0xff]  ;;  %v6141_v46 = vpack.c.bf16 %v3327_v38, %v3327_v38  ;;  %v4324_v49 = vcombine.low %v3331_v33, %v3335_v34  ;;  %v4326_v50 = vcombine.low %v3332_v35, %v3336_v36 }
 0x224   : > { %v4345_v0 = vcombine.high %v3353_v58, %v3357_v59  ;;  %v4347_v1 = vcombine.high %v3354_v60, %v3358_v61  ;;  %v3361_v2 = vld [vmem:[%s5268_s17 + $0x100] sm:$0xff]  ;;  %v3362_v4 = vld [vmem:[%s5268_s17 + $0x108] sm:$0xff]  ;;  %v4344_v6 = vcombine.low %v3353_v58, %v3357_v59  ;;  %v4346_v7 = vcombine.low %v3354_v60, %v3358_v61  ;;  %v3340_v47 = vld [vmem:[%s5268_s17 + $0x58] sm:$0xff] }
 0x225   : > { %3758 = vmatpush1.bf16.msra.mxu0 %v4328_v54  ;;  %3799 = vmatpush1.bf16.msra.mxu1 %v4330_v55  ;;  %v3365_v3 = vld [vmem:[%s5268_s17 + $0x120] sm:$0xff]  ;;  %v3366_v5 = vld [vmem:[%s5268_s17 + $0x128] sm:$0xff]  ;;  %v3344_v48 = vld [vmem:[%s5268_s17 + $0x78] sm:$0xff]  ;;  %v4333_v51 = vcombine.high %v3339_v44, %v3343_v45 }
 0x226   : > { %3759 = vmatprep.subr.bf16.mxu0 %v4337_v56  ;;  %3800 = vmatprep.subr.bf16.mxu1 %v4339_v57  ;;  %v4353_v8 = vcombine.high %v3361_v2, %v3365_v3  ;;  %v4355_v9 = vcombine.high %v3362_v4, %v3366_v5  ;;  %v3369_v10 = vld [vmem:[%s5268_s17 + $0x140] sm:$0xff]  ;;  %v3370_v12 = vld [vmem:[%s5268_s17 + $0x148] sm:$0xff]  ;;  %v4352_v14 = vcombine.low %v3361_v2, %v3365_v3  ;;  %v3347_v53 = vld [vmem:[%s5268_s17 + $0x90] sm:$0xff] }
 0x227   : > { %v3373_v11 = vld [vmem:[%s5268_s17 + $0x160] sm:$0xff]  ;;  %v3374_v13 = vld [vmem:[%s5268_s17 + $0x168] sm:$0xff]  ;;  %v4354_v15 = vcombine.low %v3362_v4, %v3366_v5  ;;  %v4335_v52 = vcombine.high %v3340_v47, %v3344_v48  ;;  %v3351_v54 = vld [vmem:[%s5268_s17 + $0xb0] sm:$0xff]  ;;  %v4332_v57 = vcombine.low %v3339_v44, %v3343_v45  ;;  %v4334_v58 = vcombine.low %v3340_v47, %v3344_v48 }
 0x228   : > { %v4361_v16 = vcombine.high %v3369_v10, %v3373_v11  ;;  %v4363_v17 = vcombine.high %v3370_v12, %v3374_v13  ;;  %v3377_v18 = vld [vmem:[%s5268_s17 + $0x180] sm:$0xff]  ;;  %v3378_v21 = vld [vmem:[%s5268_s17 + $0x188] sm:$0xff]  ;;  %v4360_v23 = vcombine.low %v3369_v10, %v3373_v11  ;;  %v4362_v41 = vcombine.low %v3370_v12, %v3374_v13  ;;  %v3348_v55 = vld [vmem:[%s5268_s17 + $0x98] sm:$0xff] }
 0x229   : > { %3760 = vmatpush1.bf16.msra.mxu0 %v4336_v62  ;;  %3801 = vmatpush1.bf16.msra.mxu1 %v4338_v63  ;;  %v3381_v20 = vld [vmem:[%s5268_s17 + $0x1a0] sm:$0xff]  ;;  %v3382_v22 = vld [vmem:[%s5268_s17 + $0x1a8] sm:$0xff]  ;;  %v3352_v56 = vld [vmem:[%s5268_s17 + $0xb8] sm:$0xff]  ;;  %v4341_v59 = vcombine.high %v3347_v53, %v3351_v54  ;;  %v5056_v45 = vmov 1966171168  }
 0x22a   : > { %3761 = vmatprep.subr.bf16.mxu0 %v4345_v0  ;;  %3802 = vmatprep.subr.bf16.mxu1 %v4347_v1  ;;  %v4369_v19 = vcombine.high %v3377_v18, %v3381_v20  ;;  %v4371_v24 = vcombine.high %v3378_v21, %v3382_v22  ;;  %v3385_v25 = vld [vmem:[%s5268_s17 + $0x1c0] sm:$0xff]  ;;  %v3386_v27 = vld [vmem:[%s5268_s17 + $0x1c8] sm:$0xff]  ;;  %v4368_v29 = vcombine.low %v3377_v18, %v3381_v20  ;;  %v3355_v61 = vld [vmem:[%s5268_s17 + $0xd0] sm:$0xff]  ;;  %v3940_v47 = vunpack.c.l.s4 %v5056_v45 }
 0x22b   : > { %v3389_v26 = vld [vmem:[%s5268_s17 + $0x1e0] sm:$0xff]  ;;  %v3390_v28 = vld [vmem:[%s5268_s17 + $0x1e8] sm:$0xff]  ;;  %v4370_v30 = vcombine.low %v3378_v21, %v3382_v22  ;;  %v4343_v60 = vcombine.high %v3348_v55, %v3352_v56  ;;  %v3359_v62 = vld [vmem:[%s5268_s17 + $0xf0] sm:$0xff]  ;;  %v4340_v1 = vcombine.low %v3347_v53, %v3351_v54  ;;  %v4342_v2 = vcombine.low %v3348_v55, %v3352_v56 }
 0x22c   : > { %v4377_v31 = vcombine.high %v3385_v25, %v3389_v26  ;;  %v4379_v32 = vcombine.high %v3386_v27, %v3390_v28  ;;  %v4376_v37 = vcombine.low %v3385_v25, %v3389_v26  ;;  %v4378_v39 = vcombine.low %v3386_v27, %v3390_v28  ;;  %v3356_v63 = vld [vmem:[%s5268_s17 + $0xd8] sm:$0xff]  ;;  %v3363_v5 = vld [vmem:[%s5268_s17 + $0x110] sm:$0xff] }
 0x22d   : > { %3762 = vmatpush1.bf16.msra.mxu0 %v4344_v6  ;;  %3803 = vmatpush1.bf16.msra.mxu1 %v4346_v7  ;;  %v3360_v0 = vld [vmem:[%s5268_s17 + $0xf8] sm:$0xff]  ;;  %v4349_v3 = vcombine.high %v3355_v61, %v3359_v62  ;;  %v3367_v6 = vld [vmem:[%s5268_s17 + $0x130] sm:$0xff] }
 0x22e   : > { %3763 = vmatprep.subr.bf16.mxu0 %v4353_v8  ;;  %3804 = vmatprep.subr.bf16.mxu1 %v4355_v9  ;;  %v4351_v4 = vcombine.high %v3356_v63, %v3360_v0  ;;  %v3364_v7 = vld [vmem:[%s5268_s17 + $0x118] sm:$0xff]  ;;  %v4348_v9 = vcombine.low %v3355_v61, %v3359_v62  ;;  %v4357_v10 = vcombine.high %v3363_v5, %v3367_v6  ;;  %v3371_v12 = vld [vmem:[%s5268_s17 + $0x150] sm:$0xff] }
 0x22f   : > { %v3368_v8 = vld [vmem:[%s5268_s17 + $0x138] sm:$0xff]  ;;  %v3375_v13 = vld [vmem:[%s5268_s17 + $0x170] sm:$0xff] }
 0x230   : > { %v4359_v11 = vcombine.high %v3364_v7, %v3368_v8  ;;  %v4365_v18 = vcombine.high %v3371_v12, %v3375_v13  ;;  %v3379_v21 = vld [vmem:[%s5268_s17 + $0x190] sm:$0xff] }
 0x231   : > { %3764 = vmatpush1.bf16.msra.mxu0 %v4352_v14  ;;  %3805 = vmatpush1.bf16.msra.mxu1 %v4354_v15  ;;  %v3372_v14 = vld [vmem:[%s5268_s17 + $0x158] sm:$0xff]  ;;  %v3383_v22 = vld [vmem:[%s5268_s17 + $0x1b0] sm:$0xff] }
 0x232   : > { %3765 = vmatprep.subr.bf16.mxu0 %v4361_v16  ;;  %3806 = vmatprep.subr.bf16.mxu1 %v4363_v17  ;;  %v3376_v15 = vld [vmem:[%s5268_s17 + $0x178] sm:$0xff]  ;;  %v4356_v16 = vcombine.low %v3363_v5, %v3367_v6  ;;  %v4358_v17 = vcombine.low %v3364_v7, %v3368_v8  ;;  %v4373_v25 = vcombine.high %v3379_v21, %v3383_v22  ;;  %v3387_v27 = vld [vmem:[%s5268_s17 + $0x1d0] sm:$0xff] }
 0x233   : > { %v4367_v20 = vcombine.high %v3372_v14, %v3376_v15  ;;  %v3391_v28 = vld [vmem:[%s5268_s17 + $0x1f0] sm:$0xff] }
 0x234   : > { %v4381_v33 = vcombine.high %v3387_v27, %v3391_v28  ;;  %v4380_v35 = vcombine.low %v3387_v27, %v3391_v28 }
 0x235   : > { %3766 = vmatpush1.bf16.msra.mxu0 %v4360_v23  ;;  %3807 = vmatpush1.bf16.msra.mxu1 %v4362_v41  ;;  %v3380_v23 = vld [vmem:[%s5268_s17 + $0x198] sm:$0xff] }
 0x236   : > { %3767 = vmatprep.subr.bf16.mxu0 %v4369_v19  ;;  %3808 = vmatprep.subr.bf16.mxu1 %v4371_v24  ;;  %v3384_v41 = vld [vmem:[%s5268_s17 + $0x1b8] sm:$0xff]  ;;  %v4364_v19 = vcombine.low %v3371_v12, %v3375_v13  ;;  %v4366_v24 = vcombine.low %v3372_v14, %v3376_v15 }
 0x237   : > { %v4375_v26 = vcombine.high %v3380_v23, %v3384_v41 }
 0x239   : > { %3768 = vmatpush1.bf16.msra.mxu0 %v4368_v29  ;;  %3809 = vmatpush1.bf16.msra.mxu1 %v4370_v30  ;;  %v3388_v29 = vld [vmem:[%s5268_s17 + $0x1d8] sm:$0xff] }
 0x23a   : > { %3769 = vmatprep.subr.bf16.mxu0 %v4377_v31  ;;  %3810 = vmatprep.subr.bf16.mxu1 %v4379_v32  ;;  %v3392_v30 = vld [vmem:[%s5268_s17 + $0x1f8] sm:$0xff]  ;;  %v4372_v31 = vcombine.low %v3379_v21, %v3383_v22  ;;  %v4374_v32 = vcombine.low %v3380_v23, %v3384_v41 }
 0x23b   : > { %v4383_v34 = vcombine.high %v3388_v29, %v3392_v30  ;;  %v4382_v36 = vcombine.low %v3388_v29, %v3392_v30 }
 0x23d   : > { %3770 = vmatpush1.bf16.msra.mxu0 %v4376_v37  ;;  %3811 = vmatpush1.bf16.msra.mxu1 %v4378_v39  ;;  %v3395_v37 = vlaneseq }
 0x23e   : > { %3837 = vmatprep.subr.bf16.mxu0 %v4325_v40  ;;  %3878 = vmatprep.subr.bf16.mxu1 %v4327_v42  ;;  %v3393_v40 = vld [vmem:[%s383_s13] sm:$0xff] }
 0x23f   : > { %v3396_v38 = vshrl.u32 %v3395_v37, 7 }
 0x240   : > { %3788 = vmatmul.mubr.bf16.vlgmr.msra.gmra.mrb[0].mxu0 %v6141_v46  ;;  %3829 = vmatmul.mubr.bf16.vlgmr.msra.gmra.mrb[0].mxu1 %v6141_v46 }
 0x241   : > { %3838 = vmatpush1.bf16.msra.mxu0 %v4324_v49  ;;  %3879 = vmatpush1.bf16.msra.mxu1 %v4326_v50  ;;  %v3397_v39 = vsub.s32 0, %v3396_v38  ;;  %v3405_v42 = vsub.s32 2, %v3396_v38  ;;  %v3401_v44 = vsub.s32 1, %v3396_v38  ;;  %v3409_v48 = vsub.s32 3, %v3396_v38 }
 0x242   : > { %3839 = vmatprep.subr.bf16.mxu0 %v4333_v51  ;;  %3880 = vmatprep.subr.bf16.mxu1 %v4335_v52  ;;  %v3941_v52 = vunpack.c.0.s8 %v3940_v47  ;;  %v3413_v7 = vsub.s32 4, %v3396_v38  ;;  %v3421_v8 = vsub.s32 6, %v3396_v38 }
 0x243   : > { %3869 = vmatprep.mubr.bf16.mxu0 %v5055_v43  ;;  %3910 = vmatprep.mubr.bf16.mxu1 %v5055_v43  ;;  %v4350_v43 = vcombine.low %v3356_v63, %v3360_v0  ;;  %v3398_v49 = vrot.slane %v3393_v40, %v3397_v39  ;;  %v3406_v50 = vrot.slane %v3393_v40, %v3405_v42 }
 0x244   : > { %v3402_v51 = vrot.slane %v3393_v40, %v3401_v44  ;;  %v3410_v53 = vrot.slane %v3393_v40, %v3409_v48 }
 0x245   : > { %3840 = vmatpush1.bf16.msra.mxu0 %v4332_v57  ;;  %3881 = vmatpush1.bf16.msra.mxu1 %v4334_v58 }
 0x246   : > { %3841 = vmatprep.subr.bf16.mxu0 %v4341_v59  ;;  %3882 = vmatprep.subr.bf16.mxu1 %v4343_v60  ;;  %v3944_v59 = vsub.s32 %v3941_v52, %v3396_v38 }
 0x249   : > { %3842 = vmatpush1.bf16.msra.mxu0 %v4340_v1  ;;  %3883 = vmatpush1.bf16.msra.mxu1 %v4342_v2 }
 0x24a   : > { %3843 = vmatprep.subr.bf16.mxu0 %v4349_v3  ;;  %3884 = vmatprep.subr.bf16.mxu1 %v4351_v4 }
 0x24d   : > { %3844 = vmatpush1.bf16.msra.mxu0 %v4348_v9  ;;  %3885 = vmatpush1.bf16.msra.mxu1 %v4350_v43  ;;  %v3417_v9 = vsub.s32 5, %v3396_v38  ;;  %v3425_v43 = vsub.s32 7, %v3396_v38 }
 0x24e   : > { %3845 = vmatprep.subr.bf16.mxu0 %v4357_v10  ;;  %3886 = vmatprep.subr.bf16.mxu1 %v4359_v11  ;;  %v3414_v10 = vrot.slane %v3393_v40, %v3413_v7  ;;  %v3422_v11 = vrot.slane %v3393_v40, %v3421_v8 }
 0x24f   : > { %v3418_v12 = vrot.slane %v3393_v40, %v3417_v9  ;;  %v3426_v13 = vrot.slane %v3393_v40, %v3425_v43 }
 0x251   : > { %3846 = vmatpush1.bf16.msra.mxu0 %v4356_v16  ;;  %3887 = vmatpush1.bf16.msra.mxu1 %v4358_v17 }
 0x252   : > { %3847 = vmatprep.subr.bf16.mxu0 %v4365_v18  ;;  %3888 = vmatprep.subr.bf16.mxu1 %v4367_v20 }
 0x255   : > { %3848 = vmatpush1.bf16.msra.mxu0 %v4364_v19  ;;  %3889 = vmatpush1.bf16.msra.mxu1 %v4366_v24 }
 0x256   : > { %3849 = vmatprep.subr.bf16.mxu0 %v4373_v25  ;;  %3890 = vmatprep.subr.bf16.mxu1 %v4375_v26 }
 0x259   : > { %3850 = vmatpush1.bf16.msra.mxu0 %v4372_v31  ;;  %3891 = vmatpush1.bf16.msra.mxu1 %v4374_v32 }
 0x25a   : > { %3851 = vmatprep.subr.bf16.mxu0 %v4381_v33  ;;  %3892 = vmatprep.subr.bf16.mxu1 %v4383_v34 }
 0x25d   : > { %3852 = vmatpush1.bf16.msra.mxu0 %v4380_v35  ;;  %3893 = vmatpush1.bf16.msra.mxu1 %v4382_v36 }
 0x260   : > { %3870 = vmatmul.mubr.bf16.vlgmr.msra.gmra.mrb[4].mxu0 %v6141_v46  ;;  %3911 = vmatmul.mubr.bf16.vlgmr.msra.gmra.mrb[4].mxu1 %v6141_v46 }
 0x313   : > { %v3789_v54 = vpop.f32.mrb[0].mxu0  ;;  %v3830_v55 = vpop.f32.mrb[0].mxu1 }
 0x314   : > { %v3790_v46 = vadd.f32 %v3789_v54, %v3398_v49  ;;  %v3791_v56 = vpop.f32.mrb[1].mxu0  ;;  %v3831_v57 = vadd.f32 %v3830_v55, %v3406_v50  ;;  %v3832_v60 = vpop.f32.mrb[1].mxu1 }
 0x315   : > { %v3792_v58 = vadd.f32 %v3791_v56, %v3402_v51  ;;  %v3793_v61 = vpop.f32.mrb[2].mxu0  ;;  %v3833_v62 = vadd.f32 %v3832_v60, %v3410_v53  ;;  %v3834_v63 = vpop.f32.mrb[2].mxu1 }
 0x316   : > { %v3794_v0 = vpop.f32.mrb[3].mxu0  ;;  %v3835_v2 = vpop.f32.mrb[3].mxu1 }
 0x317   : > { %v4384_v1 = vpack.c.bf16 %v3792_v58, %v3790_v46  ;;  %v4385_v3 = vpack.c.bf16 %v3833_v62, %v3831_v57 }
 0x319   : > { %v3945_v4 = vrot.slane %v4384_v1, %v3944_v59  ;;  %v3952_v5 = vrot.slane %v4385_v3, %v3944_v59 }
 0x31b   : > { %v3967_v6 = vcombine.low %v3945_v4, %v3952_v5 }
 0x31d   : > { %v3975_v30 = vrot.slane %v3967_v6, %v3944_v59 }
 0x333   : > { %v3871_v14 = vpop.f32.mrb[4].mxu0  ;;  %v3912_v16 = vpop.f32.mrb[4].mxu1 }
 0x334   : > { %v3872_v15 = vadd.f32 %v3871_v14, %v3414_v10  ;;  %v3873_v17 = vpop.f32.mrb[5].mxu0  ;;  %v3913_v18 = vadd.f32 %v3912_v16, %v3422_v11  ;;  %v3914_v21 = vpop.f32.mrb[5].mxu1 }
 0x335   : > { %v3874_v20 = vadd.f32 %v3873_v17, %v3418_v12  ;;  %v3875_v22 = vpop.f32.mrb[6].mxu0  ;;  %v3915_v23 = vadd.f32 %v3914_v21, %v3426_v13  ;;  %v3916_v41 = vpop.f32.mrb[6].mxu1 }
 0x336   : > { %v3876_v19 = vpop.f32.mrb[7].mxu0  ;;  %v3917_v25 = vpop.f32.mrb[7].mxu1 }
 0x337   : > { %v4386_v24 = vpack.c.bf16 %v3874_v20, %v3872_v15  ;;  %v4387_v26 = vpack.c.bf16 %v3915_v23, %v3913_v18 }
 0x339   : > { %v3959_v27 = vrot.slane %v4386_v24, %v3944_v59  ;;  %v3966_v28 = vrot.slane %v4387_v26, %v3944_v59 }
 0x33b   : > { %v3968_v29 = vcombine.low %v3959_v27, %v3966_v28 }
 0x33d   : > { %v3982_v31 = vrot.slane %v3968_v29, %v3944_v59 }
 0x33f   : > { %v3983_v32 = vcombine.low %v3975_v30, %v3982_v31 }
 0x341   : > { %3985 = vst [vmem:[%s388_s16] sm:$0xff] %v3983_v32 }
 0x342 PF: > { %p12_p10 = scmp.ge.s32.totalorder %s5104_s22, 6   ;;  %s6201_s18 = smov %s5048_s19 }
 0x343   : > { %s6202_s19 = smov %s5113_s25  ;;  %s6203_s20 = smov %s5104_s22 }
 0x344   :  { %14 = sbr.rel (!%p12_p10) target bundleno = 2 (0x2), region = 105 }

// kernel: lightweight_autoencoder_forward.11
= control target key start
LH: loop header
LB: loop body
LE: loop exit
PB: predicated region body
PF: predicated region fallthrough
CT: control target
= control target key end

     0   :  { %s1313_s12 = smov 0   ;;  %s1487_s0 = inlined_call_operand.vmem [shape: bf16[128,576], index: 0, kind: input, shape index: {}]   ;;  %s1488_s1 = inlined_call_operand.vmem [shape: bf16[576,128], index: 1, kind: input, shape index: {}]   ;;  %s1489_s2 = inlined_call_operand.vmem [shape: f32[128,1], index: 2, kind: input, shape index: {}]   ;;  %s1490_s3 = inlined_call_operand.vmem [shape: bf16[128,128], index: 3, kind: output, shape index: {}]  }
   0x1 LB: > { %s984_s13 = sadd.s32 4294967295, %s1290_s12   ;;  %p988_p0 = scmp.ge.s32.totalorder %s1290_s12, 1  ;;  %s1290_s12 = sphi %s1313_s12, %s13_s12  }
   0x2   : > { %p150_p1 = scmp.lt.s32.totalorder %s1290_s12, 3 }
   0x4   : > { %p151_p2 = pnand %p988_p0, %p150_p1 }
   0x5   : > { %v1220_v0 = vld [vmem:[%s1488_s1 + $0x40] sm:$0xff] (!%p151_p2)   ;;  %v1224_v4 = vld [vmem:[%s1488_s1 + $0x48] sm:$0xff] (!%p151_p2)   ;;  %v1292_v6 = vmov (!%p151_p2), 0   ;;  %v1228_v9 = vld [vmem:[%s1488_s1 + $0x50] sm:$0xff] (!%p151_p2)   ;;  %s989_s19 = sshll.u32 (!%p151_p2), %s984_s13, 3  ;;  %vm660_vm0 = vcmask (!%p151_p2), 523264  }
   0x6   : > { %154 = sbr.rel (%p151_p2) target bundleno = 294 (0x126), region = 32  ;;  %v1221_v1 = vld [vmem:[%s1488_s1 + $0xc0] sm:$0xff] (!%p151_p2)   ;;  %1096 = vmatprep.subr.bf16.mxu0 (!%p151_p2), %v1220_v0  ;;  %v1225_v5 = vld [vmem:[%s1488_s1 + $0xc8] sm:$0xff] (!%p151_p2)   ;;  %1218 = vset.pattern.permute.xlu0 (!%p151_p2), %v1292_v6  ;;  %v1229_v10 = vld [vmem:[%s1488_s1 + $0xd0] sm:$0xff] (!%p151_p2)   ;;  %p181_p3 = scmp.lt.s32.totalorder (!%p151_p2), %s989_s19, 15 }
   0x7   : > { %v1222_v2 = vld [vmem:[%s1488_s1] sm:$0xff] (!%p151_p2)   ;;  %1136 = vmatprep.subr.bf16.mxu1 (!%p151_p2), %v1221_v1  ;;  %v1226_v7 = vld [vmem:[%s1488_s1 + $0x8] sm:$0xff] (!%p151_p2)   ;;  %1219 = vset.pattern.permute.xlu1 (!%p151_p2), %v1292_v6  ;;  %v1230_v11 = vld [vmem:[%s1488_s1 + $0x10] sm:$0xff] (!%p151_p2)  }
   0x8   : > { %v1223_v3 = vld [vmem:[%s1488_s1 + $0x80] sm:$0xff] (!%p151_p2)   ;;  %1097 = vmatpush3.bf16.msra.mxu0 (!%p151_p2), %v1222_v2  ;;  %v1227_v8 = vld [vmem:[%s1488_s1 + $0x88] sm:$0xff] (!%p151_p2)   ;;  %v1231_v12 = vld [vmem:[%s1488_s1 + $0x90] sm:$0xff] (!%p151_p2)  }
   0x9   : > { %1137 = vmatpush3.bf16.msra.mxu1 (!%p151_p2), %v1223_v3  ;;  %1098 = vmatprep.subr.bf16.mxu0 (!%p151_p2), %v1224_v4  ;;  %v1232_v13 = vld [vmem:[%s1488_s1 + $0x58] sm:$0xff] (!%p151_p2)   ;;  %v1236_v17 = vld [vmem:[%s1488_s1 + $0x60] sm:$0xff] (!%p151_p2)   ;;  %v1240_v21 = vld [vmem:[%s1488_s1 + $0x68] sm:$0xff] (!%p151_p2)  }
   0xa   : > { %1138 = vmatprep.subr.bf16.mxu1 (!%p151_p2), %v1225_v5  ;;  %v1233_v14 = vld [vmem:[%s1488_s1 + $0xd8] sm:$0xff] (!%p151_p2)   ;;  %v1237_v18 = vld [vmem:[%s1488_s1 + $0xe0] sm:$0xff] (!%p151_p2)   ;;  %v1241_v22 = vld [vmem:[%s1488_s1 + $0xe8] sm:$0xff] (!%p151_p2)  }
   0xb   : > { %v1234_v15 = vld [vmem:[%s1488_s1 + $0x18] sm:$0xff] (!%p151_p2)   ;;  %v1238_v19 = vld [vmem:[%s1488_s1 + $0x20] sm:$0xff] (!%p151_p2)   ;;  %v1242_v23 = vld [vmem:[%s1488_s1 + $0x28] sm:$0xff] (!%p151_p2)  }
   0xc   : > { %1099 = vmatpush3.bf16.msra.mxu0 (!%p151_p2), %v1226_v7  ;;  %v1235_v16 = vld [vmem:[%s1488_s1 + $0x98] sm:$0xff] (!%p151_p2)   ;;  %v1239_v20 = vld [vmem:[%s1488_s1 + $0xa0] sm:$0xff] (!%p151_p2)   ;;  %v1243_v24 = vld [vmem:[%s1488_s1 + $0xa8] sm:$0xff] (!%p151_p2)  }
   0xd   : > { %1139 = vmatpush3.bf16.msra.mxu1 %v1227_v8  ;;  %1100 = vmatprep.subr.bf16.mxu0 %v1228_v9  ;;  %s1492_s19 = smov (!%p181_p3, %s989_s19), 15  ;;  %v1244_v25 = vld [vmem:[%s1488_s1 + $0x70] sm:$0xff]   ;;  %v1248_v29 = vld [vmem:[%s1488_s1 + $0x78] sm:$0xff]   ;;  %v1258_v37 = vld [vmem:[%s1488_s1 + $0x100] sm:$0xff]  }
   0xe   : > { %1140 = vmatprep.subr.bf16.mxu1 %v1229_v10  ;;  %v1245_v26 = vld [vmem:[%s1488_s1 + $0xf0] sm:$0xff]   ;;  %s1208_s16 = smul.u32 20, %s1492_s19  ;;  %v1249_v30 = vld [vmem:[%s1488_s1 + $0xf8] sm:$0xff]   ;;  %v1265_v40 = vld [vmem:[%s1488_s1 + $0x108] sm:$0xff]   ;;  %s992_s11 = sshll.u32 %s1492_s19, 3 }
   0xf   : > { %v1246_v27 = vld [vmem:[%s1488_s1 + $0x30] sm:$0xff]   ;;  %v1250_v31 = vld [vmem:[%s1488_s1 + $0x38] sm:$0xff]   ;;  %s1454_s18 = scalar_lea.vmem %s1489_s2, %s992_s11  ;;  %s994_s20 = sshll.u32 %s1492_s19, 2 }
  0x10   : > { %1101 = vmatpush3.bf16.msra.mxu0 %v1230_v11  ;;  %v1247_v28 = vld [vmem:[%s1488_s1 + $0xb0] sm:$0xff]   ;;  %s1419_s13 = scalar_lea.vmem %s1487_s0, %s1208_s16  ;;  %v1251_v32 = vld [vmem:[%s1488_s1 + $0xb8] sm:$0xff]   ;;  %v296_v51 = vld [vmem:[%s1454_s18] sm:$0xff]  ;;  %s197_s23 = scalar_lea.vmem %s1490_s3, %s994_s20 }
  0x11   : > { %1141 = vmatpush3.bf16.msra.mxu1 %v1231_v12  ;;  %1102 = vmatprep.subr.bf16.mxu0 %v1232_v13  ;;  %v1252_v33 = vld [vmem:[%s1419_s13] ss:$20 sps:$4 sm:$0xff]   ;;  %v1254_v34 = vld [vmem:[%s1419_s13 + $0x4] ss:$20 sps:$4 sm:$0xff]   ;;  %v1255_v35 = vld [vmem:[%s1419_s13 + $0x8] ss:$20 sps:$4 sm:$0xff]  }
  0x12   : > { %1142 = vmatprep.subr.bf16.mxu1 %v1233_v14  ;;  %v1257_v36 = vld [vmem:[%s1419_s13 + $0xc] ss:$20 sps:$4 sm:$0xff]   ;;  %705 = vmatprep.mubr.bf16.mxu0 %v1254_v34  ;;  %v1261_v39 = vld [vmem:[%s1419_s13 + $0x34] ss:$20 sps:$4 sm:$0xff]   ;;  %v1264_v42 = vld [vmem:[%s1419_s13 + $0x30] ss:$20 sps:$4 sm:$0xff]  }
  0x13   : > { %770 = vmatprep.mubr.bf16.mxu1 %v1257_v36  ;;  %v1259_v38 = vld [vmem:[%s1419_s13 + $0x2c] ss:$20 sps:$4 sm:$0xff]   ;;  %v1263_v41 = vld [vmem:[%s1419_s13 + $0x28] ss:$20 sps:$4 sm:$0xff]   ;;  %v1272_v45 = vld [vmem:[%s1488_s1 + $0x110] sm:$0xff]   ;;  %306 = vperm.xlu0 %1218, %v296_v51  }
  0x14   : > { %1103 = vmatpush3.bf16.msra.mxu0 %v1234_v15  ;;  %v1266_v43 = vld [vmem:[%s1419_s13 + $0x54] ss:$20 sps:$4 sm:$0xff]   ;;  %v1268_v44 = vld [vmem:[%s1419_s13 + $0x5c] ss:$20 sps:$4 sm:$0xff]   ;;  %v1271_v48 = vld [vmem:[%s1419_s13 + $0x58] ss:$20 sps:$4 sm:$0xff]  }
  0x15   : > { %1143 = vmatpush3.bf16.msra.mxu1 %v1235_v16  ;;  %1104 = vmatprep.subr.bf16.mxu0 %v1236_v17  ;;  %v1279_v46 = vld [vmem:[%s1488_s1 + $0x118] sm:$0xff]   ;;  %v1270_v47 = vld [vmem:[%s1419_s13 + $0x50] ss:$20 sps:$4 sm:$0xff]   ;;  %v297_v53 = vld [vmem:[%s1454_s18 + $0x8] sm:$0xff] }
  0x16   : > { %1144 = vmatprep.subr.bf16.mxu1 %v1237_v18  ;;  %v1273_v49 = vld [vmem:[%s1419_s13 + $0x7c] ss:$20 sps:$4 sm:$0xff]   ;;  %v1275_v50 = vld [vmem:[%s1419_s13 + $0x84] ss:$20 sps:$4 sm:$0xff]   ;;  %v1278_v56 = vld [vmem:[%s1419_s13 + $0x80] ss:$20 sps:$4 sm:$0xff]  }
  0x17   : > { %v298_v52 = vld [vmem:[%s1454_s18 + $0x10] sm:$0xff]  ;;  %v299_v54 = vld [vmem:[%s1454_s18 + $0x18] sm:$0xff]  ;;  %311 = vperm.xlu0 %1218, %v297_v53   ;;  %v300_v58 = vld [vmem:[%s1454_s18 + $0x20] sm:$0xff] }
  0x18   : > { %1105 = vmatpush3.bf16.msra.mxu0 %v1238_v19  ;;  %316 = vperm.xlu1 %1219, %v298_v52   ;;  %v1277_v55 = vld [vmem:[%s1419_s13 + $0x78] ss:$20 sps:$4 sm:$0xff]   ;;  %v1280_v57 = vld [vmem:[%s1419_s13 + $0x10] ss:$20 sps:$4 sm:$0xff]   ;;  %v1281_v59 = vld [vmem:[%s1419_s13 + $0x60] ss:$20 sps:$4 sm:$0xff]  }
  0x19   : > { %1145 = vmatpush3.bf16.msra.mxu1 %v1239_v20  ;;  %1106 = vmatprep.subr.bf16.mxu0 %v1240_v21  ;;  %v301_v60 = vld [vmem:[%s1454_s18 + $0x28] sm:$0xff]  ;;  %v302_v61 = vld [vmem:[%s1454_s18 + $0x30] sm:$0xff]  ;;  %v303_v62 = vld [vmem:[%s1454_s18 + $0x38] sm:$0xff] }
  0x1a   : > { %1146 = vmatprep.subr.bf16.mxu1 %v1241_v22  ;;  %v1282_v63 = vld [vmem:[%s1419_s13 + $0x38] ss:$20 sps:$4 sm:$0xff]   ;;  %v1283_v0 = vld [vmem:[%s1419_s13 + $0x88] ss:$20 sps:$4 sm:$0xff]  }
  0x1b   : > { %326 = vperm.xlu0 %1218, %v300_v58  }
  0x1c   : > { %1107 = vmatpush3.bf16.msra.mxu0 %v1242_v23  ;;  %321 = vperm.xlu1 %1219, %v299_v54  }
  0x1d   : > { %1147 = vmatpush3.bf16.msra.mxu1 %v1243_v24  ;;  %1108 = vmatprep.subr.bf16.mxu0 %v1244_v25 }
  0x1e   : > { %1148 = vmatprep.subr.bf16.mxu1 %v1245_v26 }
  0x1f   : > { %336 = vperm.xlu0 %1218, %v302_v61  }
  0x20   : > { %1109 = vmatpush3.bf16.msra.mxu0 %v1246_v27  ;;  %331 = vperm.xlu1 %1219, %v301_v60  }
  0x21   : > { %1149 = vmatpush3.bf16.msra.mxu1 %v1247_v28  ;;  %1110 = vmatprep.subr.bf16.mxu0 %v1248_v29 }
  0x22   : > { %1150 = vmatprep.subr.bf16.mxu1 %v1249_v30 }
  0x24   : > { %1111 = vmatpush3.bf16.msra.mxu0 %v1250_v31  ;;  %341 = vperm.xlu1 %1219, %v303_v62  }
  0x25   : > { %1151 = vmatpush3.bf16.msra.mxu1 %v1251_v32  ;;  %1184 = vmatprep.subr.bf16.mxu0 %v1258_v37 }
  0x26   : > { %1200 = vmatprep.subr.bf16.mxu1 %v1258_v37 }
  0x27   : > { %706 = vmatmul.mubr.bf16.vlgmr.msra.gmra.mrb[0].mxu0 %v1252_v33 }
  0x28   : > { %771 = vmatmul.mubr.bf16.vlgmr.msra.gmra.mrb[0].mxu1 %v1255_v35  ;;  %1185 = vmatpush3.bf16.msra.mxu0 %v1258_v37 }
  0x29   : > { %1204 = vmatpush3.bf16.msra.mxu1 %v1258_v37  ;;  %713 = vmatprep.mubr.bf16.mxu0 %v1259_v38 }
  0x2a   : > { %778 = vmatprep.mubr.bf16.mxu1 %v1261_v39  ;;  %1186 = vmatprep.subr.bf16.mxu0 %v1265_v40 }
  0x2b   : > { %1201 = vmatprep.subr.bf16.mxu1 %v1265_v40 }
  0x2c   : > { %1187 = vmatpush3.bf16.msra.mxu0 %v1265_v40 }
  0x2d   : > { %1205 = vmatpush3.bf16.msra.mxu1 %v1265_v40  ;;  %1188 = vmatprep.subr.bf16.mxu0 %v1272_v45 }
  0x2e   : > { %1202 = vmatprep.subr.bf16.mxu1 %v1272_v45 }
  0x2f   : > { %714 = vmatmul.mubr.bf16.gmra.mrb[4].mxu0 %v1263_v41 }
  0x30   : > { %779 = vmatmul.mubr.bf16.gmra.mrb[4].mxu1 %v1264_v42  ;;  %721 = vmatprep.mubr.bf16.mxu0 %v1266_v43 }
  0x31   : > { %786 = vmatprep.mubr.bf16.mxu1 %v1268_v44  ;;  %1189 = vmatpush3.bf16.msra.mxu0 %v1272_v45 }
  0x32   : > { %1206 = vmatpush3.bf16.msra.mxu1 %v1272_v45  ;;  %1190 = vmatprep.subr.bf16.mxu0 %v1279_v46 }
  0x33   : > { %1203 = vmatprep.subr.bf16.mxu1 %v1279_v46 }
  0x35   : > { %1191 = vmatpush3.bf16.msra.mxu0 %v1279_v46 }
  0x36   : > { %1207 = vmatpush3.bf16.msra.mxu1 %v1279_v46 }
  0x37   : > { %722 = vmatmul.mubr.bf16.gmra.mrb[8].mxu0 %v1270_v47 }
  0x38   : > { %787 = vmatmul.mubr.bf16.gmra.mrb[8].mxu1 %v1271_v48  ;;  %729 = vmatprep.mubr.bf16.mxu0 %v1273_v49 }
  0x39   : > { %794 = vmatprep.mubr.bf16.mxu1 %v1275_v50 }
  0x3f   : > { %730 = vmatmul.mubr.bf16.gmra.mrb[12].mxu0 %v1277_v55 }
  0x40   : > { %795 = vmatmul.mubr.bf16.gmra.mrb[12].mxu1 %v1278_v56  ;;  %1192 = vmatprep.mubr.msk.bf16.mxu0 %vm660_vm0, %v1280_v57 }
  0x41   : > { %1196 = vmatprep.mubr.msk.bf16.mxu1 %vm660_vm0, %v1281_v59 }
  0x47   : > { %1193 = vmatmul.mubr.msk.bf16.vlgmr.msra.gmra.mrb[16].mxu0 %vm660_vm0, %v1282_v63 }
  0x48   : > { %1197 = vmatmul.mubr.msk.bf16.vlgmr.msra.gmra.mrb[16].mxu1 %vm660_vm0, %v1283_v0 }
  0x92   : > { %v307_v1 = vpop.permute.xlu0 %306 }
  0x96   : > { %v312_v3 = vpop.permute.xlu0 %311 }
  0x97   : > { %v317_v18 = vpop.permute.xlu1 %316 }
  0x9a   : > { %v327_v36 = vpop.permute.xlu0 %326 }
  0x9b   : > { %v322_v33 = vpop.permute.xlu1 %321 }
  0x9e   : > { %v337_v54 = vpop.permute.xlu0 %336 }
  0x9f   : > { %v332_v50 = vpop.permute.xlu1 %331 }
  0xfa   : > { %v1112_v2 = vpop.f32.mrb[0].mxu0 }
  0xfb   : > { %v1152_v4 = vpop.f32.mrb[0].mxu1  ;;  %v1113_v5 = vpop.f32.mrb[1].mxu0 }
  0xfc   : > { %v1114_v6 = vadd.f32 %v1113_v5, %v1112_v2  ;;  %v1153_v7 = vpop.f32.mrb[1].mxu1  ;;  %v1115_v8 = vpop.f32.mrb[2].mxu0 }
  0xfd   : > { %v1154_v9 = vadd.f32 %v1153_v7, %v1152_v4  ;;  %v1155_v10 = vpop.f32.mrb[2].mxu1  ;;  %v1116_v11 = vpop.f32.mrb[3].mxu0 }
  0xfe   : > { %v708_v12 = vadd.f32 %v1114_v6, %v307_v1  ;;  %v1117_v13 = vadd.f32 %v1116_v11, %v1115_v8  ;;  %v1156_v14 = vpop.f32.mrb[3].mxu1  ;;  %v342_v4 = vpop.permute.xlu1 %341 }
  0xff   : > { %v1157_v15 = vadd.f32 %v1156_v14, %v1155_v10 }
 0x100   : > { %v711_v16 = vadd.f32 %v1117_v13, %v312_v3  ;;  %v773_v17 = vadd.f32 %v1154_v9, %v708_v12 }
 0x102   : > { %v1118_v19 = vpop.f32.mrb[4].mxu0  ;;  %v1477_v20 = vadd.f32 %v1157_v15, %v711_v16 }
 0x103   : > { %v1158_v21 = vpop.f32.mrb[4].mxu1  ;;  %v1119_v22 = vpop.f32.mrb[5].mxu0 }
 0x104   : > { %v1120_v23 = vadd.f32 %v1119_v22, %v1118_v19  ;;  %v1159_v24 = vpop.f32.mrb[5].mxu1  ;;  %v1121_v25 = vpop.f32.mrb[6].mxu0 }
 0x105   : > { %v1160_v26 = vadd.f32 %v1159_v24, %v1158_v21  ;;  %v1161_v27 = vpop.f32.mrb[6].mxu1  ;;  %v1122_v28 = vpop.f32.mrb[7].mxu0 }
 0x106   : > { %v716_v29 = vadd.f32 %v1120_v23, %v317_v18  ;;  %v1123_v30 = vadd.f32 %v1122_v28, %v1121_v25  ;;  %v1162_v31 = vpop.f32.mrb[7].mxu1 }
 0x107   : > { %v1163_v32 = vadd.f32 %v1162_v31, %v1161_v27 }
 0x108   : > { %v719_v34 = vadd.f32 %v1123_v30, %v322_v33  ;;  %v781_v35 = vadd.f32 %v1160_v26, %v716_v29 }
 0x10a   : > { %v1124_v37 = vpop.f32.mrb[8].mxu0  ;;  %v784_v38 = vadd.f32 %v1163_v32, %v719_v34 }
 0x10b   : > { %v1164_v39 = vpop.f32.mrb[8].mxu1  ;;  %v1125_v40 = vpop.f32.mrb[9].mxu0 }
 0x10c   : > { %v1126_v41 = vadd.f32 %v1125_v40, %v1124_v37  ;;  %v1165_v42 = vpop.f32.mrb[9].mxu1  ;;  %v1127_v43 = vpop.f32.mrb[10].mxu0 }
 0x10d   : > { %v1166_v44 = vadd.f32 %v1165_v42, %v1164_v39  ;;  %v1167_v45 = vpop.f32.mrb[10].mxu1  ;;  %v1128_v46 = vpop.f32.mrb[11].mxu0 }
 0x10e   : > { %v724_v47 = vadd.f32 %v1126_v41, %v327_v36  ;;  %v1129_v48 = vadd.f32 %v1128_v46, %v1127_v43  ;;  %v1168_v49 = vpop.f32.mrb[11].mxu1 }
 0x10f   : > { %v1169_v51 = vadd.f32 %v1168_v49, %v1167_v45 }
 0x110   : > { %v727_v52 = vadd.f32 %v1129_v48, %v332_v50  ;;  %v789_v53 = vadd.f32 %v1166_v44, %v724_v47 }
 0x112   : > { %v1130_v55 = vpop.f32.mrb[12].mxu0  ;;  %v792_v56 = vadd.f32 %v1169_v51, %v727_v52 }
 0x113   : > { %v1170_v57 = vpop.f32.mrb[12].mxu1  ;;  %v1131_v58 = vpop.f32.mrb[13].mxu0 }
 0x114   : > { %v1132_v59 = vadd.f32 %v1131_v58, %v1130_v55  ;;  %v1171_v60 = vpop.f32.mrb[13].mxu1  ;;  %v1133_v61 = vpop.f32.mrb[14].mxu0 }
 0x115   : > { %v1172_v62 = vadd.f32 %v1171_v60, %v1170_v57  ;;  %v1173_v63 = vpop.f32.mrb[14].mxu1  ;;  %v1134_v0 = vpop.f32.mrb[15].mxu0 }
 0x116   : > { %v732_v1 = vadd.f32 %v1132_v59, %v337_v54  ;;  %v1135_v2 = vadd.f32 %v1134_v0, %v1133_v61  ;;  %v1174_v3 = vpop.f32.mrb[15].mxu1 }
 0x117   : > { %v1175_v5 = vadd.f32 %v1174_v3, %v1173_v63 }
 0x118   : > { %v735_v6 = vadd.f32 %v1135_v2, %v342_v4  ;;  %v797_v7 = vadd.f32 %v1172_v62, %v732_v1 }
 0x11a   : > { %v1194_v8 = vpop.f32.mrb[16].mxu0  ;;  %v800_v9 = vadd.f32 %v1175_v5, %v735_v6 }
 0x11b   : > { %v846_v10 = vadd.f32 %v1194_v8, %v781_v35  ;;  %v1198_v11 = vpop.f32.mrb[16].mxu1  ;;  %v837_v12 = vpop.f32.mrb[17].mxu0 }
 0x11c   : > { %v862_v13 = vadd.f32 %v1198_v11, %v797_v7  ;;  %v838_v14 = vadd.f32 %v837_v12, %v773_v17  ;;  %v853_v15 = vpop.f32.mrb[17].mxu1  ;;  %v1195_v16 = vpop.f32.mrb[18].mxu0 }
 0x11d   : > { %v854_v18 = vadd.f32 %v853_v15, %v789_v53  ;;  %v849_v19 = vadd.f32 %v1195_v16, %v784_v38  ;;  %v1199_v21 = vpop.f32.mrb[18].mxu1  ;;  %v840_v22 = vpop.f32.mrb[19].mxu0  ;;  %v870_v26 = vmax.f32 %v846_v10, 0.0 }
 0x11e   : > { %v865_v23 = vadd.f32 %v1199_v21, %v800_v9  ;;  %v841_v24 = vadd.f32 %v840_v22, %v1477_v20  ;;  %v856_v25 = vpop.f32.mrb[19].mxu1  ;;  %v874_v29 = vmax.f32 %v862_v13, 0.0  ;;  %v868_v30 = vmax.f32 %v838_v14, 0.0 }
 0x11f   : > { %v871_v27 = vmax.f32 %v849_v19, 0.0  ;;  %v857_v28 = vadd.f32 %v856_v25, %v792_v56  ;;  %v872_v32 = vmax.f32 %v854_v18, 0.0 }
 0x120   : > { %v875_v17 = vmax.f32 %v865_v23, 0.0  ;;  %v869_v31 = vmax.f32 %v841_v24, 0.0 }
 0x121   : > { %v1081_v33 = vpack.c.bf16 %v871_v27, %v870_v26  ;;  %v873_v34 = vmax.f32 %v857_v28, 0.0 }
 0x122   : > { %v1091_v35 = vpack.c.bf16 %v875_v17, %v874_v29  ;;  %v1076_v36 = vpack.c.bf16 %v869_v31, %v868_v30 }
 0x123   : > { %1093 = vst [vmem:[%s197_s23 + $0x8] sm:$0xff] %v1081_v33   ;;  %v1086_v37 = vpack.c.bf16 %v873_v34, %v872_v32 }
 0x124   : > { %1095 = vst [vmem:[%s197_s23 + $0x18] sm:$0xff] %v1091_v35   ;;  %1077 = vst [vmem:[%s197_s23] sm:$0xff] %v1076_v36  }
 0x125   : > { %1094 = vst [vmem:[%s197_s23 + $0x10] sm:$0xff] %v1086_v37  }
 0x126 PF: > { %s13_s12 = sadd.s32 1, %s1290_s12  }
 0x127   : > { %p10_p4 = scmp.ge.s32.totalorder %s13_s12, 4  }
 0x129   :  { %12 = sbr.rel (!%p10_p4) target bundleno = 1 (0x1), region = 65 }

// kernel: lightweight_autoencoder_forward.12
= control target key start
LH: loop header
LB: loop body
LE: loop exit
PB: predicated region body
PF: predicated region fallthrough
CT: control target
= control target key end

     0   :  { %s1299_s12 = smov 0   ;;  %s1301_s13 = smov 0   ;;  %s1586_s0 = inlined_call_operand.vmem [shape: bf16[64,288], index: 0, kind: input, shape index: {}]   ;;  %s1587_s1 = inlined_call_operand.vmem [shape: bf16[288,512], index: 1, kind: input, shape index: {}]   ;;  %s1588_s2 = inlined_call_operand.vmem [shape: f32[64,1], index: 2, kind: input, shape index: {}]   ;;  %s1589_s3 = inlined_call_operand.vmem [shape: bf16[64,512], index: 3, kind: output, shape index: {}]  }
   0x1   :  { %s1303_s14 = smov 0  }
   0x2 LB: > { %s1040_s15 = sadd.s32 4294967295, %s1276_s14   ;;  %s1316_s16 = sadd.s32 1, %s1276_s14   ;;  %s1276_s14 = sphi %s1303_s14, %s1593_s14   ;;  %s1272_s13 = sphi %s1301_s13, %s1592_s13   ;;  %s1268_s12 = sphi %s1299_s12, %s1591_s12  }
   0x3   : > { %s38_s17 = ssub.s32 %s1276_s14, %s1316_s16  ;;  %s41_s18 = sadd.s32 1, %s1272_s13 }
   0x4   : > { %p39_p0 = scmp.eq.s32.totalorder %s38_s17, 0  ;;  %p48_p1 = scmp.ne.s32.totalorder %s1272_s13, %s1268_s12 }
   0x5   : > { %p49_p2 = scmp.eq.s32.totalorder %s1276_s14, 0  ;;  %p99_p3 = scmp.eq.s32.totalorder %s1040_s15, 1 }
   0x6   : > { %s1327_s19 = scalar_select %p39_p0, %s1272_s13, %s41_s18  }
   0x7   : > { %p50_p4 = por %p49_p2, %p48_p1  ;;  %p1329_p5 = por %p99_p3, %p48_p1 }
   0x8   : > { %p1043_p6 = scmp.ge.s32.totalorder %s1276_s14, 2 }
   0xa   : > { %127 = sbr.rel (%p1043_p6) target bundleno = 39 (0x27), region = 24 }
  0x11   : > { %130 = sbr.rel (!%p50_p4) target bundleno = 39 (0x27), region = 28  ;;  %s132_s21 = sand.u32 (%p50_p4), 1, %s1272_s13  }
  0x12   : > { %s1113_s22 = sshll.u32 (%p50_p4), %s1276_s14, 3  ;;  %s1155_s23 = smul.u32 (%p50_p4), 288, %s132_s21 }
  0x13   : > { %s1339_s26 = scalar_lea.vmem (%p50_p4), %s1587_s1, %s1113_s22 }
  0x14   : > { %v235_v0 = vld [vmem:[%s1339_s26] sm:$0xff] (%p50_p4)  ;;  %v237_v1 = vld [vmem:[%s1339_s26 + $0x10] sm:$0xff] (%p50_p4)  ;;  %s1347_s27 = scalar_lea.vmem (%p50_p4), [#allocation2], %s1155_s23 }
  0x15   : > { %v239_v2 = vld [vmem:[%s1339_s26 + $0x20] sm:$0xff] (%p50_p4)  ;;  %v241_v3 = vld [vmem:[%s1339_s26 + $0x30] sm:$0xff] (%p50_p4)  ;;  %236 = vst [vmem:[%s1347_s27] sm:$0xff] (%p50_p4), %v235_v0  ;;  %238 = vst [vmem:[%s1347_s27 + $0x8] sm:$0xff] (%p50_p4), %v237_v1 }
  0x16   : > { %v243_v4 = vld [vmem:[%s1339_s26 + $0x40] sm:$0xff] (%p50_p4)  ;;  %v245_v5 = vld [vmem:[%s1339_s26 + $0x50] sm:$0xff] (%p50_p4)  ;;  %240 = vst [vmem:[%s1347_s27 + $0x10] sm:$0xff] (%p50_p4), %v239_v2  ;;  %242 = vst [vmem:[%s1347_s27 + $0x18] sm:$0xff] (%p50_p4), %v241_v3 }
  0x17   : > { %244 = vst [vmem:[%s1347_s27 + $0x20] sm:$0xff] (%p50_p4), %v243_v4  ;;  %246 = vst [vmem:[%s1347_s27 + $0x28] sm:$0xff] (%p50_p4), %v245_v5  ;;  %v247_v6 = vld [vmem:[%s1339_s26 + $0x60] sm:$0xff] (%p50_p4)  ;;  %v249_v7 = vld [vmem:[%s1339_s26 + $0x70] sm:$0xff] (%p50_p4) }
  0x18   : > { %v251_v8 = vld [vmem:[%s1339_s26 + $0x80] sm:$0xff]  ;;  %248 = vst [vmem:[%s1347_s27 + $0x30] sm:$0xff] %v247_v6  ;;  %250 = vst [vmem:[%s1347_s27 + $0x38] sm:$0xff] %v249_v7  ;;  %v253_v9 = vld [vmem:[%s1339_s26 + $0x90] sm:$0xff] }
  0x19   : > { %252 = vst [vmem:[%s1347_s27 + $0x40] sm:$0xff] %v251_v8  ;;  %v255_v10 = vld [vmem:[%s1339_s26 + $0xa0] sm:$0xff]  ;;  %v257_v11 = vld [vmem:[%s1339_s26 + $0xb0] sm:$0xff]  ;;  %254 = vst [vmem:[%s1347_s27 + $0x48] sm:$0xff] %v253_v9 }
  0x1a   : > { %256 = vst [vmem:[%s1347_s27 + $0x50] sm:$0xff] %v255_v10  ;;  %258 = vst [vmem:[%s1347_s27 + $0x58] sm:$0xff] %v257_v11  ;;  %v259_v12 = vld [vmem:[%s1339_s26 + $0xc0] sm:$0xff]  ;;  %v261_v13 = vld [vmem:[%s1339_s26 + $0xd0] sm:$0xff] }
  0x1b   : > { %v263_v14 = vld [vmem:[%s1339_s26 + $0xe0] sm:$0xff]  ;;  %260 = vst [vmem:[%s1347_s27 + $0x60] sm:$0xff] %v259_v12  ;;  %262 = vst [vmem:[%s1347_s27 + $0x68] sm:$0xff] %v261_v13  ;;  %v265_v15 = vld [vmem:[%s1339_s26 + $0xf0] sm:$0xff] }
  0x1c   : > { %264 = vst [vmem:[%s1347_s27 + $0x70] sm:$0xff] %v263_v14  ;;  %v267_v16 = vld [vmem:[%s1339_s26 + $0x100] sm:$0xff]  ;;  %v269_v17 = vld [vmem:[%s1339_s26 + $0x110] sm:$0xff]  ;;  %266 = vst [vmem:[%s1347_s27 + $0x78] sm:$0xff] %v265_v15 }
  0x1d   : > { %268 = vst [vmem:[%s1347_s27 + $0x80] sm:$0xff] %v267_v16  ;;  %270 = vst [vmem:[%s1347_s27 + $0x88] sm:$0xff] %v269_v17  ;;  %v271_v18 = vld [vmem:[%s1339_s26 + $0x120] sm:$0xff]  ;;  %v273_v19 = vld [vmem:[%s1339_s26 + $0x130] sm:$0xff] }
  0x1e   : > { %v275_v20 = vld [vmem:[%s1339_s26 + $0x140] sm:$0xff]  ;;  %272 = vst [vmem:[%s1347_s27 + $0x90] sm:$0xff] %v271_v18  ;;  %274 = vst [vmem:[%s1347_s27 + $0x98] sm:$0xff] %v273_v19  ;;  %v277_v21 = vld [vmem:[%s1339_s26 + $0x150] sm:$0xff] }
  0x1f   : > { %276 = vst [vmem:[%s1347_s27 + $0xa0] sm:$0xff] %v275_v20  ;;  %v279_v22 = vld [vmem:[%s1339_s26 + $0x160] sm:$0xff]  ;;  %v281_v23 = vld [vmem:[%s1339_s26 + $0x170] sm:$0xff]  ;;  %278 = vst [vmem:[%s1347_s27 + $0xa8] sm:$0xff] %v277_v21 }
  0x20   : > { %280 = vst [vmem:[%s1347_s27 + $0xb0] sm:$0xff] %v279_v22  ;;  %282 = vst [vmem:[%s1347_s27 + $0xb8] sm:$0xff] %v281_v23  ;;  %v283_v24 = vld [vmem:[%s1339_s26 + $0x180] sm:$0xff]  ;;  %v285_v25 = vld [vmem:[%s1339_s26 + $0x190] sm:$0xff] }
  0x21   : > { %v287_v26 = vld [vmem:[%s1339_s26 + $0x1a0] sm:$0xff]  ;;  %284 = vst [vmem:[%s1347_s27 + $0xc0] sm:$0xff] %v283_v24  ;;  %286 = vst [vmem:[%s1347_s27 + $0xc8] sm:$0xff] %v285_v25  ;;  %v289_v27 = vld [vmem:[%s1339_s26 + $0x1b0] sm:$0xff] }
  0x22   : > { %288 = vst [vmem:[%s1347_s27 + $0xd0] sm:$0xff] %v287_v26  ;;  %v291_v28 = vld [vmem:[%s1339_s26 + $0x1c0] sm:$0xff]  ;;  %v293_v29 = vld [vmem:[%s1339_s26 + $0x1d0] sm:$0xff]  ;;  %290 = vst [vmem:[%s1347_s27 + $0xd8] sm:$0xff] %v289_v27 }
  0x23   : > { %292 = vst [vmem:[%s1347_s27 + $0xe0] sm:$0xff] %v291_v28  ;;  %294 = vst [vmem:[%s1347_s27 + $0xe8] sm:$0xff] %v293_v29  ;;  %v295_v30 = vld [vmem:[%s1339_s26 + $0x1e0] sm:$0xff]  ;;  %v297_v31 = vld [vmem:[%s1339_s26 + $0x1f0] sm:$0xff] }
  0x24   : > { %v299_v32 = vld [vmem:[%s1339_s26 + $0x200] sm:$0xff]  ;;  %296 = vst [vmem:[%s1347_s27 + $0xf0] sm:$0xff] %v295_v30  ;;  %298 = vst [vmem:[%s1347_s27 + $0xf8] sm:$0xff] %v297_v31  ;;  %v301_v33 = vld [vmem:[%s1339_s26 + $0x210] sm:$0xff] }
  0x25   : > { %300 = vst [vmem:[%s1347_s27 + $0x100] sm:$0xff] %v299_v32  ;;  %v303_v34 = vld [vmem:[%s1339_s26 + $0x220] sm:$0xff]  ;;  %v305_v35 = vld [vmem:[%s1339_s26 + $0x230] sm:$0xff]  ;;  %302 = vst [vmem:[%s1347_s27 + $0x108] sm:$0xff] %v301_v33 }
  0x26   : > { %304 = vst [vmem:[%s1347_s27 + $0x110] sm:$0xff] %v303_v34  ;;  %306 = vst [vmem:[%s1347_s27 + $0x118] sm:$0xff] %v305_v35 }
  0x27 PF: > { %p1046_p7 = scmp.ge.s32.totalorder %s1276_s14, 1  ;;  %p311_p8 = scmp.lt.s32.totalorder %s1276_s14, 3 }
  0x29   : > { %p312_p9 = pnand %p1046_p7, %p311_p8 }
  0x2a   : > { %s318_s28 = sand.u32 (!%p312_p9), 1, %s1268_s12   ;;  %v1278_v36 = vmov (!%p312_p9), 0   ;;  %v1240_v37 = vld [vmem:[%s1586_s0 + $0x4] ss:$12 sps:$4 sm:$0xff] (!%p312_p9)   ;;  %v1241_v57 = vld [vmem:[%s1586_s0 + $0x8] ss:$12 sps:$4 sm:$0xff] (!%p312_p9)  }
  0x2b   : > { %315 = sbr.rel (%p312_p9) target bundleno = 368 (0x170), region = 66  ;;  %801 = vmatprep.mubr.bf16.mxu0 (!%p312_p9), %v1278_v36  ;;  %1182 = vset.pattern.permute.xlu0 (!%p312_p9), %v1278_v36  ;;  %vm683_vm0 = vcmask (!%p312_p9), 261120   ;;  %v395_v60 = vld [vmem:[%s1588_s2] sm:$0xff] (!%p312_p9)  ;;  %v397_v61 = vld [vmem:[%s1588_s2 + $0x10] sm:$0xff] (!%p312_p9)  ;;  %v396_v63 = vld [vmem:[%s1588_s2 + $0x8] sm:$0xff] (!%p312_p9)  ;;  %s1047_s7 = sshll.u32 (!%p312_p9), %s318_s28, 6 }
  0x2c   : > { %s1156_s29 = smul.u32 (!%p312_p9), 288, %s318_s28  ;;  %1183 = vset.pattern.permute.xlu1 (!%p312_p9), %v1278_v36  ;;  %728 = vmatprep.mubr.bf16.mxu1 (!%p312_p9), %v1240_v37  ;;  %v398_v1 = vld [vmem:[%s1588_s2 + $0x18] sm:$0xff] (!%p312_p9)  ;;  %v1244_v2 = vld [vmem:[%s1586_s0 + $0x20] ss:$12 sps:$4 sm:$0xff] (!%p312_p9)   ;;  %v401_v8 = vld [vmem:[%s1588_s2 + $0x30] sm:$0xff] (!%p312_p9)  ;;  %s1544_s8 = scalar_lea.vmem (!%p312_p9), [#allocation3], %s1047_s7 }
  0x2d   : > { %405 = vperm.xlu0 (!%p312_p9), %1182, %v395_v60   ;;  %415 = vperm.xlu1 (!%p312_p9), %1183, %v397_v61   ;;  %v399_v4 = vld [vmem:[%s1588_s2 + $0x20] sm:$0xff] (!%p312_p9)  ;;  %v400_v6 = vld [vmem:[%s1588_s2 + $0x28] sm:$0xff] (!%p312_p9)  ;;  %v402_v10 = vld [vmem:[%s1588_s2 + $0x38] sm:$0xff] (!%p312_p9) }
  0x2e   : > { %s1426_s5 = scalar_lea.vmem (!%p312_p9), [#allocation2], %s1156_s29  ;;  %v1248_v11 = vld [vmem:[%s1586_s0 + $0x38] ss:$12 sps:$4 sm:$0xff] (!%p312_p9)   ;;  %v1252_v16 = vld [vmem:[%s1586_s0 + $0x50] ss:$12 sps:$4 sm:$0xff] (!%p312_p9)  }
  0x2f   : > { %v1184_v38 = vld [vmem:[%s1426_s5 + $0x4] ss:$8 sps:$4 sm:$0xff] (!%p312_p9)   ;;  %v1186_v39 = vld [vmem:[%s1426_s5] ss:$8 sps:$4 sm:$0xff] (!%p312_p9)   ;;  %v1187_v40 = vld [vmem:[%s1426_s5 + $0x14] ss:$8 sps:$4 sm:$0xff] (!%p312_p9)  }
  0x30   : > { %696 = vmatprep.subr.bf16.mxu1 (!%p312_p9), %v1184_v38  ;;  %v1189_v41 = vld [vmem:[%s1426_s5 + $0x10] ss:$8 sps:$4 sm:$0xff] (!%p312_p9)   ;;  %v1190_v42 = vld [vmem:[%s1426_s5 + $0x24] ss:$8 sps:$4 sm:$0xff] (!%p312_p9)   ;;  %v1192_v43 = vld [vmem:[%s1426_s5 + $0x20] ss:$8 sps:$4 sm:$0xff] (!%p312_p9)  }
  0x31   : > { %697 = vmatpush1.bf16.msra.mxu1 (!%p312_p9), %v1186_v39  ;;  %v1193_v44 = vld [vmem:[%s1426_s5 + $0x34] ss:$8 sps:$4 sm:$0xff] (!%p312_p9)   ;;  %v1195_v45 = vld [vmem:[%s1426_s5 + $0x30] ss:$8 sps:$4 sm:$0xff] (!%p312_p9)   ;;  %v1196_v46 = vld [vmem:[%s1426_s5 + $0x44] ss:$8 sps:$4 sm:$0xff] (!%p312_p9)   ;;  %410 = vperm.xlu0 (!%p312_p9), %1182, %v396_v63  }
  0x32   : > { %698 = vmatprep.subr.bf16.mxu1 %v1187_v40  ;;  %v1198_v47 = vld [vmem:[%s1426_s5 + $0x40] ss:$8 sps:$4 sm:$0xff]   ;;  %v1199_v48 = vld [vmem:[%s1426_s5 + $0x54] ss:$8 sps:$4 sm:$0xff]   ;;  %v1201_v49 = vld [vmem:[%s1426_s5 + $0x50] ss:$8 sps:$4 sm:$0xff]   ;;  %420 = vperm.xlu1 %1183, %v398_v1  }
  0x33   : > { %v1226_v50 = vld [vmem:[%s1426_s5 + $0x104] ss:$8 sps:$4 sm:$0xff]   ;;  %v1230_v52 = vld [vmem:[%s1426_s5 + $0x100] ss:$8 sps:$4 sm:$0xff]   ;;  %v1232_v53 = vld [vmem:[%s1426_s5 + $0x114] ss:$8 sps:$4 sm:$0xff]  }
  0x34   : > { %v1202_v51 = vld [vmem:[%s1426_s5 + $0x64] ss:$8 sps:$4 sm:$0xff]   ;;  %769 = vmatprep.subr.bf16.mxu0 %v1226_v50  ;;  %v1204_v54 = vld [vmem:[%s1426_s5 + $0x60] ss:$8 sps:$4 sm:$0xff]   ;;  %v1236_v55 = vld [vmem:[%s1426_s5 + $0x110] ss:$8 sps:$4 sm:$0xff]  }
  0x35   : > { %699 = vmatpush1.bf16.msra.mxu1 %v1189_v41  ;;  %770 = vmatpush1.bf16.msra.mxu0 %v1230_v52  ;;  %v1205_v56 = vld [vmem:[%s1426_s5 + $0x74] ss:$8 sps:$4 sm:$0xff]   ;;  %v1207_v58 = vld [vmem:[%s1426_s5 + $0x70] ss:$8 sps:$4 sm:$0xff]   ;;  %v1208_v59 = vld [vmem:[%s1426_s5 + $0x84] ss:$8 sps:$4 sm:$0xff]  }
  0x36   : > { %700 = vmatprep.subr.bf16.mxu1 %v1190_v42  ;;  %771 = vmatprep.subr.bf16.mxu0 %v1232_v53  ;;  %v1210_v62 = vld [vmem:[%s1426_s5 + $0x80] ss:$8 sps:$4 sm:$0xff]   ;;  %v1211_v0 = vld [vmem:[%s1426_s5 + $0x94] ss:$8 sps:$4 sm:$0xff]   ;;  %v1213_v3 = vld [vmem:[%s1426_s5 + $0x90] ss:$8 sps:$4 sm:$0xff]  }
  0x37   : > { %v1214_v5 = vld [vmem:[%s1426_s5 + $0xa4] ss:$8 sps:$4 sm:$0xff]   ;;  %425 = vperm.xlu0 %1182, %v399_v4   ;;  %v1216_v7 = vld [vmem:[%s1426_s5 + $0xa0] ss:$8 sps:$4 sm:$0xff]   ;;  %430 = vperm.xlu1 %1183, %v400_v6   ;;  %v1217_v9 = vld [vmem:[%s1426_s5 + $0xb4] ss:$8 sps:$4 sm:$0xff]  }
  0x38   : > { %v1219_v12 = vld [vmem:[%s1426_s5 + $0xb0] ss:$8 sps:$4 sm:$0xff]   ;;  %v1220_v13 = vld [vmem:[%s1426_s5 + $0xc4] ss:$8 sps:$4 sm:$0xff]   ;;  %v1222_v14 = vld [vmem:[%s1426_s5 + $0xc0] ss:$8 sps:$4 sm:$0xff]  }
  0x39   : > { %701 = vmatpush1.bf16.msra.mxu1 %v1192_v43  ;;  %772 = vmatpush1.bf16.msra.mxu0 %v1236_v55  ;;  %v1223_v15 = vld [vmem:[%s1426_s5 + $0xd4] ss:$8 sps:$4 sm:$0xff]   ;;  %v1225_v17 = vld [vmem:[%s1426_s5 + $0xd0] ss:$8 sps:$4 sm:$0xff]   ;;  %v1228_v18 = vld [vmem:[%s1426_s5 + $0xe4] ss:$8 sps:$4 sm:$0xff]  }
  0x3a   : > { %702 = vmatprep.subr.bf16.mxu1 %v1193_v44  ;;  %v1231_v19 = vld [vmem:[%s1426_s5 + $0xe0] ss:$8 sps:$4 sm:$0xff]   ;;  %v1234_v20 = vld [vmem:[%s1426_s5 + $0xf4] ss:$8 sps:$4 sm:$0xff]   ;;  %v1237_v21 = vld [vmem:[%s1426_s5 + $0xf0] ss:$8 sps:$4 sm:$0xff]  }
  0x3b   : > { %435 = vperm.xlu0 %1182, %v401_v8   ;;  %440 = vperm.xlu1 %1183, %v402_v10   ;;  %v1238_v22 = vld [vmem:[%s1586_s0] ss:$12 sps:$4 sm:$0xff]   ;;  %v1242_v23 = vld [vmem:[%s1586_s0 + $0x1c] ss:$12 sps:$4 sm:$0xff]   ;;  %v1245_v24 = vld [vmem:[%s1586_s0 + $0x18] ss:$12 sps:$4 sm:$0xff]  }
  0x3c   : > { %1096 = vmatmul.mubr.msk.bf16.vlgmr.msra.gmra.mrb[0].mxu0 %vm683_vm0, %v1241_v57  ;;  %v1246_v25 = vld [vmem:[%s1586_s0 + $0x34] ss:$12 sps:$4 sm:$0xff]   ;;  %v1249_v26 = vld [vmem:[%s1586_s0 + $0x30] ss:$12 sps:$4 sm:$0xff]   ;;  %v1250_v27 = vld [vmem:[%s1586_s0 + $0x4c] ss:$12 sps:$4 sm:$0xff]  }
  0x3d   : > { %703 = vmatpush1.bf16.msra.mxu1 %v1195_v45  ;;  %811 = vmatprep.mubr.bf16.mxu0 %v1278_v36  ;;  %v1253_v28 = vld [vmem:[%s1586_s0 + $0x48] ss:$12 sps:$4 sm:$0xff]   ;;  %s1122_s12 = sshll.u32 (%p1329_p5), %s1040_s15, 3 }
  0x3e   : > { %704 = vmatprep.subr.bf16.mxu1 %v1196_v46  ;;  %s923_s10 = scalar_lea.vmem (%p1329_p5), %s1589_s3, %s1122_s12 }
  0x41   : > { %705 = vmatpush1.bf16.msra.mxu1 %v1198_v47 }
  0x42   : > { %706 = vmatprep.subr.bf16.mxu1 %v1199_v48 }
  0x44   : > { %1097 = vmatmul.mubr.msk.bf16.gmra.mrb[4].mxu0 %vm683_vm0, %v1244_v2 }
  0x45   : > { %707 = vmatpush1.bf16.msra.mxu1 %v1201_v49  ;;  %821 = vmatprep.mubr.bf16.mxu0 %v1278_v36 }
  0x46   : > { %708 = vmatprep.subr.bf16.mxu1 %v1202_v51 }
  0x49   : > { %709 = vmatpush1.bf16.msra.mxu1 %v1204_v54 }
  0x4a   : > { %710 = vmatprep.subr.bf16.mxu1 %v1205_v56 }
  0x4c   : > { %1098 = vmatmul.mubr.msk.bf16.gmra.mrb[8].mxu0 %vm683_vm0, %v1248_v11 }
  0x4d   : > { %711 = vmatpush1.bf16.msra.mxu1 %v1207_v58  ;;  %831 = vmatprep.mubr.bf16.mxu0 %v1278_v36 }
  0x4e   : > { %712 = vmatprep.subr.bf16.mxu1 %v1208_v59 }
  0x51   : > { %713 = vmatpush1.bf16.msra.mxu1 %v1210_v62 }
  0x52   : > { %714 = vmatprep.subr.bf16.mxu1 %v1211_v0 }
  0x54   : > { %1099 = vmatmul.mubr.msk.bf16.gmra.mrb[12].mxu0 %vm683_vm0, %v1252_v16 }
  0x55   : > { %715 = vmatpush1.bf16.msra.mxu1 %v1213_v3 }
  0x56   : > { %716 = vmatprep.subr.bf16.mxu1 %v1214_v5 }
  0x59   : > { %717 = vmatpush1.bf16.msra.mxu1 %v1216_v7 }
  0x5a   : > { %718 = vmatprep.subr.bf16.mxu1 %v1217_v9 }
  0x5d   : > { %719 = vmatpush1.bf16.msra.mxu1 %v1219_v12 }
  0x5e   : > { %720 = vmatprep.subr.bf16.mxu1 %v1220_v13 }
  0x61   : > { %721 = vmatpush1.bf16.msra.mxu1 %v1222_v14 }
  0x62   : > { %722 = vmatprep.subr.bf16.mxu1 %v1223_v15 }
  0x65   : > { %723 = vmatpush1.bf16.msra.mxu1 %v1225_v17 }
  0x66   : > { %724 = vmatprep.subr.bf16.mxu1 %v1228_v18 }
  0x69   : > { %725 = vmatpush1.bf16.msra.mxu1 %v1231_v19 }
  0x6a   : > { %726 = vmatprep.subr.bf16.mxu1 %v1234_v20 }
  0x6d   : > { %727 = vmatpush1.bf16.msra.mxu1 %v1237_v21 }
  0x70   : > { %729 = vmatmul.mubr.bf16.vlgmr.msra.gmra.mrb[0].mxu1 %v1238_v22 }
  0x71   : > { %738 = vmatprep.mubr.bf16.mxu1 %v1242_v23 }
  0x78   : > { %739 = vmatmul.mubr.bf16.gmra.mrb[4].mxu1 %v1245_v24 }
  0x79   : > { %748 = vmatprep.mubr.bf16.mxu1 %v1246_v25 }
  0x80   : > { %749 = vmatmul.mubr.bf16.gmra.mrb[8].mxu1 %v1249_v26 }
  0x81   : > { %758 = vmatprep.mubr.bf16.mxu1 %v1250_v27 }
  0x88   : > { %759 = vmatmul.mubr.bf16.gmra.mrb[12].mxu1 %v1253_v28 }
  0xac   : > { %v406_v45 = vpop.permute.xlu0 %405  ;;  %v416_v56 = vpop.permute.xlu1 %415 }
  0xb0   : > { %v411_v47 = vpop.permute.xlu0 %410 }
  0xb1   : > { %v421_v5 = vpop.permute.xlu1 %420 }
  0xb6   : > { %v426_v19 = vpop.permute.xlu0 %425  ;;  %v431_v24 = vpop.permute.xlu1 %430 }
 0x10f   : > { %v803_v29 = vpop.f32.mrb[0].mxu0 }
 0x110   : > { %v805_v30 = vpop.f32.mrb[1].mxu0 }
 0x111   : > { %v807_v31 = vpop.f32.mrb[2].mxu0 }
 0x112   : > { %v809_v32 = vpop.f32.mrb[3].mxu0 }
 0x117   : > { %v813_v33 = vpop.f32.mrb[4].mxu0 }
 0x118   : > { %v815_v34 = vpop.f32.mrb[5].mxu0 }
 0x119   : > { %v817_v35 = vpop.f32.mrb[6].mxu0 }
 0x11a   : > { %v819_v36 = vpop.f32.mrb[7].mxu0 }
 0x11f   : > { %v823_v37 = vpop.f32.mrb[8].mxu0 }
 0x120   : > { %v1528_v38 = vpop.f32.mrb[9].mxu0 }
 0x121   : > { %v1530_v39 = vpop.f32.mrb[10].mxu0 }
 0x122   : > { %v1532_v40 = vpop.f32.mrb[11].mxu0 }
 0x127   : > { %v1534_v41 = vpop.f32.mrb[12].mxu0 }
 0x128   : > { %v1536_v42 = vpop.f32.mrb[13].mxu0 }
 0x129   : > { %v1538_v43 = vpop.f32.mrb[14].mxu0 }
 0x12a   : > { %v1540_v44 = vpop.f32.mrb[15].mxu0 }
 0x143   : > { %v730_v46 = vpop.f32.mrb[0].mxu1 }
 0x144   : > { %v731_v48 = vadd.f32 %v730_v46, %v406_v45  ;;  %v732_v49 = vpop.f32.mrb[1].mxu1  ;;  %v436_v46 = vpop.permute.xlu0 %435 }
 0x145   : > { %v733_v50 = vadd.f32 %v732_v49, %v406_v45  ;;  %v734_v51 = vpop.f32.mrb[2].mxu1 }
 0x146   : > { %v804_v52 = vadd.f32 %v803_v29, %v731_v48  ;;  %v735_v53 = vadd.f32 %v734_v51, %v411_v47  ;;  %v736_v54 = vpop.f32.mrb[3].mxu1  ;;  %v441_v51 = vpop.permute.xlu1 %440 }
 0x147   : > { %v806_v55 = vadd.f32 %v805_v30, %v733_v50  ;;  %v737_v57 = vadd.f32 %v736_v54, %v411_v47 }
 0x148   : > { %v842_v58 = vmax.f32 %v804_v52, 0.0  ;;  %v808_v59 = vadd.f32 %v807_v31, %v735_v53 }
 0x149   : > { %v843_v60 = vmax.f32 %v806_v55, 0.0  ;;  %v810_v61 = vadd.f32 %v809_v32, %v737_v57 }
 0x14a   : > { %v844_v62 = vmax.f32 %v808_v59, 0.0 }
 0x14b   : > { %v1114_v63 = vpack.c.bf16 %v843_v60, %v842_v58  ;;  %v845_v0 = vmax.f32 %v810_v61, 0.0  ;;  %v740_v1 = vpop.f32.mrb[4].mxu1 }
 0x14c   : > { %v741_v2 = vadd.f32 %v740_v1, %v416_v56  ;;  %v742_v3 = vpop.f32.mrb[5].mxu1 }
 0x14d   : > { %906 = vst [vmem:[%s1544_s8] sm:$0xff] %v1114_v63  ;;  %v1115_v4 = vpack.c.bf16 %v845_v0, %v844_v62  ;;  %v743_v6 = vadd.f32 %v742_v3, %v416_v56  ;;  %v744_v7 = vpop.f32.mrb[6].mxu1 }
 0x14e   : > { %v814_v8 = vadd.f32 %v813_v33, %v741_v2  ;;  %v745_v9 = vadd.f32 %v744_v7, %v421_v5  ;;  %v746_v10 = vpop.f32.mrb[7].mxu1 }
 0x14f   : > { %907 = vst [vmem:[%s1544_s8 + $0x8] sm:$0xff] %v1115_v4  ;;  %v816_v11 = vadd.f32 %v815_v34, %v743_v6  ;;  %v747_v12 = vadd.f32 %v746_v10, %v421_v5 }
 0x150   : > { %v846_v13 = vmax.f32 %v814_v8, 0.0  ;;  %v818_v14 = vadd.f32 %v817_v35, %v745_v9 }
 0x151   : > { %v847_v15 = vmax.f32 %v816_v11, 0.0  ;;  %v820_v16 = vadd.f32 %v819_v36, %v747_v12 }
 0x152   : > { %v848_v17 = vmax.f32 %v818_v14, 0.0 }
 0x153   : > { %v1116_v18 = vpack.c.bf16 %v847_v15, %v846_v13  ;;  %v849_v20 = vmax.f32 %v820_v16, 0.0  ;;  %v750_v21 = vpop.f32.mrb[8].mxu1 }
 0x154   : > { %v751_v22 = vadd.f32 %v750_v21, %v426_v19  ;;  %v752_v23 = vpop.f32.mrb[9].mxu1 }
 0x155   : > { %908 = vst [vmem:[%s1544_s8 + $0x10] sm:$0xff] %v1116_v18  ;;  %v1117_v25 = vpack.c.bf16 %v849_v20, %v848_v17  ;;  %v753_v26 = vadd.f32 %v752_v23, %v426_v19  ;;  %v754_v27 = vpop.f32.mrb[10].mxu1 }
 0x156   : > { %v824_v28 = vadd.f32 %v823_v37, %v751_v22  ;;  %v755_v29 = vadd.f32 %v754_v27, %v431_v24  ;;  %v756_v30 = vpop.f32.mrb[11].mxu1 }
 0x157   : > { %909 = vst [vmem:[%s1544_s8 + $0x18] sm:$0xff] %v1117_v25  ;;  %v826_v31 = vadd.f32 %v1528_v38, %v753_v26  ;;  %v757_v32 = vadd.f32 %v756_v30, %v431_v24 }
 0x158   : > { %v850_v33 = vmax.f32 %v824_v28, 0.0  ;;  %v828_v34 = vadd.f32 %v1530_v39, %v755_v29 }
 0x159   : > { %v851_v35 = vmax.f32 %v826_v31, 0.0  ;;  %v830_v36 = vadd.f32 %v1532_v40, %v757_v32 }
 0x15a   : > { %v852_v45 = vmax.f32 %v828_v34, 0.0 }
 0x15b   : > { %v1118_v47 = vpack.c.bf16 %v851_v35, %v850_v33  ;;  %v853_v48 = vmax.f32 %v830_v36, 0.0  ;;  %v760_v49 = vpop.f32.mrb[12].mxu1 }
 0x15c   : > { %v761_v37 = vadd.f32 %v760_v49, %v436_v46  ;;  %v762_v50 = vpop.f32.mrb[13].mxu1 }
 0x15d   : > { %910 = vst [vmem:[%s1544_s8 + $0x20] sm:$0xff] %v1118_v47  ;;  %v1119_v52 = vpack.c.bf16 %v853_v48, %v852_v45  ;;  %v763_v38 = vadd.f32 %v762_v50, %v436_v46  ;;  %v764_v53 = vpop.f32.mrb[14].mxu1 }
 0x15e   : > { %v834_v39 = vadd.f32 %v1534_v41, %v761_v37  ;;  %v765_v54 = vadd.f32 %v764_v53, %v441_v51  ;;  %v766_v55 = vpop.f32.mrb[15].mxu1  ;;  %v965_v41 = vld [vmem:[%s1544_s8] sm:$0xff] (%p1329_p5) }
 0x15f   : > { %911 = vst [vmem:[%s1544_s8 + $0x28] sm:$0xff] %v1119_v52  ;;  %v836_v40 = vadd.f32 %v1536_v42, %v763_v38  ;;  %v767_v56 = vadd.f32 %v766_v55, %v441_v51  ;;  %v967_v42 = vld [vmem:[%s1544_s8 + $0x8] sm:$0xff] (%p1329_p5)  ;;  %966 = vst [vmem:[%s923_s10] sm:$0xff] (%p1329_p5), %v965_v41 }
 0x160   : > { %v854_v57 = vmax.f32 %v834_v39, 0.0  ;;  %v838_v58 = vadd.f32 %v1538_v43, %v765_v54  ;;  %v969_v43 = vld [vmem:[%s1544_s8 + $0x10] sm:$0xff] (%p1329_p5)  ;;  %968 = vst [vmem:[%s923_s10 + $0x10] sm:$0xff] (%p1329_p5), %v967_v42 }
 0x161   : > { %v855_v59 = vmax.f32 %v836_v40, 0.0  ;;  %v840_v60 = vadd.f32 %v1540_v44, %v767_v56  ;;  %920 = sbr.rel (!%p1329_p5) target bundleno = 368 (0x170), region = 74  ;;  %v971_v44 = vld [vmem:[%s1544_s8 + $0x18] sm:$0xff] (%p1329_p5)  ;;  %970 = vst [vmem:[%s923_s10 + $0x20] sm:$0xff] (%p1329_p5), %v969_v43 }
 0x162   : > { %v856_v61 = vmax.f32 %v838_v58, 0.0  ;;  %972 = vst [vmem:[%s923_s10 + $0x30] sm:$0xff] (%p1329_p5), %v971_v44 }
 0x163   : > { %v1120_v62 = vpack.c.bf16 %v855_v59, %v854_v57  ;;  %v857_v63 = vmax.f32 %v840_v60, 0.0 }
 0x164   : > { %v973_v1 = vld [vmem:[%s1544_s8 + $0x20] sm:$0xff] (%p1329_p5) }
 0x165   : > { %912 = vst [vmem:[%s1544_s8 + $0x30] sm:$0xff] %v1120_v62  ;;  %v1121_v0 = vpack.c.bf16 %v857_v63, %v856_v61  ;;  %974 = vst [vmem:[%s923_s10 + $0x40] sm:$0xff] (%p1329_p5), %v973_v1 }
 0x166   : > { %v975_v2 = vld [vmem:[%s1544_s8 + $0x28] sm:$0xff] (%p1329_p5) }
 0x167   : > { %913 = vst [vmem:[%s1544_s8 + $0x38] sm:$0xff] %v1121_v0  ;;  %976 = vst [vmem:[%s923_s10 + $0x50] sm:$0xff] (%p1329_p5), %v975_v2 }
 0x16c   : > { %v977_v3 = vld [vmem:[%s1544_s8 + $0x30] sm:$0xff] }
 0x16d   : > { %978 = vst [vmem:[%s923_s10 + $0x60] sm:$0xff] %v977_v3 }
 0x16e   : > { %v979_v4 = vld [vmem:[%s1544_s8 + $0x38] sm:$0xff] }
 0x16f   : > { %980 = vst [vmem:[%s923_s10 + $0x70] sm:$0xff] %v979_v4 }
 0x170 PF: > { %p10_p10 = scmp.ge.s32.totalorder %s1316_s16, 4   ;;  %s1591_s12 = smov %s1272_s13 }
 0x171   : > { %s1592_s13 = smov %s1327_s19  ;;  %s1593_s14 = smov %s1316_s16 }
 0x172   :  { %12 = sbr.rel (!%p10_p10) target bundleno = 2 (0x2), region = 143 }

// kernel: lightweight_autoencoder_forward.13
= control target key start
LH: loop header
LB: loop body
LE: loop exit
PB: predicated region body
PF: predicated region fallthrough
CT: control target
= control target key end

     0   :  { %s1277_s12 = smov 0   ;;  %s1279_s13 = smov 0   ;;  %s1581_s0 = inlined_call_operand.vmem [shape: bf16[4,144], index: 0, kind: input, shape index: {}]   ;;  %s1582_s1 = inlined_call_operand.vmem [shape: bf16[144,2048], index: 1, kind: input, shape index: {}]   ;;  %s1583_s2 = inlined_call_operand.vmem [shape: f32[4,1], index: 2, kind: input, shape index: {}]   ;;  %s1584_s3 = inlined_call_operand.vmem [shape: f32[4,2048], index: 3, kind: output, shape index: {}]  }
   0x1   :  { %s1281_s14 = smov 0  }
   0x2 LB: > { %s1083_s15 = sadd.s32 4294967295, %s1254_s14   ;;  %s1294_s16 = sadd.s32 1, %s1254_s14   ;;  %s1254_s14 = sphi %s1281_s14, %s1587_s14   ;;  %s1250_s13 = sphi %s1279_s13, %s1586_s13   ;;  %s1246_s12 = sphi %s1277_s12, %s1585_s12  }
   0x3   : > { %s38_s17 = ssub.s32 %s1254_s14, %s1294_s16  ;;  %s41_s18 = sadd.s32 1, %s1250_s13 }
   0x4   : > { %p39_p0 = scmp.eq.s32.totalorder %s38_s17, 0  ;;  %p48_p1 = scmp.ne.s32.totalorder %s1250_s13, %s1246_s12 }
   0x5   : > { %p49_p2 = scmp.eq.s32.totalorder %s1254_s14, 0  ;;  %p1086_p4 = scmp.ge.s32.totalorder %s1254_s14, 2 }
   0x6   : > { %s1303_s19 = scalar_select %p39_p0, %s1250_s13, %s41_s18  }
   0x7   : > { %p50_p3 = por %p49_p2, %p48_p1  ;;  %127 = sbr.rel (%p1086_p4) target bundleno = 55 (0x37), region = 24 }
   0xe   : > { %130 = sbr.rel (!%p50_p3) target bundleno = 55 (0x37), region = 28  ;;  %s132_s20 = sand.u32 (%p50_p3), 1, %s1250_s13  }
   0xf   : > { %s1171_s21 = sshll.u32 (%p50_p3), %s1254_s14, 5  ;;  %s1172_s22 = smul.u32 (%p50_p3), 576, %s132_s20 }
  0x10   : > { %s1311_s25 = scalar_lea.vmem (%p50_p3), %s1582_s1, %s1171_s21 }
  0x11   : > { %v150_v0 = vld [vmem:[%s1311_s25] sm:$0xff] (%p50_p3)  ;;  %v152_v1 = vld [vmem:[%s1311_s25 + $0x8] sm:$0xff] (%p50_p3)  ;;  %v154_v2 = vld [vmem:[%s1311_s25 + $0x10] sm:$0xff] (%p50_p3)  ;;  %s1319_s26 = scalar_lea.vmem (%p50_p3), [#allocation2], %s1172_s22 }
  0x12   : > { %v156_v3 = vld [vmem:[%s1311_s25 + $0x18] sm:$0xff] (%p50_p3)  ;;  %v158_v4 = vld [vmem:[%s1311_s25 + $0x40] sm:$0xff] (%p50_p3)  ;;  %v160_v5 = vld [vmem:[%s1311_s25 + $0x48] sm:$0xff] (%p50_p3)  ;;  %151 = vst [vmem:[%s1319_s26] sm:$0xff] (%p50_p3), %v150_v0 }
  0x13   : > { %153 = vst [vmem:[%s1319_s26 + $0x8] sm:$0xff] (%p50_p3), %v152_v1  ;;  %155 = vst [vmem:[%s1319_s26 + $0x10] sm:$0xff] (%p50_p3), %v154_v2  ;;  %v162_v6 = vld [vmem:[%s1311_s25 + $0x50] sm:$0xff] (%p50_p3)  ;;  %v164_v7 = vld [vmem:[%s1311_s25 + $0x58] sm:$0xff] (%p50_p3) }
  0x14   : > { %157 = vst [vmem:[%s1319_s26 + $0x18] sm:$0xff] (%p50_p3), %v156_v3  ;;  %159 = vst [vmem:[%s1319_s26 + $0x20] sm:$0xff] (%p50_p3), %v158_v4  ;;  %v166_v8 = vld [vmem:[%s1311_s25 + $0x80] sm:$0xff] (%p50_p3)  ;;  %v168_v9 = vld [vmem:[%s1311_s25 + $0x88] sm:$0xff] (%p50_p3) }
  0x15   : > { %161 = vst [vmem:[%s1319_s26 + $0x28] sm:$0xff] %v160_v5  ;;  %163 = vst [vmem:[%s1319_s26 + $0x30] sm:$0xff] %v162_v6  ;;  %v170_v10 = vld [vmem:[%s1311_s25 + $0x90] sm:$0xff]  ;;  %v172_v11 = vld [vmem:[%s1311_s25 + $0x98] sm:$0xff] }
  0x16   : > { %165 = vst [vmem:[%s1319_s26 + $0x38] sm:$0xff] %v164_v7  ;;  %167 = vst [vmem:[%s1319_s26 + $0x40] sm:$0xff] %v166_v8  ;;  %v174_v12 = vld [vmem:[%s1311_s25 + $0xc0] sm:$0xff]  ;;  %v176_v13 = vld [vmem:[%s1311_s25 + $0xc8] sm:$0xff] }
  0x17   : > { %169 = vst [vmem:[%s1319_s26 + $0x48] sm:$0xff] %v168_v9  ;;  %171 = vst [vmem:[%s1319_s26 + $0x50] sm:$0xff] %v170_v10  ;;  %v178_v14 = vld [vmem:[%s1311_s25 + $0xd0] sm:$0xff]  ;;  %v180_v15 = vld [vmem:[%s1311_s25 + $0xd8] sm:$0xff] }
  0x18   : > { %173 = vst [vmem:[%s1319_s26 + $0x58] sm:$0xff] %v172_v11  ;;  %175 = vst [vmem:[%s1319_s26 + $0x60] sm:$0xff] %v174_v12  ;;  %v182_v16 = vld [vmem:[%s1311_s25 + $0x100] sm:$0xff]  ;;  %v184_v17 = vld [vmem:[%s1311_s25 + $0x108] sm:$0xff] }
  0x19   : > { %177 = vst [vmem:[%s1319_s26 + $0x68] sm:$0xff] %v176_v13  ;;  %179 = vst [vmem:[%s1319_s26 + $0x70] sm:$0xff] %v178_v14  ;;  %v186_v18 = vld [vmem:[%s1311_s25 + $0x110] sm:$0xff]  ;;  %v188_v19 = vld [vmem:[%s1311_s25 + $0x118] sm:$0xff] }
  0x1a   : > { %181 = vst [vmem:[%s1319_s26 + $0x78] sm:$0xff] %v180_v15  ;;  %183 = vst [vmem:[%s1319_s26 + $0x80] sm:$0xff] %v182_v16  ;;  %v190_v20 = vld [vmem:[%s1311_s25 + $0x140] sm:$0xff]  ;;  %v192_v21 = vld [vmem:[%s1311_s25 + $0x148] sm:$0xff] }
  0x1b   : > { %185 = vst [vmem:[%s1319_s26 + $0x88] sm:$0xff] %v184_v17  ;;  %187 = vst [vmem:[%s1319_s26 + $0x90] sm:$0xff] %v186_v18  ;;  %v194_v22 = vld [vmem:[%s1311_s25 + $0x150] sm:$0xff]  ;;  %v196_v23 = vld [vmem:[%s1311_s25 + $0x158] sm:$0xff] }
  0x1c   : > { %189 = vst [vmem:[%s1319_s26 + $0x98] sm:$0xff] %v188_v19  ;;  %191 = vst [vmem:[%s1319_s26 + $0xa0] sm:$0xff] %v190_v20  ;;  %v198_v24 = vld [vmem:[%s1311_s25 + $0x180] sm:$0xff]  ;;  %v200_v25 = vld [vmem:[%s1311_s25 + $0x188] sm:$0xff] }
  0x1d   : > { %193 = vst [vmem:[%s1319_s26 + $0xa8] sm:$0xff] %v192_v21  ;;  %195 = vst [vmem:[%s1319_s26 + $0xb0] sm:$0xff] %v194_v22  ;;  %v202_v26 = vld [vmem:[%s1311_s25 + $0x190] sm:$0xff]  ;;  %v204_v27 = vld [vmem:[%s1311_s25 + $0x198] sm:$0xff] }
  0x1e   : > { %197 = vst [vmem:[%s1319_s26 + $0xb8] sm:$0xff] %v196_v23  ;;  %199 = vst [vmem:[%s1319_s26 + $0xc0] sm:$0xff] %v198_v24  ;;  %v206_v28 = vld [vmem:[%s1311_s25 + $0x1c0] sm:$0xff]  ;;  %v208_v29 = vld [vmem:[%s1311_s25 + $0x1c8] sm:$0xff] }
  0x1f   : > { %201 = vst [vmem:[%s1319_s26 + $0xc8] sm:$0xff] %v200_v25  ;;  %203 = vst [vmem:[%s1319_s26 + $0xd0] sm:$0xff] %v202_v26  ;;  %v210_v30 = vld [vmem:[%s1311_s25 + $0x1d0] sm:$0xff]  ;;  %v212_v31 = vld [vmem:[%s1311_s25 + $0x1d8] sm:$0xff] }
  0x20   : > { %205 = vst [vmem:[%s1319_s26 + $0xd8] sm:$0xff] %v204_v27  ;;  %207 = vst [vmem:[%s1319_s26 + $0xe0] sm:$0xff] %v206_v28  ;;  %v214_v32 = vld [vmem:[%s1311_s25 + $0x200] sm:$0xff]  ;;  %v216_v33 = vld [vmem:[%s1311_s25 + $0x208] sm:$0xff] }
  0x21   : > { %209 = vst [vmem:[%s1319_s26 + $0xe8] sm:$0xff] %v208_v29  ;;  %211 = vst [vmem:[%s1319_s26 + $0xf0] sm:$0xff] %v210_v30  ;;  %v218_v34 = vld [vmem:[%s1311_s25 + $0x210] sm:$0xff]  ;;  %v220_v35 = vld [vmem:[%s1311_s25 + $0x218] sm:$0xff] }
  0x22   : > { %213 = vst [vmem:[%s1319_s26 + $0xf8] sm:$0xff] %v212_v31  ;;  %215 = vst [vmem:[%s1319_s26 + $0x100] sm:$0xff] %v214_v32  ;;  %v222_v36 = vld [vmem:[%s1311_s25 + $0x240] sm:$0xff]  ;;  %v224_v37 = vld [vmem:[%s1311_s25 + $0x248] sm:$0xff] }
  0x23   : > { %217 = vst [vmem:[%s1319_s26 + $0x108] sm:$0xff] %v216_v33  ;;  %219 = vst [vmem:[%s1319_s26 + $0x110] sm:$0xff] %v218_v34  ;;  %v226_v38 = vld [vmem:[%s1311_s25 + $0x250] sm:$0xff]  ;;  %v228_v39 = vld [vmem:[%s1311_s25 + $0x258] sm:$0xff] }
  0x24   : > { %221 = vst [vmem:[%s1319_s26 + $0x118] sm:$0xff] %v220_v35  ;;  %223 = vst [vmem:[%s1319_s26 + $0x120] sm:$0xff] %v222_v36  ;;  %v230_v40 = vld [vmem:[%s1311_s25 + $0x280] sm:$0xff]  ;;  %v232_v41 = vld [vmem:[%s1311_s25 + $0x288] sm:$0xff] }
  0x25   : > { %225 = vst [vmem:[%s1319_s26 + $0x128] sm:$0xff] %v224_v37  ;;  %227 = vst [vmem:[%s1319_s26 + $0x130] sm:$0xff] %v226_v38  ;;  %v234_v42 = vld [vmem:[%s1311_s25 + $0x290] sm:$0xff]  ;;  %v236_v43 = vld [vmem:[%s1311_s25 + $0x298] sm:$0xff] }
  0x26   : > { %229 = vst [vmem:[%s1319_s26 + $0x138] sm:$0xff] %v228_v39  ;;  %231 = vst [vmem:[%s1319_s26 + $0x140] sm:$0xff] %v230_v40  ;;  %v238_v44 = vld [vmem:[%s1311_s25 + $0x2c0] sm:$0xff]  ;;  %v240_v45 = vld [vmem:[%s1311_s25 + $0x2c8] sm:$0xff] }
  0x27   : > { %233 = vst [vmem:[%s1319_s26 + $0x148] sm:$0xff] %v232_v41  ;;  %235 = vst [vmem:[%s1319_s26 + $0x150] sm:$0xff] %v234_v42  ;;  %v242_v46 = vld [vmem:[%s1311_s25 + $0x2d0] sm:$0xff]  ;;  %v244_v47 = vld [vmem:[%s1311_s25 + $0x2d8] sm:$0xff] }
  0x28   : > { %237 = vst [vmem:[%s1319_s26 + $0x158] sm:$0xff] %v236_v43  ;;  %239 = vst [vmem:[%s1319_s26 + $0x160] sm:$0xff] %v238_v44  ;;  %v246_v48 = vld [vmem:[%s1311_s25 + $0x300] sm:$0xff]  ;;  %v248_v49 = vld [vmem:[%s1311_s25 + $0x308] sm:$0xff] }
  0x29   : > { %241 = vst [vmem:[%s1319_s26 + $0x168] sm:$0xff] %v240_v45  ;;  %243 = vst [vmem:[%s1319_s26 + $0x170] sm:$0xff] %v242_v46  ;;  %v250_v50 = vld [vmem:[%s1311_s25 + $0x310] sm:$0xff]  ;;  %v252_v51 = vld [vmem:[%s1311_s25 + $0x318] sm:$0xff] }
  0x2a   : > { %245 = vst [vmem:[%s1319_s26 + $0x178] sm:$0xff] %v244_v47  ;;  %247 = vst [vmem:[%s1319_s26 + $0x180] sm:$0xff] %v246_v48  ;;  %v254_v52 = vld [vmem:[%s1311_s25 + $0x340] sm:$0xff]  ;;  %v256_v53 = vld [vmem:[%s1311_s25 + $0x348] sm:$0xff] }
  0x2b   : > { %249 = vst [vmem:[%s1319_s26 + $0x188] sm:$0xff] %v248_v49  ;;  %251 = vst [vmem:[%s1319_s26 + $0x190] sm:$0xff] %v250_v50  ;;  %v258_v54 = vld [vmem:[%s1311_s25 + $0x350] sm:$0xff]  ;;  %v260_v55 = vld [vmem:[%s1311_s25 + $0x358] sm:$0xff] }
  0x2c   : > { %253 = vst [vmem:[%s1319_s26 + $0x198] sm:$0xff] %v252_v51  ;;  %255 = vst [vmem:[%s1319_s26 + $0x1a0] sm:$0xff] %v254_v52  ;;  %v262_v56 = vld [vmem:[%s1311_s25 + $0x380] sm:$0xff]  ;;  %v264_v57 = vld [vmem:[%s1311_s25 + $0x388] sm:$0xff] }
  0x2d   : > { %257 = vst [vmem:[%s1319_s26 + $0x1a8] sm:$0xff] %v256_v53  ;;  %259 = vst [vmem:[%s1319_s26 + $0x1b0] sm:$0xff] %v258_v54  ;;  %v266_v58 = vld [vmem:[%s1311_s25 + $0x390] sm:$0xff]  ;;  %v268_v59 = vld [vmem:[%s1311_s25 + $0x398] sm:$0xff] }
  0x2e   : > { %261 = vst [vmem:[%s1319_s26 + $0x1b8] sm:$0xff] %v260_v55  ;;  %263 = vst [vmem:[%s1319_s26 + $0x1c0] sm:$0xff] %v262_v56  ;;  %v270_v60 = vld [vmem:[%s1311_s25 + $0x3c0] sm:$0xff]  ;;  %v272_v61 = vld [vmem:[%s1311_s25 + $0x3c8] sm:$0xff] }
  0x2f   : > { %265 = vst [vmem:[%s1319_s26 + $0x1c8] sm:$0xff] %v264_v57  ;;  %267 = vst [vmem:[%s1319_s26 + $0x1d0] sm:$0xff] %v266_v58  ;;  %v274_v62 = vld [vmem:[%s1311_s25 + $0x3d0] sm:$0xff]  ;;  %v276_v63 = vld [vmem:[%s1311_s25 + $0x3d8] sm:$0xff] }
  0x30   : > { %269 = vst [vmem:[%s1319_s26 + $0x1d8] sm:$0xff] %v268_v59  ;;  %271 = vst [vmem:[%s1319_s26 + $0x1e0] sm:$0xff] %v270_v60  ;;  %v278_v0 = vld [vmem:[%s1311_s25 + $0x400] sm:$0xff]  ;;  %v280_v1 = vld [vmem:[%s1311_s25 + $0x408] sm:$0xff] }
  0x31   : > { %273 = vst [vmem:[%s1319_s26 + $0x1e8] sm:$0xff] %v272_v61  ;;  %275 = vst [vmem:[%s1319_s26 + $0x1f0] sm:$0xff] %v274_v62  ;;  %v282_v2 = vld [vmem:[%s1311_s25 + $0x410] sm:$0xff]  ;;  %v284_v3 = vld [vmem:[%s1311_s25 + $0x418] sm:$0xff] }
  0x32   : > { %277 = vst [vmem:[%s1319_s26 + $0x1f8] sm:$0xff] %v276_v63  ;;  %279 = vst [vmem:[%s1319_s26 + $0x200] sm:$0xff] %v278_v0  ;;  %v286_v4 = vld [vmem:[%s1311_s25 + $0x440] sm:$0xff]  ;;  %v288_v5 = vld [vmem:[%s1311_s25 + $0x448] sm:$0xff] }
  0x33   : > { %281 = vst [vmem:[%s1319_s26 + $0x208] sm:$0xff] %v280_v1  ;;  %283 = vst [vmem:[%s1319_s26 + $0x210] sm:$0xff] %v282_v2  ;;  %v290_v6 = vld [vmem:[%s1311_s25 + $0x450] sm:$0xff]  ;;  %v292_v7 = vld [vmem:[%s1311_s25 + $0x458] sm:$0xff] }
  0x34   : > { %285 = vst [vmem:[%s1319_s26 + $0x218] sm:$0xff] %v284_v3  ;;  %287 = vst [vmem:[%s1319_s26 + $0x220] sm:$0xff] %v286_v4 }
  0x35   : > { %289 = vst [vmem:[%s1319_s26 + $0x228] sm:$0xff] %v288_v5  ;;  %291 = vst [vmem:[%s1319_s26 + $0x230] sm:$0xff] %v290_v6 }
  0x36   : > { %293 = vst [vmem:[%s1319_s26 + $0x238] sm:$0xff] %v292_v7 }
  0x37 PF: > { %p1089_p5 = scmp.ge.s32.totalorder %s1254_s14, 1  ;;  %p298_p6 = scmp.lt.s32.totalorder %s1254_s14, 3 }
  0x39   : > { %p299_p7 = pnand %p1089_p5, %p298_p6 }
  0x3a   : > { %s305_s27 = sand.u32 (!%p299_p7), 1, %s1246_s12   ;;  %v1465_v8 = vld.sshfl [vmem:[%s1581_s0] sm:$0x33 pattern:$0x76325410] (!%p299_p7)  ;;  %vm785_vm0 = vcmask (!%p299_p7), 130048  }
  0x3b   : > { %302 = sbr.rel (%p299_p7) target bundleno = 387 (0x183), region = 51  ;;  %v1469_v9 = vcombine.high (!%p299_p7), %v1465_v8, %v1465_v8  ;;  %v409_v10 = vld [vmem:[%s1583_s2] sm:$0xf] (!%p299_p7)  ;;  %v1256_v11 = vmov (!%p299_p7), 0   ;;  %s1090_s7 = sshll.u32 (!%p299_p7), %s1083_s15, 3 }
  0x3c   : > { %s1173_s30 = smul.u32 (!%p299_p7), 576, %s305_s27  ;;  %1199 = vset.pattern.permute.xlu0 (!%p299_p7), %v1256_v11  ;;  %p330_p8 = scmp.lt.s32.totalorder (!%p299_p7), %s1090_s7, 15 }
  0x3d   : > { %1165 = vmatprep.mubr.msk.bf16.mxu0 (!%p299_p7), %vm785_vm0, %v1469_v9  ;;  %1166 = vmatprep.mubr.msk.bf16.mxu1 (!%p299_p7), %vm785_vm0, %v1469_v9 }
  0x3e   : > { %s1478_s6 = scalar_lea.vmem (!%p299_p7), [#allocation2], %s1173_s30  ;;  %412 = vperm.xlu0 (!%p299_p7), %1199, %v409_v10  }
  0x3f   : > { %v337_v12 = vld [vmem:[%s1478_s6] sm:$0xff] (!%p299_p7)  ;;  %v338_v14 = vld [vmem:[%s1478_s6 + $0x8] sm:$0xff] (!%p299_p7) }
  0x40   : > { %v341_v13 = vld [vmem:[%s1478_s6 + $0x20] sm:$0xff] (!%p299_p7)  ;;  %v342_v16 = vld [vmem:[%s1478_s6 + $0x28] sm:$0xff] (!%p299_p7) }
  0x41   : > { %v1094_v15 = vcombine.high (!%p299_p7), %v337_v12, %v341_v13  ;;  %v1093_v17 = vcombine.low (!%p299_p7), %v337_v12, %v341_v13  ;;  %v345_v18 = vld [vmem:[%s1478_s6 + $0x40] sm:$0xff] (!%p299_p7)  ;;  %v1096_v20 = vcombine.high (!%p299_p7), %v338_v14, %v342_v16  ;;  %v1095_v21 = vcombine.low (!%p299_p7), %v338_v14, %v342_v16  ;;  %v346_v23 = vld [vmem:[%s1478_s6 + $0x48] sm:$0xff] (!%p299_p7) }
  0x42   : > { %v349_v19 = vld [vmem:[%s1478_s6 + $0x60] sm:$0xff]  ;;  %v350_v24 = vld [vmem:[%s1478_s6 + $0x68] sm:$0xff]  ;;  %s1589_s7 = smov (!%p330_p8, %s1090_s7), 15 }
  0x43   : > { %v1102_v22 = vcombine.high %v345_v18, %v349_v19  ;;  %v353_v25 = vld [vmem:[%s1478_s6 + $0x80] sm:$0xff]  ;;  %789 = vmatprep.subr.bf16.mxu0 %v1094_v15  ;;  %v1104_v26 = vcombine.high %v346_v23, %v350_v24  ;;  %v354_v28 = vld [vmem:[%s1478_s6 + $0x88] sm:$0xff]  ;;  %830 = vmatprep.subr.bf16.mxu1 %v1096_v20  ;;  %v1101_v30 = vcombine.low %v345_v18, %v349_v19  ;;  %v339_v20 = vld [vmem:[%s1478_s6 + $0x10] sm:$0xff]  ;;  %s1091_s8 = sshll.u32 %s1589_s7, 2 }
  0x44   : > { %v357_v27 = vld [vmem:[%s1478_s6 + $0xa0] sm:$0xff]  ;;  %v358_v29 = vld [vmem:[%s1478_s6 + $0xa8] sm:$0xff]  ;;  %790 = vmatpush1.bf16.msra.mxu0 %v1093_v17  ;;  %831 = vmatpush1.bf16.msra.mxu1 %v1095_v21  ;;  %v1103_v31 = vcombine.low %v346_v23, %v350_v24  ;;  %v343_v21 = vld [vmem:[%s1478_s6 + $0x30] sm:$0xff]  ;;  %s1565_s11 = scalar_lea.vmem %s1584_s3, %s1091_s8 }
  0x45   : > { %791 = vmatprep.subr.bf16.mxu0 %v1102_v22  ;;  %v1110_v32 = vcombine.high %v353_v25, %v357_v27  ;;  %832 = vmatprep.subr.bf16.mxu1 %v1104_v26  ;;  %v1112_v33 = vcombine.high %v354_v28, %v358_v29  ;;  %v361_v34 = vld [vmem:[%s1478_s6 + $0xc0] sm:$0xff]  ;;  %v362_v36 = vld [vmem:[%s1478_s6 + $0xc8] sm:$0xff]  ;;  %v1109_v38 = vcombine.low %v353_v25, %v357_v27  ;;  %v340_v22 = vld [vmem:[%s1478_s6 + $0x18] sm:$0xff] }
  0x46   : > { %v365_v35 = vld [vmem:[%s1478_s6 + $0xe0] sm:$0xff]  ;;  %v366_v37 = vld [vmem:[%s1478_s6 + $0xe8] sm:$0xff]  ;;  %v1111_v39 = vcombine.low %v354_v28, %v358_v29  ;;  %v344_v23 = vld [vmem:[%s1478_s6 + $0x38] sm:$0xff]  ;;  %v1098_v26 = vcombine.high %v339_v20, %v343_v21 }
  0x47   : > { %v1118_v40 = vcombine.high %v361_v34, %v365_v35  ;;  %v1120_v41 = vcombine.high %v362_v36, %v366_v37  ;;  %v369_v42 = vld [vmem:[%s1478_s6 + $0x100] sm:$0xff]  ;;  %v370_v44 = vld [vmem:[%s1478_s6 + $0x108] sm:$0xff]  ;;  %v1117_v46 = vcombine.low %v361_v34, %v365_v35  ;;  %v1119_v47 = vcombine.low %v362_v36, %v366_v37  ;;  %v347_v28 = vld [vmem:[%s1478_s6 + $0x50] sm:$0xff] }
  0x48   : > { %792 = vmatpush1.bf16.msra.mxu0 %v1101_v30  ;;  %833 = vmatpush1.bf16.msra.mxu1 %v1103_v31  ;;  %v373_v43 = vld [vmem:[%s1478_s6 + $0x120] sm:$0xff]  ;;  %v374_v45 = vld [vmem:[%s1478_s6 + $0x128] sm:$0xff]  ;;  %v1100_v27 = vcombine.high %v340_v22, %v344_v23  ;;  %v351_v29 = vld [vmem:[%s1478_s6 + $0x70] sm:$0xff] }
  0x49   : > { %793 = vmatprep.subr.bf16.mxu0 %v1110_v32  ;;  %834 = vmatprep.subr.bf16.mxu1 %v1112_v33  ;;  %v1126_v48 = vcombine.high %v369_v42, %v373_v43  ;;  %v1128_v49 = vcombine.high %v370_v44, %v374_v45  ;;  %v377_v50 = vld [vmem:[%s1478_s6 + $0x140] sm:$0xff]  ;;  %v378_v52 = vld [vmem:[%s1478_s6 + $0x148] sm:$0xff]  ;;  %v1125_v54 = vcombine.low %v369_v42, %v373_v43  ;;  %v348_v30 = vld [vmem:[%s1478_s6 + $0x58] sm:$0xff] }
  0x4a   : > { %v381_v51 = vld [vmem:[%s1478_s6 + $0x160] sm:$0xff]  ;;  %v382_v53 = vld [vmem:[%s1478_s6 + $0x168] sm:$0xff]  ;;  %v1127_v55 = vcombine.low %v370_v44, %v374_v45  ;;  %v352_v31 = vld [vmem:[%s1478_s6 + $0x78] sm:$0xff]  ;;  %v1097_v32 = vcombine.low %v339_v20, %v343_v21  ;;  %v1099_v33 = vcombine.low %v340_v22, %v344_v23  ;;  %v1106_v34 = vcombine.high %v347_v28, %v351_v29 }
  0x4b   : > { %v1134_v56 = vcombine.high %v377_v50, %v381_v51  ;;  %v1136_v57 = vcombine.high %v378_v52, %v382_v53  ;;  %v385_v58 = vld [vmem:[%s1478_s6 + $0x180] sm:$0xff]  ;;  %v386_v60 = vld [vmem:[%s1478_s6 + $0x188] sm:$0xff]  ;;  %v1133_v62 = vcombine.low %v377_v50, %v381_v51  ;;  %v1135_v63 = vcombine.low %v378_v52, %v382_v53  ;;  %v355_v36 = vld [vmem:[%s1478_s6 + $0x90] sm:$0xff] }
  0x4c   : > { %794 = vmatpush1.bf16.msra.mxu0 %v1109_v38  ;;  %835 = vmatpush1.bf16.msra.mxu1 %v1111_v39  ;;  %v389_v59 = vld [vmem:[%s1478_s6 + $0x1a0] sm:$0xff]  ;;  %v390_v61 = vld [vmem:[%s1478_s6 + $0x1a8] sm:$0xff]  ;;  %v1108_v35 = vcombine.high %v348_v30, %v352_v31  ;;  %v359_v37 = vld [vmem:[%s1478_s6 + $0xb0] sm:$0xff] }
  0x4d   : > { %795 = vmatprep.subr.bf16.mxu0 %v1118_v40  ;;  %836 = vmatprep.subr.bf16.mxu1 %v1120_v41  ;;  %v1142_v0 = vcombine.high %v385_v58, %v389_v59  ;;  %v1144_v1 = vcombine.high %v386_v60, %v390_v61  ;;  %v393_v2 = vld [vmem:[%s1478_s6 + $0x1c0] sm:$0xff]  ;;  %v394_v4 = vld [vmem:[%s1478_s6 + $0x1c8] sm:$0xff]  ;;  %v1141_v6 = vcombine.low %v385_v58, %v389_v59  ;;  %v356_v38 = vld [vmem:[%s1478_s6 + $0x98] sm:$0xff] }
  0x4e   : > { %v397_v3 = vld [vmem:[%s1478_s6 + $0x1e0] sm:$0xff]  ;;  %v398_v5 = vld [vmem:[%s1478_s6 + $0x1e8] sm:$0xff]  ;;  %v1143_v7 = vcombine.low %v386_v60, %v390_v61  ;;  %v360_v39 = vld [vmem:[%s1478_s6 + $0xb8] sm:$0xff]  ;;  %v1105_v40 = vcombine.low %v347_v28, %v351_v29  ;;  %v1107_v41 = vcombine.low %v348_v30, %v352_v31  ;;  %v1114_v42 = vcombine.high %v355_v36, %v359_v37 }
  0x4f   : > { %v1150_v10 = vcombine.high %v393_v2, %v397_v3  ;;  %v1152_v11 = vcombine.high %v394_v4, %v398_v5  ;;  %v401_v12 = vld [vmem:[%s1478_s6 + $0x200] sm:$0xff]  ;;  %v402_v14 = vld [vmem:[%s1478_s6 + $0x208] sm:$0xff]  ;;  %v1149_v16 = vcombine.low %v393_v2, %v397_v3  ;;  %v1151_v17 = vcombine.low %v394_v4, %v398_v5  ;;  %v363_v44 = vld [vmem:[%s1478_s6 + $0xd0] sm:$0xff] }
  0x50   : > { %796 = vmatpush1.bf16.msra.mxu0 %v1117_v46  ;;  %837 = vmatpush1.bf16.msra.mxu1 %v1119_v47  ;;  %v405_v13 = vld [vmem:[%s1478_s6 + $0x220] sm:$0xff]  ;;  %v406_v15 = vld [vmem:[%s1478_s6 + $0x228] sm:$0xff]  ;;  %v1116_v43 = vcombine.high %v356_v38, %v360_v39  ;;  %v367_v45 = vld [vmem:[%s1478_s6 + $0xf0] sm:$0xff] }
  0x51   : > { %797 = vmatprep.subr.bf16.mxu0 %v1126_v48  ;;  %838 = vmatprep.subr.bf16.mxu1 %v1128_v49  ;;  %v1158_v18 = vcombine.high %v401_v12, %v405_v13  ;;  %v1160_v19 = vcombine.high %v402_v14, %v406_v15  ;;  %v1157_v24 = vcombine.low %v401_v12, %v405_v13  ;;  %v364_v46 = vld [vmem:[%s1478_s6 + $0xd8] sm:$0xff]  ;;  %v371_v52 = vld [vmem:[%s1478_s6 + $0x110] sm:$0xff] }
  0x52   : > { %v1159_v25 = vcombine.low %v402_v14, %v406_v15  ;;  %v368_v47 = vld [vmem:[%s1478_s6 + $0xf8] sm:$0xff]  ;;  %v1113_v48 = vcombine.low %v355_v36, %v359_v37  ;;  %v1115_v49 = vcombine.low %v356_v38, %v360_v39  ;;  %v1122_v50 = vcombine.high %v363_v44, %v367_v45  ;;  %v375_v53 = vld [vmem:[%s1478_s6 + $0x130] sm:$0xff] }
  0x53   : > { %v1124_v51 = vcombine.high %v364_v46, %v368_v47  ;;  %v379_v59 = vld [vmem:[%s1478_s6 + $0x150] sm:$0xff]  ;;  %v380_v61 = vld [vmem:[%s1478_s6 + $0x158] sm:$0xff] }
  0x54   : > { %798 = vmatpush1.bf16.msra.mxu0 %v1125_v54  ;;  %839 = vmatpush1.bf16.msra.mxu1 %v1127_v55  ;;  %v372_v54 = vld [vmem:[%s1478_s6 + $0x118] sm:$0xff]  ;;  %v383_v60 = vld [vmem:[%s1478_s6 + $0x170] sm:$0xff] }
  0x55   : > { %799 = vmatprep.subr.bf16.mxu0 %v1134_v56  ;;  %840 = vmatprep.subr.bf16.mxu1 %v1136_v57  ;;  %v376_v55 = vld [vmem:[%s1478_s6 + $0x138] sm:$0xff]  ;;  %v1121_v56 = vcombine.low %v363_v44, %v367_v45  ;;  %v1130_v57 = vcombine.high %v371_v52, %v375_v53  ;;  %v387_v3 = vld [vmem:[%s1478_s6 + $0x190] sm:$0xff] }
  0x56   : > { %v1132_v58 = vcombine.high %v372_v54, %v376_v55  ;;  %v391_v4 = vld [vmem:[%s1478_s6 + $0x1b0] sm:$0xff]  ;;  %v388_v5 = vld [vmem:[%s1478_s6 + $0x198] sm:$0xff] }
  0x57   : > { %v395_v13 = vld [vmem:[%s1478_s6 + $0x1d0] sm:$0xff]  ;;  %v396_v15 = vld [vmem:[%s1478_s6 + $0x1d8] sm:$0xff] }
  0x58   : > { %800 = vmatpush1.bf16.msra.mxu0 %v1133_v62  ;;  %841 = vmatpush1.bf16.msra.mxu1 %v1135_v63  ;;  %v384_v62 = vld [vmem:[%s1478_s6 + $0x178] sm:$0xff]  ;;  %v1129_v63 = vcombine.low %v371_v52, %v375_v53  ;;  %v399_v14 = vld [vmem:[%s1478_s6 + $0x1f0] sm:$0xff] }
  0x59   : > { %801 = vmatprep.subr.bf16.mxu0 %v1142_v0  ;;  %842 = vmatprep.subr.bf16.mxu1 %v1144_v1  ;;  %v1131_v0 = vcombine.low %v372_v54, %v376_v55  ;;  %v1138_v1 = vcombine.high %v379_v59, %v383_v60  ;;  %v1140_v2 = vcombine.high %v380_v61, %v384_v62  ;;  %v403_v21 = vld [vmem:[%s1478_s6 + $0x210] sm:$0xff]  ;;  %v404_v23 = vld [vmem:[%s1478_s6 + $0x218] sm:$0xff] }
  0x5a   : > { %v407_v22 = vld [vmem:[%s1478_s6 + $0x230] sm:$0xff] }
  0x5b   : > { %v1161_v29 = vcombine.low %v403_v21, %v407_v22 }
  0x5c   : > { %802 = vmatpush1.bf16.msra.mxu0 %v1141_v6  ;;  %843 = vmatpush1.bf16.msra.mxu1 %v1143_v7  ;;  %v392_v6 = vld [vmem:[%s1478_s6 + $0x1b8] sm:$0xff]  ;;  %v1137_v7 = vcombine.low %v379_v59, %v383_v60 }
  0x5d   : > { %803 = vmatprep.subr.bf16.mxu0 %v1150_v10  ;;  %844 = vmatprep.subr.bf16.mxu1 %v1152_v11  ;;  %v1139_v10 = vcombine.low %v380_v61, %v384_v62  ;;  %v1146_v11 = vcombine.high %v387_v3, %v391_v4  ;;  %v1148_v12 = vcombine.high %v388_v5, %v392_v6 }
  0x60   : > { %804 = vmatpush1.bf16.msra.mxu0 %v1149_v16  ;;  %845 = vmatpush1.bf16.msra.mxu1 %v1151_v17  ;;  %v400_v16 = vld [vmem:[%s1478_s6 + $0x1f8] sm:$0xff]  ;;  %v1145_v17 = vcombine.low %v387_v3, %v391_v4 }
  0x61   : > { %805 = vmatprep.subr.bf16.mxu0 %v1158_v18  ;;  %846 = vmatprep.subr.bf16.mxu1 %v1160_v19  ;;  %v1147_v18 = vcombine.low %v388_v5, %v392_v6  ;;  %v1154_v19 = vcombine.high %v395_v13, %v399_v14  ;;  %v1156_v20 = vcombine.high %v396_v15, %v400_v16 }
  0x64   : > { %806 = vmatpush1.bf16.msra.mxu0 %v1157_v24  ;;  %847 = vmatpush1.bf16.msra.mxu1 %v1159_v25  ;;  %v408_v24 = vld [vmem:[%s1478_s6 + $0x238] sm:$0xff]  ;;  %v1153_v25 = vcombine.low %v395_v13, %v399_v14 }
  0x65   : > { %871 = vmatprep.subr.bf16.mxu0 %v1098_v26  ;;  %912 = vmatprep.subr.bf16.mxu1 %v1100_v27  ;;  %v1155_v26 = vcombine.low %v396_v15, %v400_v16  ;;  %v1162_v27 = vcombine.high %v403_v21, %v407_v22  ;;  %v1164_v28 = vcombine.high %v404_v23, %v408_v24 }
  0x66   : > { %v1163_v30 = vcombine.low %v404_v23, %v408_v24 }
  0x67   : > { %822 = vmatmul.mubr.bf16.vlgmr.msra.gmra.mrb[0].mxu0 %v1465_v8  ;;  %863 = vmatmul.mubr.bf16.vlgmr.msra.gmra.mrb[0].mxu1 %v1465_v8 }
  0x68   : > { %872 = vmatpush1.bf16.msra.mxu0 %v1097_v32  ;;  %913 = vmatpush1.bf16.msra.mxu1 %v1099_v33 }
  0x69   : > { %873 = vmatprep.subr.bf16.mxu0 %v1106_v34  ;;  %914 = vmatprep.subr.bf16.mxu1 %v1108_v35 }
  0x6a   : > { %1167 = vmatprep.mubr.msk.bf16.mxu0 %vm785_vm0, %v1469_v9  ;;  %1168 = vmatprep.mubr.msk.bf16.mxu1 %vm785_vm0, %v1469_v9  ;;  %v1123_v9 = vcombine.low %v364_v46, %v368_v47 }
  0x6c   : > { %874 = vmatpush1.bf16.msra.mxu0 %v1105_v40  ;;  %915 = vmatpush1.bf16.msra.mxu1 %v1107_v41 }
  0x6d   : > { %875 = vmatprep.subr.bf16.mxu0 %v1114_v42  ;;  %916 = vmatprep.subr.bf16.mxu1 %v1116_v43 }
  0x70   : > { %876 = vmatpush1.bf16.msra.mxu0 %v1113_v48  ;;  %917 = vmatpush1.bf16.msra.mxu1 %v1115_v49 }
  0x71   : > { %877 = vmatprep.subr.bf16.mxu0 %v1122_v50  ;;  %918 = vmatprep.subr.bf16.mxu1 %v1124_v51 }
  0x74   : > { %878 = vmatpush1.bf16.msra.mxu0 %v1121_v56  ;;  %919 = vmatpush1.bf16.msra.mxu1 %v1123_v9 }
  0x75   : > { %879 = vmatprep.subr.bf16.mxu0 %v1130_v57  ;;  %920 = vmatprep.subr.bf16.mxu1 %v1132_v58 }
  0x78   : > { %880 = vmatpush1.bf16.msra.mxu0 %v1129_v63  ;;  %921 = vmatpush1.bf16.msra.mxu1 %v1131_v0 }
  0x79   : > { %881 = vmatprep.subr.bf16.mxu0 %v1138_v1  ;;  %922 = vmatprep.subr.bf16.mxu1 %v1140_v2 }
  0x7c   : > { %882 = vmatpush1.bf16.msra.mxu0 %v1137_v7  ;;  %923 = vmatpush1.bf16.msra.mxu1 %v1139_v10 }
  0x7d   : > { %883 = vmatprep.subr.bf16.mxu0 %v1146_v11  ;;  %924 = vmatprep.subr.bf16.mxu1 %v1148_v12 }
  0x80   : > { %884 = vmatpush1.bf16.msra.mxu0 %v1145_v17  ;;  %925 = vmatpush1.bf16.msra.mxu1 %v1147_v18 }
  0x81   : > { %885 = vmatprep.subr.bf16.mxu0 %v1154_v19  ;;  %926 = vmatprep.subr.bf16.mxu1 %v1156_v20 }
  0x84   : > { %886 = vmatpush1.bf16.msra.mxu0 %v1153_v25  ;;  %927 = vmatpush1.bf16.msra.mxu1 %v1155_v26 }
  0x85   : > { %887 = vmatprep.subr.bf16.mxu0 %v1162_v27  ;;  %928 = vmatprep.subr.bf16.mxu1 %v1164_v28 }
  0x88   : > { %888 = vmatpush1.bf16.msra.mxu0 %v1161_v29  ;;  %929 = vmatpush1.bf16.msra.mxu1 %v1163_v30 }
  0x8b   : > { %904 = vmatmul.mubr.bf16.vlgmr.msra.gmra.mrb[4].mxu0 %v1465_v8  ;;  %945 = vmatmul.mubr.bf16.vlgmr.msra.gmra.mrb[4].mxu1 %v1465_v8 }
  0xbd   : > { %v413_v31 = vpop.permute.xlu0 %412 }
 0x13a   : > { %v823_v32 = vpop.f32.mrb[0].mxu0  ;;  %v864_v33 = vpop.f32.mrb[0].mxu1 }
 0x13b   : > { %v824_v34 = vadd.f32 %v823_v32, %v413_v31  ;;  %v825_v35 = vpop.f32.mrb[1].mxu0  ;;  %v865_v36 = vadd.f32 %v864_v33, %v413_v31  ;;  %v866_v38 = vpop.f32.mrb[1].mxu1 }
 0x13c   : > { %v826_v37 = vadd.f32 %v825_v35, %v413_v31  ;;  %v827_v39 = vpop.f32.mrb[2].mxu0  ;;  %v867_v41 = vadd.f32 %v866_v38, %v413_v31  ;;  %v868_v42 = vpop.f32.mrb[2].mxu1 }
 0x13d   : > { %v953_v40 = vsub.f32 0.0, %v824_v34  ;;  %v828_v43 = vpop.f32.mrb[3].mxu0  ;;  %v955_v44 = vsub.f32 0.0, %v865_v36  ;;  %v869_v46 = vpop.f32.mrb[3].mxu1 }
 0x13e   : > { %v954_v45 = vsub.f32 0.0, %v826_v37  ;;  %v956_v48 = vsub.f32 0.0, %v867_v41 }
 0x13f   : > { %v961_v47 = vmul.f32 1.442695, %v953_v40  ;;  %v965_v8 = vmul.f32 1.442695, %v955_v44 }
 0x140   : > { %v963_v49 = vmul.f32 1.442695, %v954_v45  ;;  %v967_v50 = vmul.f32 1.442695, %v956_v48 }
 0x141   : > { %1200 = vpow2.f32 %v961_v47 }
 0x142   : > { %1202 = vpow2.f32 %v965_v8 }
 0x143   : > { %1204 = vpow2.f32 %v963_v49 }
 0x144   : > { %1206 = vpow2.f32 %v967_v50 }
 0x14b   : > { %v1201_v51 = vpop.eup %1200 }
 0x14c   : > { %v1203_v52 = vpop.eup %1202  ;;  %v977_v53 = vadd.f32 1.0, %v1201_v51 }
 0x14d   : > { %v1205_v54 = vpop.eup %1204  ;;  %v979_v55 = vadd.f32 1.0, %v1203_v52 }
 0x14e   : > { %v1207_v56 = vpop.eup %1206  ;;  %1208 = vrcp.f32 %v977_v53  ;;  %v978_v9 = vadd.f32 1.0, %v1205_v54 }
 0x14f   : > { %1210 = vrcp.f32 %v979_v55  ;;  %v980_v57 = vadd.f32 1.0, %v1207_v56 }
 0x150   : > { %1212 = vrcp.f32 %v978_v9 }
 0x151   : > { %1214 = vrcp.f32 %v980_v57 }
 0x158   : > { %v1209_v58 = vpop.eup %1208 }
 0x159   : > { %v1211_v59 = vpop.eup %1210 }
 0x15a   : > { %v1213_v60 = vpop.eup %1212 }
 0x15b   : > { %v1215_v61 = vpop.eup %1214  ;;  %v1009_v62 = vcombine.low %v1209_v58, %v1213_v60 }
 0x15c   : > { %v1010_v63 = vcombine.low %v1211_v59, %v1215_v61 }
 0x15d   : > { %1017 = vst [vmem:[%s1565_s11] sm:$0xff] %v1009_v62 }
 0x15e   : > { %1018 = vst [vmem:[%s1565_s11 + $0x8] sm:$0xff] %v1010_v63  ;;  %v905_v0 = vpop.f32.mrb[4].mxu0  ;;  %v946_v2 = vpop.f32.mrb[4].mxu1 }
 0x15f   : > { %v906_v1 = vadd.f32 %v905_v0, %v413_v31  ;;  %v907_v3 = vpop.f32.mrb[5].mxu0  ;;  %v947_v4 = vadd.f32 %v946_v2, %v413_v31  ;;  %v948_v6 = vpop.f32.mrb[5].mxu1 }
 0x160   : > { %v908_v5 = vadd.f32 %v907_v3, %v413_v31  ;;  %v909_v7 = vpop.f32.mrb[6].mxu0  ;;  %v949_v11 = vadd.f32 %v948_v6, %v413_v31  ;;  %v950_v12 = vpop.f32.mrb[6].mxu1 }
 0x161   : > { %v957_v10 = vsub.f32 0.0, %v906_v1  ;;  %v910_v13 = vpop.f32.mrb[7].mxu0  ;;  %v959_v14 = vsub.f32 0.0, %v947_v4  ;;  %v951_v16 = vpop.f32.mrb[7].mxu1 }
 0x162   : > { %v958_v15 = vsub.f32 0.0, %v908_v5  ;;  %v960_v18 = vsub.f32 0.0, %v949_v11 }
 0x163   : > { %v969_v17 = vmul.f32 1.442695, %v957_v10  ;;  %v973_v19 = vmul.f32 1.442695, %v959_v14 }
 0x164   : > { %v971_v20 = vmul.f32 1.442695, %v958_v15  ;;  %v975_v21 = vmul.f32 1.442695, %v960_v18 }
 0x165   : > { %1216 = vpow2.f32 %v969_v17 }
 0x166   : > { %1218 = vpow2.f32 %v973_v19 }
 0x167   : > { %1220 = vpow2.f32 %v971_v20 }
 0x168   : > { %1222 = vpow2.f32 %v975_v21 }
 0x16f   : > { %v1217_v22 = vpop.eup %1216 }
 0x170   : > { %v1219_v23 = vpop.eup %1218  ;;  %v981_v24 = vadd.f32 1.0, %v1217_v22 }
 0x171   : > { %v1221_v25 = vpop.eup %1220  ;;  %v983_v26 = vadd.f32 1.0, %v1219_v23 }
 0x172   : > { %v1223_v27 = vpop.eup %1222  ;;  %1224 = vrcp.f32 %v981_v24  ;;  %v982_v28 = vadd.f32 1.0, %v1221_v25 }
 0x173   : > { %1226 = vrcp.f32 %v983_v26  ;;  %v984_v29 = vadd.f32 1.0, %v1223_v27 }
 0x174   : > { %1228 = vrcp.f32 %v982_v28 }
 0x175   : > { %1230 = vrcp.f32 %v984_v29 }
 0x17c   : > { %v1225_v30 = vpop.eup %1224 }
 0x17d   : > { %v1227_v31 = vpop.eup %1226 }
 0x17e   : > { %v1229_v32 = vpop.eup %1228 }
 0x17f   : > { %v1231_v33 = vpop.eup %1230  ;;  %v1011_v34 = vcombine.low %v1225_v30, %v1229_v32 }
 0x180   : > { %v1012_v35 = vcombine.low %v1227_v31, %v1231_v33 }
 0x181   : > { %1019 = vst [vmem:[%s1565_s11 + $0x10] sm:$0xff] %v1011_v34 }
 0x182   : > { %1020 = vst [vmem:[%s1565_s11 + $0x18] sm:$0xff] %v1012_v35 }
 0x183 PF: > { %p10_p9 = scmp.ge.s32.totalorder %s1294_s16, 4   ;;  %s1585_s12 = smov %s1250_s13 }
 0x184   : > { %s1586_s13 = smov %s1303_s19  ;;  %s1587_s14 = smov %s1294_s16 }
 0x185   :  { %12 = sbr.rel (!%p10_p9) target bundleno = 2 (0x2), region = 90 }

</bundles_post_ra>
